<compile_context>
chip_gen: v7x
topology: tpu7x:2x2x1
jax: 0.10.0
libtpu: 0.0.40
codegen_flags: <defaults>
</compile_context>

<pallas_src>
import functools
import math

import jax
import jax.numpy as jnp
from jax.experimental import pallas as pl
from jax.experimental.pallas import tpu as pltpu


# ------------------------------ tiling helpers --------------------------------

_TM, _TN, _TK = 512, 256, 512            # bf16 blocks; fits scoped VMEM defaults
_MXU_DTYPE = jnp.bfloat16                 # bf16 MXU operands, f32 accumulation
_ACT_DTYPE = jnp.bfloat16                 # inter-kernel activation dtype
_EPS = 1e-12


def _pick_tile(dim, target, base):
    """Largest tile <= target that divides dim and respects the (8,128) rule."""
    if dim <= target:
        return dim
    t = (target // base) * base
    while t >= base:
        if dim % t == 0:
            return t
        t -= base
    return dim


def _pick_batch_block(B, cap=8):
    """Largest divisor of B <= min(cap, B//2): amortizes per-step overhead while
    keeping grid extent >= 2 so both v7x TensorCores get work."""
    if B < 2:
        return 1
    target = max(1, min(cap, B // 2))
    for bb in range(target, 0, -1):
        if B % bb == 0:
            return bb
    return 1


def _apply_act(y, act):
    if act == "gelu":   # exact (erf) gelu, matching BERT
        return y * 0.5 * (1.0 + jax.lax.erf(y * (1.0 / math.sqrt(2.0))))
    if act == "tanh":
        return jnp.tanh(y)
    return y


def _ln(x, g, b, eps):
    mu = jnp.mean(x, axis=-1, keepdims=True)
    var = jnp.mean(jnp.square(x - mu), axis=-1, keepdims=True)
    return (x - mu) * jax.lax.rsqrt(var + eps) * g + b


def _mm(x, w, rhs_t=False):
    if x.dtype != _MXU_DTYPE:
        x = x.astype(_MXU_DTYPE)
    if w.dtype != _MXU_DTYPE:
        w = w.astype(_MXU_DTYPE)
    if rhs_t:   # x (m,k) @ w(n,k)^T -> (m,n), contracting on k of both
        return jax.lax.dot_general(x, w, (((1,), (1,)), ((), ())),
                                   preferred_element_type=jnp.float32)
    return jnp.dot(x, w, preferred_element_type=jnp.float32)


# ------------------------- tiled GEMM (+bias+act) kernel -----------------------

def _gemm_kernel(x_ref, w_ref, b_ref, o_ref, acc_ref, *, act, rhs_t):
    @pl.when(pl.program_id(2) == 0)
    def _():
        acc_ref[...] = jnp.zeros_like(acc_ref)

    acc_ref[...] += _mm(x_ref[...], w_ref[...], rhs_t)

    @pl.when(pl.program_id(2) == pl.num_programs(2) - 1)
    def _():
        y = acc_ref[...] + b_ref[...]
        o_ref[...] = _apply_act(y, act).astype(o_ref.dtype)


def gemm(x, w, b, act=None, rhs_t=False, out_dtype=_ACT_DTYPE):
    """y = act(x @ w + b).  x:(M,K); w:(K,N) or (N,K) if rhs_t (tied embedding)."""
    M, K = x.shape
    N = w.shape[0] if rhs_t else w.shape[1]
    tm = _pick_tile(M, _TM, 8)
    tn = _pick_tile(N, _TN, 128)
    tk = _pick_tile(K, _TK, 128)
    if rhs_t:
        w_spec = pl.BlockSpec((tn, tk), lambda i, j, k: (j, k))
    else:
        w_spec = pl.BlockSpec((tk, tn), lambda i, j, k: (k, j))
    return pl.pallas_call(
        functools.partial(_gemm_kernel, act=act, rhs_t=rhs_t),
        out_shape=jax.ShapeDtypeStruct((M, N), out_dtype),
        grid=(M // tm, N // tn, K // tk),
        in_specs=[pl.BlockSpec((tm, tk), lambda i, j, k: (i, k)),
                  w_spec,
                  pl.BlockSpec((1, tn), lambda i, j, k: (0, j))],
        out_specs=pl.BlockSpec((tm, tn), lambda i, j, k: (i, j)),
        scratch_shapes=[pltpu.VMEM((tm, tn), jnp.float32)],
        compiler_params=pltpu.CompilerParams(
            dimension_semantics=("parallel", "parallel", "arbitrary")),
    )(x, w, b.reshape(1, N))


# ------------------- tiled GEMM + bias [+act] [+residual] + LN -----------------

def _make_gemm_ln_kernel(act, has_residual, eps):
    def epilogue(acc, b, res, g, bb, o_ref):
        y = acc + b
        y = _apply_act(y, act)
        if res is not None:
            y = y + res.astype(jnp.float32)
        o_ref[...] = _ln(y, g, bb, eps).astype(o_ref.dtype)

    if has_residual:
        def kernel(x_ref, w_ref, b_ref, r_ref, g_ref, bb_ref, o_ref, acc_ref):
            @pl.when(pl.program_id(1) == 0)
            def _():
                acc_ref[...] = jnp.zeros_like(acc_ref)
            acc_ref[...] += _mm(x_ref[...], w_ref[...], False)
            @pl.when(pl.program_id(1) == pl.num_programs(1) - 1)
            def _():
                epilogue(acc_ref[...], b_ref[...], r_ref[...],
                         g_ref[...], bb_ref[...], o_ref)
    else:
        def kernel(x_ref, w_ref, b_ref, g_ref, bb_ref, o_ref, acc_ref):
            @pl.when(pl.program_id(1) == 0)
            def _():
                acc_ref[...] = jnp.zeros_like(acc_ref)
            acc_ref[...] += _mm(x_ref[...], w_ref[...], False)
            @pl.when(pl.program_id(1) == pl.num_programs(1) - 1)
            def _():
                epilogue(acc_ref[...], b_ref[...], None,
                         g_ref[...], bb_ref[...], o_ref)
    return kernel


def gemm_ln(x, w, b, ln_g, ln_b, residual=None, act=None, eps=_EPS,
            out_dtype=_ACT_DTYPE):
    """LN(act(x @ w + b) [+ residual]).  N (= LN axis) kept untiled."""
    M, K = x.shape
    N = w.shape[1]
    tm = _pick_tile(M, _TM, 8)
    tk = _pick_tile(K, _TK, 128)
    has_res = residual is not None
    kernel = _make_gemm_ln_kernel(act, has_res, eps)
    in_specs = [pl.BlockSpec((tm, tk), lambda i, k: (i, k)),
                pl.BlockSpec((tk, N), lambda i, k: (k, 0)),
                pl.BlockSpec((1, N), lambda i, k: (0, 0))]
    args = [x, w, b.reshape(1, N)]
    if has_res:
        in_specs.append(pl.BlockSpec((tm, N), lambda i, k: (i, 0)))
        args.append(residual)
    in_specs += [pl.BlockSpec((1, N), lambda i, k: (0, 0)),
                 pl.BlockSpec((1, N), lambda i, k: (0, 0))]
    args += [ln_g.reshape(1, N), ln_b.reshape(1, N)]
    return pl.pallas_call(
        kernel,
        out_shape=jax.ShapeDtypeStruct((M, N), out_dtype),
        grid=(M // tm, K // tk),
        in_specs=in_specs,
        out_specs=pl.BlockSpec((tm, N), lambda i, k: (i, 0)),
        scratch_shapes=[pltpu.VMEM((tm, N), jnp.float32)],
        compiler_params=pltpu.CompilerParams(
            dimension_semantics=("parallel", "arbitrary")),
    )(*args)


# --------------------------- standalone LayerNorm ------------------------------

def _ln_kernel(x_ref, g_ref, b_ref, o_ref, *, eps):
    o_ref[...] = _ln(x_ref[...].astype(jnp.float32), g_ref[...], b_ref[...],
                     eps).astype(o_ref.dtype)


def layer_norm(x, gamma, beta, eps=_EPS, out_dtype=_ACT_DTYPE):
    M, N = x.shape
    tm = _pick_tile(M, _TM, 8)
    return pl.pallas_call(
        functools.partial(_ln_kernel, eps=eps),
        out_shape=jax.ShapeDtypeStruct((M, N), out_dtype),
        grid=(M // tm,),
        in_specs=[pl.BlockSpec((tm, N), lambda i: (i, 0)),
                  pl.BlockSpec((1, N), lambda i: (0, 0)),
                  pl.BlockSpec((1, N), lambda i: (0, 0))],
        out_specs=pl.BlockSpec((tm, N), lambda i: (i, 0)),
        compiler_params=pltpu.CompilerParams(dimension_semantics=("parallel",)),
    )(x, gamma.reshape(1, N), beta.reshape(1, N))


# --------------------------------- attention -----------------------------------

def _make_attn_kernel(num_heads, head_dim, hidden, cross, has_mask):
    H = hidden

    def attend(q, k, v, mask):
        # q: (Bb,Sq,H); k,v: (Bb,Sk,H); mask: (Bb,1,Sk) or None.
        # 1/sqrt(head_dim) is pre-folded into the Q projection weights.
        # TODO(synk): for long sequences switch to online-softmax (flash) with
        #             Sk tiling; full (Sq,Sk) scores are fine at these sizes.
        outs = []
        for h in range(num_heads):
            sl = slice(h * head_dim, (h + 1) * head_dim)
            qh = q[..., sl].astype(_MXU_DTYPE)
            kh = k[..., sl].astype(_MXU_DTYPE)
            vh = v[..., sl].astype(_MXU_DTYPE)
            s = jnp.einsum('bqd,bkd->bqk', qh, kh,
                           preferred_element_type=jnp.float32)
            if mask is not None:
                s = s + mask
            s = s - jnp.max(s, axis=-1, keepdims=True)
            p = jnp.exp(s)
            p = p * pl.reciprocal(jnp.sum(p, axis=-1, keepdims=True), approx=True)
            outs.append(jnp.einsum('bqk,bkd->bqd', p.astype(_MXU_DTYPE), vh,
                                   preferred_element_type=jnp.float32))
        # TODO(synk): a fully heads-batched dot_general would remove this lane
        #             concatenate but needs a heads-leading relayout in-kernel.
        return jnp.concatenate(outs, axis=-1)

    if cross:
        if has_mask:
            def kernel(q_ref, c_ref, m_ref, o_ref):
                qp, cp = q_ref[...], c_ref[...]
                o_ref[...] = attend(qp[..., :H], cp[..., H:2 * H],
                                    cp[..., 2 * H:], m_ref[...]).astype(o_ref.dtype)
        else:
            def kernel(q_ref, c_ref, o_ref):
                qp, cp = q_ref[...], c_ref[...]
                o_ref[...] = attend(qp[..., :H], cp[..., H:2 * H],
                                    cp[..., 2 * H:], None).astype(o_ref.dtype)
    else:
        if has_mask:
            def kernel(qkv_ref, m_ref, o_ref):
                qkv = qkv_ref[...]
                o_ref[...] = attend(qkv[..., :H], qkv[..., H:2 * H],
                                    qkv[..., 2 * H:], m_ref[...]).astype(o_ref.dtype)
        else:
            def kernel(qkv_ref, o_ref):
                qkv = qkv_ref[...]
                o_ref[...] = attend(qkv[..., :H], qkv[..., H:2 * H],
                                    qkv[..., 2 * H:], None).astype(o_ref.dtype)
    return kernel


def self_attention(qkv, mask3, num_heads):
    """qkv: (B, S, 3H) packed projections; mask3: (B, 1, S) additive or None."""
    B, S, H3 = qkv.shape
    H = H3 // 3
    Bb = _pick_batch_block(B)
    kernel = _make_attn_kernel(num_heads, H // num_heads, H,
                               cross=False, has_mask=mask3 is not None)
    in_specs = [pl.BlockSpec((Bb, S, H3), lambda b: (b, 0, 0))]
    args = [qkv]
    if mask3 is not None:
        in_specs.append(pl.BlockSpec((Bb, 1, S), lambda b: (b, 0, 0)))
        args.append(mask3)
    return pl.pallas_call(
        kernel,
        out_shape=jax.ShapeDtypeStruct((B, S, H), _ACT_DTYPE),
        grid=(B // Bb,),
        in_specs=in_specs,
        out_specs=pl.BlockSpec((Bb, S, H), lambda b: (b, 0, 0)),
        compiler_params=pltpu.CompilerParams(dimension_semantics=("parallel",)),
    )(*args)


def cross_attention(q_qkv, ctx_qkv, mask3, num_heads):
    """Q taken from q_qkv (B,Sq,3H); K/V taken from ctx_qkv (B,Sk,3H)."""
    B, Sq, H3 = q_qkv.shape
    H = H3 // 3
    Sk = ctx_qkv.shape[1]
    Bb = _pick_batch_block(B)
    kernel = _make_attn_kernel(num_heads, H // num_heads, H,
                               cross=True, has_mask=mask3 is not None)
    in_specs = [pl.BlockSpec((Bb, Sq, H3), lambda b: (b, 0, 0)),
                pl.BlockSpec((Bb, Sk, H3), lambda b: (b, 0, 0))]
    args = [q_qkv, ctx_qkv]
    if mask3 is not None:
        in_specs.append(pl.BlockSpec((Bb, 1, Sk), lambda b: (b, 0, 0)))
        args.append(mask3)
    return pl.pallas_call(
        kernel,
        out_shape=jax.ShapeDtypeStruct((B, Sq, H), _ACT_DTYPE),
        grid=(B // Bb,),
        in_specs=in_specs,
        out_specs=pl.BlockSpec((Bb, Sq, H), lambda b: (b, 0, 0)),
        compiler_params=pltpu.CompilerParams(dimension_semantics=("parallel",)),
    )(*args)


# ------------------------ fused visual feature encoder -------------------------

def _visn_kernel(f_ref, p_ref, vw_ref, vb_ref, vg_ref, vbe_ref,
                 bw_ref, bb_ref, bg_ref, bbe_ref, o_ref, *, eps):
    x = _mm(f_ref[...], vw_ref[...], False) + vb_ref[...]
    x = _ln(x, vg_ref[...], vbe_ref[...], eps)
    y = _mm(p_ref[...], bw_ref[...], False) + bb_ref[...]
    y = _ln(y, bg_ref[...], bbe_ref[...], eps)
    o_ref[...] = (0.5 * (x + y)).astype(o_ref.dtype)


def visn_encoder_fwd(feats, boxes, p):
    B, O, F = feats.shape
    P = boxes.shape[-1]
    H = p["visn_w"].shape[1]
    M = B * O
    tm = _pick_tile(M, _TM, 8)
    vec = pl.BlockSpec((1, H), lambda i: (0, 0))
    return pl.pallas_call(
        functools.partial(_visn_kernel, eps=_EPS),
        out_shape=jax.ShapeDtypeStruct((M, H), _ACT_DTYPE),
        grid=(M // tm,),
        in_specs=[pl.BlockSpec((tm, F), lambda i: (i, 0)),
                  pl.BlockSpec((tm, P), lambda i: (i, 0)),
                  pl.BlockSpec((F, H), lambda i: (0, 0)), vec, vec, vec,
                  pl.BlockSpec((P, H), lambda i: (0, 0)), vec, vec, vec],
        out_specs=pl.BlockSpec((tm, H), lambda i: (i, 0)),
        compiler_params=pltpu.CompilerParams(dimension_semantics=("parallel",)),
    )(feats.reshape(M, F), boxes.reshape(M, P),
      p["visn_w"], p["visn_b"].reshape(1, H),
      p["visn_ln_g"].reshape(1, H), p["visn_ln_b"].reshape(1, H),
      p["box_w"], p["box_b"].reshape(1, H),
      p["box_ln_g"].reshape(1, H), p["box_ln_b"].reshape(1, H))


# --------------------------- model building blocks -----------------------------

def self_att_block(x_flat, B, S, mask3, att_p, out_p, nh):
    """BertSelfattLayer: fused QKV GEMM -> attention -> fused out+residual+LN."""
    H = x_flat.shape[-1]
    qkv = gemm(x_flat, att_p["qkv_w"], att_p["qkv_b"])
    ctx = self_attention(qkv.reshape(B, S, 3 * H), mask3, nh).reshape(B * S, H)
    return gemm_ln(ctx, out_p["w"], out_p["b"], out_p["ln_g"], out_p["ln_b"],
                   residual=x_flat)


def ffn_block(x_flat, f):
    """BertIntermediate (+gelu fused) + BertOutput (+residual+LN fused)."""
    inter = gemm(x_flat, f["inter_w"], f["inter_b"], act="gelu")
    return gemm_ln(inter, f["out_w"], f["out_b"], f["out_ln_g"], f["out_ln_b"],
                   residual=x_flat)


def bert_layer(x_flat, B, S, mask3, p, nh):
    x_flat = self_att_block(x_flat, B, S, mask3,
                            p["attn"]["att"], p["attn"]["out"], nh)
    return ffn_block(x_flat, p["ffn"])


def x_layer(lang, B, Sl, lmask3, visn, Sv, vmask3, p, nh):
    """LXRTXLayer: shared cross-attn both directions, self-attn, FFN."""
    H = lang.shape[-1]
    ca = p["cross_att"]
    # One fused (H,3H) projection per stream serves both cross directions.
    lang_qkv = gemm(lang, ca["qkv_w"], ca["qkv_b"]).reshape(B, Sl, 3 * H)
    visn_qkv = gemm(visn, ca["qkv_w"], ca["qkv_b"]).reshape(B, Sv, 3 * H)
    lang_ctx = cross_attention(lang_qkv, visn_qkv, vmask3, nh).reshape(B * Sl, H)
    visn_ctx = cross_attention(visn_qkv, lang_qkv, lmask3, nh).reshape(B * Sv, H)
    co = p["cross_out"]
    lang_att = gemm_ln(lang_ctx, co["w"], co["b"], co["ln_g"], co["ln_b"],
                       residual=lang)
    visn_att = gemm_ln(visn_ctx, co["w"], co["b"], co["ln_g"], co["ln_b"],
                       residual=visn)
    lang_att = self_att_block(lang_att, B, Sl, lmask3,
                              p["lang_self"]["att"], p["lang_self"]["out"], nh)
    visn_att = self_att_block(visn_att, B, Sv, vmask3,
                              p["visn_self"]["att"], p["visn_self"]["out"], nh)
    return ffn_block(lang_att, p["lang_ffn"]), ffn_block(visn_att, p["visn_ffn"])


def embeddings_fwd(input_ids, token_type_ids, p):
    B, S = input_ids.shape
    we = jnp.take(p["word_emb"], input_ids, axis=0)              # XLA gather (glue)
    pe = jnp.take(p["pos_emb"], jnp.arange(S), axis=0)[None, :, :]
    te = jnp.take(p["type_emb"], token_type_ids, axis=0)
    x = we + pe + te
    H = x.shape[-1]
    return layer_norm(x.reshape(B * S, H), p["ln_g"], p["ln_b"])   # (B*S, H) bf16


def xtec_forward(params, cfg, input_ids, token_type_ids=None, attention_mask=None,
                 visual_feats=None, pos=None):
    B, S = input_ids.shape
    O = visual_feats.shape[1]
    H = cfg["hidden"]
    nh = cfg["num_heads"]
    V = cfg["vocab"]
    if attention_mask is None:
        attention_mask = jnp.ones((B, S), jnp.float32)
    if token_type_ids is None:
        token_type_ids = jnp.zeros((B, S), jnp.int32)
    lang_mask3 = ((1.0 - attention_mask.astype(jnp.float32)) * -10000.0
                  ).reshape(B, 1, S)
    visn_mask3 = None   # no visual_attention_mask passed in XTECModel.forward

    x = embeddings_fwd(input_ids, token_type_ids, params["embeddings"])  # (B*S,H)
    vf = visn_encoder_fwd(visual_feats, pos, params["visn_fc"])          # (B*O,H)

    for p in params["l_layers"]:
        x = bert_layer(x, B, S, lang_mask3, p, nh)
    for p in params["r_layers"]:
        vf = bert_layer(vf, B, O, visn_mask3, p, nh)
    for p in params["x_layers"]:
        x, vf = x_layer(x, B, S, lang_mask3, vf, O, visn_mask3, p, nh)

    # Pooler + seq_relationship: microscopic GEMMs -> plain XLA (no launch cost,
    # no sub-128-lane masked stores).
    pooled_in = x.reshape(B, S, H)[:, 0, :].astype(jnp.float32)
    pooled = jnp.tanh(pooled_in @ params["pooler"]["w"] + params["pooler"]["b"])

    # BertPreTrainingHeads: transform (dense+gelu+LN fused), tied decoder
    # against the vocab-padded bf16 embedding matrix, seq head.
    cls = params["cls"]
    t = gemm_ln(x, cls["tr_w"], cls["tr_b"], cls["tr_ln_g"], cls["tr_ln_b"],
                act="gelu")
    scores = gemm(t, cls["dec_w"], cls["dec_b_p"], rhs_t=True,
                  out_dtype=jnp.float32)
    lang_prediction_scores = scores[:, :V].reshape(B, S, V)
    cross_relationship_score = pooled @ cls["seq_w"] + cls["seq_b"]
    return lang_prediction_scores, cross_relationship_score


# ------------------------------ parameter init ---------------------------------

def init_params(seed, cfg):
    base = jax.random.PRNGKey(seed)
    counter = [0]

    def nk():
        counter[0] += 1
        return jax.random.fold_in(base, counter[0])

    def wmat(shape):
        return (0.02 * jax.random.normal(nk(), shape)).astype(jnp.float32)

    def lin(din, dout):
        return wmat((din, dout)), jnp.zeros((dout,), jnp.float32)

    H, I, V = cfg["hidden"], cfg["intermediate"], cfg["vocab"]

    def attn_params():
        qw, qb = lin(H, H); kw, kb = lin(H, H); vw, vb = lin(H, H)
        return {"q_w": qw, "q_b": qb, "k_w": kw, "k_b": kb, "v_w": vw, "v_b": vb}

    def att_out_params():
        ww, bb = lin(H, H)
        return {"w": ww, "b": bb,
                "ln_g": jnp.ones((H,), jnp.float32),
                "ln_b": jnp.zeros((H,), jnp.float32)}

    def self_att_layer_params():
        return {"att": attn_params(), "out": att_out_params()}

    def ffn_params():
        iw, ib = lin(H, I)
        ow, ob = lin(I, H)
        return {"inter_w": iw, "inter_b": ib, "out_w": ow, "out_b": ob,
                "out_ln_g": jnp.ones((H,), jnp.float32),
                "out_ln_b": jnp.zeros((H,), jnp.float32)}

    def bert_layer_params():
        return {"attn": self_att_layer_params(), "ffn": ffn_params()}

    def x_layer_params():
        return {"cross_att": attn_params(), "cross_out": att_out_params(),
                "lang_self": self_att_layer_params(),
                "visn_self": self_att_layer_params(),
                "lang_ffn": ffn_params(), "visn_ffn": ffn_params()}

    word_emb = wmat((V, H)).at[0].set(0.0)  # padding_idx=0

    vw, vb = lin(cfg["visual_feat_dim"], H)
    bw, bb = lin(cfg["visual_pos_dim"], H)
    pw, pb = lin(H, H)
    tw, tb = lin(H, H)
    sw, sb = lin(H, 2)

    return {
        "embeddings": {
            "word_emb": word_emb,
            "pos_emb": wmat((cfg["max_pos"], H)),
            "type_emb": wmat((cfg["type_vocab"], H)),
            "ln_g": jnp.ones((H,), jnp.float32),
            "ln_b": jnp.zeros((H,), jnp.float32),
        },
        "visn_fc": {
            "visn_w": vw, "visn_b": vb,
            "visn_ln_g": jnp.ones((H,), jnp.float32),
            "visn_ln_b": jnp.zeros((H,), jnp.float32),
            "box_w": bw, "box_b": bb,
            "box_ln_g": jnp.ones((H,), jnp.float32),
            "box_ln_b": jnp.zeros((H,), jnp.float32),
        },
        "l_layers": [bert_layer_params() for _ in range(cfg["l_layers"])],
        "r_layers": [bert_layer_params() for _ in range(cfg["r_layers"])],
        "x_layers": [x_layer_params() for _ in range(cfg["x_layers"])],
        "pooler": {"w": pw, "b": pb},
        "cls": {"tr_w": tw, "tr_b": tb,
                "tr_ln_g": jnp.ones((H,), jnp.float32),
                "tr_ln_b": jnp.zeros((H,), jnp.float32),
                "dec_b": jnp.zeros((V,), jnp.float32),
                "seq_w": sw, "seq_b": sb},
    }


def prepare_params(params, cfg):
    """One-time (outside jit) weight prep:
      * fuse Q/K/V into (H,3H) with 1/sqrt(head_dim) folded into the Q columns,
      * cast every MXU weight matrix to bf16 (biases / LN params stay f32),
      * pad the tied-decoder vocab to a multiple of 256 (bf16) for tiling."""
    params = jax.tree_util.tree_map(lambda x: x, params)   # fresh containers
    nh = cfg["num_heads"]
    bf16 = jnp.bfloat16

    def fuse(a):
        H = a["q_w"].shape[0]
        scale = 1.0 / math.sqrt(H // nh)
        a["qkv_w"] = jnp.concatenate(
            [a["q_w"] * scale, a["k_w"], a["v_w"]], axis=1).astype(bf16)
        a["qkv_b"] = jnp.concatenate(
            [a["q_b"] * scale, a["k_b"], a["v_b"]], axis=0)

    def cast_out(o):
        o["w"] = o["w"].astype(bf16)

    def cast_ffn(f):
        f["inter_w"] = f["inter_w"].astype(bf16)
        f["out_w"] = f["out_w"].astype(bf16)

    for layer in params["l_layers"] + params["r_layers"]:
        fuse(layer["attn"]["att"])
        cast_out(layer["attn"]["out"])
        cast_ffn(layer["ffn"])
    for layer in params["x_layers"]:
        fuse(layer["cross_att"]); cast_out(layer["cross_out"])
        fuse(layer["lang_self"]["att"]); cast_out(layer["lang_self"]["out"])
        fuse(layer["visn_self"]["att"]); cast_out(layer["visn_self"]["out"])
        cast_ffn(layer["lang_ffn"]); cast_ffn(layer["visn_ffn"])

    vfc = params["visn_fc"]
    vfc["visn_w"] = vfc["visn_w"].astype(bf16)
    vfc["box_w"] = vfc["box_w"].astype(bf16)

    cls = params["cls"]
    cls["tr_w"] = cls["tr_w"].astype(bf16)
    # Tied decoder weights: pad rows so tn<=256 tiles the vocab axis (keeps the
    # rhs_t weight block small enough for v7x's 64 MiB VMEM); logits sliced back.
    we = params["embeddings"]["word_emb"]
    V = we.shape[0]
    Vp = ((V + 255) // 256) * 256
    pad = Vp - V
    cls["dec_w"] = jnp.pad(we, ((0, pad), (0, 0))).astype(bf16)
    cls["dec_b_p"] = jnp.pad(cls["dec_b"], (0, pad))
    return params


# ------------------------------------ main --------------------------------------

if __name__ == "__main__":
    cfg = dict(hidden=32, num_heads=4, intermediate=64, vocab=128, max_pos=64,
               type_vocab=2, l_layers=2, x_layers=1, r_layers=1,
               visual_feat_dim=16, visual_pos_dim=4)
    B, S, O = 2, 8, 4

    params = prepare_params(init_params(0, cfg), cfg)

    key = jax.random.PRNGKey(0)
    k_ids, k_feat, k_pos = jax.random.split(key, 3)
    input_ids = jax.random.randint(k_ids, (B, S), 0, cfg["vocab"], dtype=jnp.int32)
    token_type_ids = jnp.zeros((B, S), jnp.int32)
    attention_mask = jnp.ones((B, S), jnp.float32).at[1, -2:].set(0.0)  # pad 2 toks
    visual_feats = jax.random.normal(k_feat, (B, O, cfg["visual_feat_dim"]),
                                     jnp.float32)
    pos = jax.random.uniform(k_pos, (B, O, cfg["visual_pos_dim"]), jnp.float32)

    fwd = jax.jit(functools.partial(xtec_forward, params, cfg))
    lang_prediction_scores, cross_relationship_score = fwd(
        input_ids, token_type_ids, attention_mask, visual_feats, pos)
    jax.block_until_ready((lang_prediction_scores, cross_relationship_score))

    assert lang_prediction_scores.shape == (B, S, cfg["vocab"])
    assert cross_relationship_score.shape == (B, 2)
    assert bool(jnp.all(jnp.isfinite(lang_prediction_scores)))
    assert bool(jnp.all(jnp.isfinite(cross_relationship_score)))
    print("KERNEL_OK")
</pallas_src>

<mosaic_0001>
module attributes {stable_mosaic.version = 11 : i64} {
  func.func @_gemm_kernel(%arg0: i32, %arg1: i32, %arg2: i32, %arg3: memref<16x32xbf16, #tpu.memory_space<vmem>>, %arg4: memref<32x96xbf16, #tpu.memory_space<vmem>>, %arg5: memref<1x96xf32, #tpu.memory_space<vmem>>, %arg6: memref<16x96xbf16, #tpu.memory_space<vmem>>, %arg7: memref<16x96xf32, #tpu.memory_space<vmem>>) attributes {dimension_semantics = [#tpu.dimension_semantics<parallel>, #tpu.dimension_semantics<parallel>, #tpu.dimension_semantics<arbitrary>], iteration_bounds = array<i64: 1, 1, 1>, scalar_prefetch = 0 : i64, scratch_operands = 1 : i64, tpu.core_type = #tpu.core_type<tc>, window_params = [{transform_indices = @transform_0, window_bounds = array<i64: 16, 32>}, {transform_indices = @transform_1, window_bounds = array<i64: 32, 96>}, {transform_indices = @transform_2, window_bounds = array<i64: 1, 96>}, {transform_indices = @transform_3, window_bounds = array<i64: 16, 96>}]} {
    %c0_i32 = arith.constant 0 : i32
    %0 = arith.cmpi eq, %arg2, %c0_i32 : i32
    %1 = arith.extui %0 : i1 to i32
    %c0_i32_0 = arith.constant 0 : i32
    %2 = arith.cmpi ne, %1, %c0_i32_0 : i32
    scf.if %2 {
      %cst_10 = arith.constant 0.000000e+00 : f32
      %12 = vector.broadcast %cst_10 : f32 to vector<16x96xf32>
      %c0_11 = arith.constant 0 : index
      %c0_12 = arith.constant 0 : index
      %13 = vector.load %arg7[%c0_11, %c0_12] : memref<16x96xf32, #tpu.memory_space<vmem>>, vector<16x96xf32>
      tpu.vector_store %arg7[%c0_11, %c0_12], %12 {strides = array<i32>} : memref<16x96xf32, #tpu.memory_space<vmem>>, vector<16x96xf32>,
    } else {
    }
    %c0 = arith.constant 0 : index
    %c0_1 = arith.constant 0 : index
    %3 = vector.load %arg7[%c0, %c0_1] : memref<16x96xf32, #tpu.memory_space<vmem>>, vector<16x96xf32>
    %c0_2 = arith.constant 0 : index
    %c0_3 = arith.constant 0 : index
    %4 = vector.load %arg3[%c0_2, %c0_3] : memref<16x32xbf16, #tpu.memory_space<vmem>>, vector<16x32xbf16>
    %c0_4 = arith.constant 0 : index
    %c0_5 = arith.constant 0 : index
    %5 = vector.load %arg4[%c0_4, %c0_5] : memref<32x96xbf16, #tpu.memory_space<vmem>>, vector<32x96xbf16>
    %cst = arith.constant dense<0.000000e+00> : vector<16x96xf32>
    %6 = tpu.matmul %4, %5, %cst {dimension_numbers = #tpu.dot_dimension_numbers<[1], [0], [0], [1], [0, 0, 1, 1], [], []>} : vector<16x32xbf16>, vector<32x96xbf16>, vector<16x96xf32> -> vector<16x96xf32>
    %7 = arith.addf %3, %6 : vector<16x96xf32>
    %c0_6 = arith.constant 0 : index
    %c0_7 = arith.constant 0 : index
    %8 = vector.load %arg7[%c0_6, %c0_7] : memref<16x96xf32, #tpu.memory_space<vmem>>, vector<16x96xf32>
    tpu.vector_store %arg7[%c0_6, %c0_7], %7 {strides = array<i32>} : memref<16x96xf32, #tpu.memory_space<vmem>>, vector<16x96xf32>,
    %c0_i32_8 = arith.constant 0 : i32
    %9 = arith.cmpi eq, %arg2, %c0_i32_8 : i32
    %10 = arith.extui %9 : i1 to i32
    %c0_i32_9 = arith.constant 0 : i32
    %11 = arith.cmpi ne, %10, %c0_i32_9 : i32
    scf.if %11 {
      %c0_10 = arith.constant 0 : index
      %c0_11 = arith.constant 0 : index
      %12 = vector.load %arg7[%c0_10, %c0_11] : memref<16x96xf32, #tpu.memory_space<vmem>>, vector<16x96xf32>
      %c0_12 = arith.constant 0 : index
      %c0_13 = arith.constant 0 : index
      %13 = vector.load %arg5[%c0_12, %c0_13] : memref<1x96xf32, #tpu.memory_space<vmem>>, vector<1x96xf32>
      %14 = vector.broadcast %13 : vector<1x96xf32> to vector<16x96xf32>
      %15 = arith.addf %12, %14 : vector<16x96xf32>
      %16 = arith.truncf %15 : vector<16x96xf32> to vector<16x96xbf16>
      %c0_14 = arith.constant 0 : index
      %c0_15 = arith.constant 0 : index
      %17 = vector.load %arg6[%c0_14, %c0_15] : memref<16x96xbf16, #tpu.memory_space<vmem>>, vector<16x96xbf16>
      tpu.vector_store %arg6[%c0_14, %c0_15], %16 {strides = array<i32>} : memref<16x96xbf16, #tpu.memory_space<vmem>>, vector<16x96xbf16>,
    } else {
    }
    return
  }
  func.func @transform_0(%arg0: i32, %arg1: i32, %arg2: i32) -> (i32, i32) {
    %c0_i32 = arith.constant 0 : i32
    return %arg0, %arg2 : i32, i32
  }
  func.func @transform_1(%arg0: i32, %arg1: i32, %arg2: i32) -> (i32, i32) {
    %c0_i32 = arith.constant 0 : i32
    return %arg2, %arg1 : i32, i32
  }
  func.func @transform_2(%arg0: i32, %arg1: i32, %arg2: i32) -> (i32, i32) {
    %c0_i32 = arith.constant 0 : i32
    %c0_i32_0 = arith.constant 0 : i32
    return %c0_i32, %arg1 : i32, i32
  }
  func.func @transform_3(%arg0: i32, %arg1: i32, %arg2: i32) -> (i32, i32) {
    %c0_i32 = arith.constant 0 : i32
    return %arg0, %arg1 : i32, i32
  }
}

module attributes {stable_mosaic.version = 11 : i64} {
  func.func @_ln_kernel(%arg0: i32, %arg1: memref<16x32xf32, #tpu.memory_space<vmem>>, %arg2: memref<1x32xf32, #tpu.memory_space<vmem>>, %arg3: memref<1x32xf32, #tpu.memory_space<vmem>>, %arg4: memref<16x32xbf16, #tpu.memory_space<vmem>>) attributes {dimension_semantics = [#tpu.dimension_semantics<parallel>], iteration_bounds = array<i64: 1>, scalar_prefetch = 0 : i64, scratch_operands = 0 : i64, tpu.core_type = #tpu.core_type<tc>, window_params = [{transform_indices = @transform_0, window_bounds = array<i64: 16, 32>}, {pipeline_mode = #tpu.pipeline_mode<synchronous>, transform_indices = @transform_1, window_bounds = array<i64: 1, 32>}, {pipeline_mode = #tpu.pipeline_mode<synchronous>, transform_indices = @transform_2, window_bounds = array<i64: 1, 32>}, {transform_indices = @transform_3, window_bounds = array<i64: 16, 32>}]} {
    %c0 = arith.constant 0 : index
    %c0_0 = arith.constant 0 : index
    %0 = vector.load %arg1[%c0, %c0_0] : memref<16x32xf32, #tpu.memory_space<vmem>>, vector<16x32xf32>
    %c0_1 = arith.constant 0 : index
    %c0_2 = arith.constant 0 : index
    %1 = vector.load %arg2[%c0_1, %c0_2] : memref<1x32xf32, #tpu.memory_space<vmem>>, vector<1x32xf32>
    %c0_3 = arith.constant 0 : index
    %c0_4 = arith.constant 0 : index
    %2 = vector.load %arg3[%c0_3, %c0_4] : memref<1x32xf32, #tpu.memory_space<vmem>>, vector<1x32xf32>
    %cst = arith.constant dense<0.000000e+00> : vector<16xf32>
    %3 = vector.multi_reduction <add>, %0, %cst [1] : vector<16x32xf32> to vector<16xf32>
    %4 = vector.shape_cast %3 : vector<16xf32> to vector<16x1xf32>
    %cst_5 = arith.constant 3.200000e+01 : f32
    %5 = vector.broadcast %cst_5 : f32 to vector<16x1xf32>
    %6 = arith.divf %4, %5 : vector<16x1xf32>
    %7 = vector.broadcast %6 : vector<16x1xf32> to vector<16x32xf32>
    %8 = arith.subf %0, %7 : vector<16x32xf32>
    %9 = arith.mulf %8, %8 : vector<16x32xf32>
    %cst_6 = arith.constant dense<0.000000e+00> : vector<16xf32>
    %10 = vector.multi_reduction <add>, %9, %cst_6 [1] : vector<16x32xf32> to vector<16xf32>
    %11 = vector.shape_cast %10 : vector<16xf32> to vector<16x1xf32>
    %cst_7 = arith.constant 3.200000e+01 : f32
    %12 = vector.broadcast %cst_7 : f32 to vector<16x1xf32>
    %13 = arith.divf %11, %12 : vector<16x1xf32>
    %14 = vector.broadcast %6 : vector<16x1xf32> to vector<16x32xf32>
    %15 = arith.subf %0, %14 : vector<16x32xf32>
    %cst_8 = arith.constant 9.99999996E-13 : f32
    %16 = vector.broadcast %cst_8 : f32 to vector<16x1xf32>
    %17 = arith.addf %13, %16 : vector<16x1xf32>
    %18 = math.rsqrt %17 : vector<16x1xf32>
    %19 = vector.broadcast %18 : vector<16x1xf32> to vector<16x32xf32>
    %20 = arith.mulf %15, %19 : vector<16x32xf32>
    %21 = vector.broadcast %1 : vector<1x32xf32> to vector<16x32xf32>
    %22 = arith.mulf %20, %21 : vector<16x32xf32>
    %23 = vector.broadcast %2 : vector<1x32xf32> to vector<16x32xf32>
    %24 = arith.addf %22, %23 : vector<16x32xf32>
    %25 = arith.truncf %24 : vector<16x32xf32> to vector<16x32xbf16>
    %c0_9 = arith.constant 0 : index
    %c0_10 = arith.constant 0 : index
    %26 = vector.load %arg4[%c0_9, %c0_10] : memref<16x32xbf16, #tpu.memory_space<vmem>>, vector<16x32xbf16>
    tpu.vector_store %arg4[%c0_9, %c0_10], %25 {strides = array<i32>} : memref<16x32xbf16, #tpu.memory_space<vmem>>, vector<16x32xbf16>,
    return
  }
  func.func @transform_0(%arg0: i32) -> (i32, i32) {
    %c0_i32 = arith.constant 0 : i32
    %c0_i32_0 = arith.constant 0 : i32
    return %arg0, %c0_i32 : i32, i32
  }
  func.func @transform_1(%arg0: i32) -> (i32, i32) {
    %c0_i32 = arith.constant 0 : i32
    %c0_i32_0 = arith.constant 0 : i32
    %c0_i32_1 = arith.constant 0 : i32
    return %c0_i32, %c0_i32_0 : i32, i32
  }
  func.func @transform_2(%arg0: i32) -> (i32, i32) {
    %c0_i32 = arith.constant 0 : i32
    %c0_i32_0 = arith.constant 0 : i32
    %c0_i32_1 = arith.constant 0 : i32
    return %c0_i32, %c0_i32_0 : i32, i32
  }
  func.func @transform_3(%arg0: i32) -> (i32, i32) {
    %c0_i32 = arith.constant 0 : i32
    %c0_i32_0 = arith.constant 0 : i32
    return %arg0, %c0_i32 : i32, i32
  }
}

module attributes {stable_mosaic.version = 11 : i64} {
  func.func @kernel(%arg0: i32, %arg1: memref<1x8x96xbf16, #tpu.memory_space<vmem>>, %arg2: memref<1x1x8xf32, #tpu.memory_space<vmem>>, %arg3: memref<1x8x32xbf16, #tpu.memory_space<vmem>>) attributes {dimension_semantics = [#tpu.dimension_semantics<parallel>], iteration_bounds = array<i64: 2>, scalar_prefetch = 0 : i64, scratch_operands = 0 : i64, tpu.core_type = #tpu.core_type<tc>, window_params = [{transform_indices = @transform_0, window_bounds = array<i64: 1, 8, 96>}, {transform_indices = @transform_1, window_bounds = array<i64: 1, 1, 8>}, {transform_indices = @transform_2, window_bounds = array<i64: 1, 8, 32>}]} {
    %c0 = arith.constant 0 : index
    %c0_0 = arith.constant 0 : index
    %c0_1 = arith.constant 0 : index
    %0 = vector.load %arg1[%c0, %c0_0, %c0_1] : memref<1x8x96xbf16, #tpu.memory_space<vmem>>, vector<1x8x96xbf16>
    %1 = vector.extract_strided_slice %0 {offsets = [0, 0, 0], sizes = [1, 8, 32], strides = [1, 1, 1]} : vector<1x8x96xbf16> to vector<1x8x32xbf16>
    %2 = vector.extract_strided_slice %0 {offsets = [0, 0, 32], sizes = [1, 8, 32], strides = [1, 1, 1]} : vector<1x8x96xbf16> to vector<1x8x32xbf16>
    %3 = vector.extract_strided_slice %0 {offsets = [0, 0, 64], sizes = [1, 8, 32], strides = [1, 1, 1]} : vector<1x8x96xbf16> to vector<1x8x32xbf16>
    %c0_2 = arith.constant 0 : index
    %c0_3 = arith.constant 0 : index
    %c0_4 = arith.constant 0 : index
    %4 = vector.load %arg2[%c0_2, %c0_3, %c0_4] : memref<1x1x8xf32, #tpu.memory_space<vmem>>, vector<1x1x8xf32>
    %5 = vector.extract_strided_slice %1 {offsets = [0, 0, 0], sizes = [1, 8, 8], strides = [1, 1, 1]} : vector<1x8x32xbf16> to vector<1x8x8xbf16>
    %6 = vector.extract_strided_slice %2 {offsets = [0, 0, 0], sizes = [1, 8, 8], strides = [1, 1, 1]} : vector<1x8x32xbf16> to vector<1x8x8xbf16>
    %7 = vector.extract_strided_slice %3 {offsets = [0, 0, 0], sizes = [1, 8, 8], strides = [1, 1, 1]} : vector<1x8x32xbf16> to vector<1x8x8xbf16>
    "tpu.trace_start"() <{level = 10 : i32, message = "bqd,bkd->bqk"}> : () -> ()
    %cst = arith.constant dense<0.000000e+00> : vector<1x8x8xf32>
    %8 = tpu.matmul %5, %6, %cst {dimension_numbers = #tpu.dot_dimension_numbers<[2], [2], [1], [1], [0, 0, 0, 1, 1, 1], [0], [0]>} : vector<1x8x8xbf16>, vector<1x8x8xbf16>, vector<1x8x8xf32> -> vector<1x8x8xf32>
    "tpu.trace_stop"() : () -> ()
    %9 = vector.broadcast %4 : vector<1x1x8xf32> to vector<1x8x8xf32>
    %10 = arith.addf %8, %9 : vector<1x8x8xf32>
    %cst_5 = arith.constant dense<0xFF800000> : vector<1x8xf32>
    %11 = vector.multi_reduction <maximumf>, %10, %cst_5 [2] : vector<1x8x8xf32> to vector<1x8xf32>
    %12 = vector.shape_cast %11 : vector<1x8xf32> to vector<1x8x1xf32>
    %13 = vector.broadcast %12 : vector<1x8x1xf32> to vector<1x8x8xf32>
    %14 = arith.subf %10, %13 : vector<1x8x8xf32>
    %15 = math.exp %14 : vector<1x8x8xf32>
    %cst_6 = arith.constant dense<0.000000e+00> : vector<1x8xf32>
    %16 = vector.multi_reduction <add>, %15, %cst_6 [2] : vector<1x8x8xf32> to vector<1x8xf32>
    %17 = vector.shape_cast %16 : vector<1x8xf32> to vector<1x8x1xf32>
    %18 = tpu.reciprocal %17 {approx = true} : vector<1x8x1xf32> -> vector<1x8x1xf32>
    %19 = vector.broadcast %18 : vector<1x8x1xf32> to vector<1x8x8xf32>
    %20 = arith.mulf %15, %19 : vector<1x8x8xf32>
    %21 = arith.truncf %20 : vector<1x8x8xf32> to vector<1x8x8xbf16>
    "tpu.trace_start"() <{level = 10 : i32, message = "bqk,bkd->bqd"}> : () -> ()
    %cst_7 = arith.constant dense<0.000000e+00> : vector<1x8x8xf32>
    %22 = tpu.matmul %21, %7, %cst_7 {dimension_numbers = #tpu.dot_dimension_numbers<[2], [1], [1], [2], [0, 0, 0, 1, 1, 2], [0], [0]>} : vector<1x8x8xbf16>, vector<1x8x8xbf16>, vector<1x8x8xf32> -> vector<1x8x8xf32>
    "tpu.trace_stop"() : () -> ()
    %23 = vector.extract_strided_slice %1 {offsets = [0, 0, 8], sizes = [1, 8, 8], strides = [1, 1, 1]} : vector<1x8x32xbf16> to vector<1x8x8xbf16>
    %24 = vector.extract_strided_slice %2 {offsets = [0, 0, 8], sizes = [1, 8, 8], strides = [1, 1, 1]} : vector<1x8x32xbf16> to vector<1x8x8xbf16>
    %25 = vector.extract_strided_slice %3 {offsets = [0, 0, 8], sizes = [1, 8, 8], strides = [1, 1, 1]} : vector<1x8x32xbf16> to vector<1x8x8xbf16>
    "tpu.trace_start"() <{level = 10 : i32, message = "bqd,bkd->bqk"}> : () -> ()
    %cst_8 = arith.constant dense<0.000000e+00> : vector<1x8x8xf32>
    %26 = tpu.matmul %23, %24, %cst_8 {dimension_numbers = #tpu.dot_dimension_numbers<[2], [2], [1], [1], [0, 0, 0, 1, 1, 1], [0], [0]>} : vector<1x8x8xbf16>, vector<1x8x8xbf16>, vector<1x8x8xf32> -> vector<1x8x8xf32>
    "tpu.trace_stop"() : () -> ()
    %27 = vector.broadcast %4 : vector<1x1x8xf32> to vector<1x8x8xf32>
    %28 = arith.addf %26, %27 : vector<1x8x8xf32>
    %cst_9 = arith.constant dense<0xFF800000> : vector<1x8xf32>
    %29 = vector.multi_reduction <maximumf>, %28, %cst_9 [2] : vector<1x8x8xf32> to vector<1x8xf32>
    %30 = vector.shape_cast %29 : vector<1x8xf32> to vector<1x8x1xf32>
    %31 = vector.broadcast %30 : vector<1x8x1xf32> to vector<1x8x8xf32>
    %32 = arith.subf %28, %31 : vector<1x8x8xf32>
    %33 = math.exp %32 : vector<1x8x8xf32>
    %cst_10 = arith.constant dense<0.000000e+00> : vector<1x8xf32>
    %34 = vector.multi_reduction <add>, %33, %cst_10 [2] : vector<1x8x8xf32> to vector<1x8xf32>
    %35 = vector.shape_cast %34 : vector<1x8xf32> to vector<1x8x1xf32>
    %36 = tpu.reciprocal %35 {approx = true} : vector<1x8x1xf32> -> vector<1x8x1xf32>
    %37 = vector.broadcast %36 : vector<1x8x1xf32> to vector<1x8x8xf32>
    %38 = arith.mulf %33, %37 : vector<1x8x8xf32>
    %39 = arith.truncf %38 : vector<1x8x8xf32> to vector<1x8x8xbf16>
    "tpu.trace_start"() <{level = 10 : i32, message = "bqk,bkd->bqd"}> : () -> ()
    %cst_11 = arith.constant dense<0.000000e+00> : vector<1x8x8xf32>
    %40 = tpu.matmul %39, %25, %cst_11 {dimension_numbers = #tpu.dot_dimension_numbers<[2], [1], [1], [2], [0, 0, 0, 1, 1, 2], [0], [0]>} : vector<1x8x8xbf16>, vector<1x8x8xbf16>, vector<1x8x8xf32> -> vector<1x8x8xf32>
    "tpu.trace_stop"() : () -> ()
    %41 = vector.extract_strided_slice %1 {offsets = [0, 0, 16], sizes = [1, 8, 8], strides = [1, 1, 1]} : vector<1x8x32xbf16> to vector<1x8x8xbf16>
    %42 = vector.extract_strided_slice %2 {offsets = [0, 0, 16], sizes = [1, 8, 8], strides = [1, 1, 1]} : vector<1x8x32xbf16> to vector<1x8x8xbf16>
    %43 = vector.extract_strided_slice %3 {offsets = [0, 0, 16], sizes = [1, 8, 8], strides = [1, 1, 1]} : vector<1x8x32xbf16> to vector<1x8x8xbf16>
    "tpu.trace_start"() <{level = 10 : i32, message = "bqd,bkd->bqk"}> : () -> ()
    %cst_12 = arith.constant dense<0.000000e+00> : vector<1x8x8xf32>
    %44 = tpu.matmul %41, %42, %cst_12 {dimension_numbers = #tpu.dot_dimension_numbers<[2], [2], [1], [1], [0, 0, 0, 1, 1, 1], [0], [0]>} : vector<1x8x8xbf16>, vector<1x8x8xbf16>, vector<1x8x8xf32> -> vector<1x8x8xf32>
    "tpu.trace_stop"() : () -> ()
    %45 = vector.broadcast %4 : vector<1x1x8xf32> to vector<1x8x8xf32>
    %46 = arith.addf %44, %45 : vector<1x8x8xf32>
    %cst_13 = arith.constant dense<0xFF800000> : vector<1x8xf32>
    %47 = vector.multi_reduction <maximumf>, %46, %cst_13 [2] : vector<1x8x8xf32> to vector<1x8xf32>
    %48 = vector.shape_cast %47 : vector<1x8xf32> to vector<1x8x1xf32>
    %49 = vector.broadcast %48 : vector<1x8x1xf32> to vector<1x8x8xf32>
    %50 = arith.subf %46, %49 : vector<1x8x8xf32>
    %51 = math.exp %50 : vector<1x8x8xf32>
    %cst_14 = arith.constant dense<0.000000e+00> : vector<1x8xf32>
    %52 = vector.multi_reduction <add>, %51, %cst_14 [2] : vector<1x8x8xf32> to vector<1x8xf32>
    %53 = vector.shape_cast %52 : vector<1x8xf32> to vector<1x8x1xf32>
    %54 = tpu.reciprocal %53 {approx = true} : vector<1x8x1xf32> -> vector<1x8x1xf32>
    %55 = vector.broadcast %54 : vector<1x8x1xf32> to vector<1x8x8xf32>
    %56 = arith.mulf %51, %55 : vector<1x8x8xf32>
    %57 = arith.truncf %56 : vector<1x8x8xf32> to vector<1x8x8xbf16>
    "tpu.trace_start"() <{level = 10 : i32, message = "bqk,bkd->bqd"}> : () -> ()
    %cst_15 = arith.constant dense<0.000000e+00> : vector<1x8x8xf32>
    %58 = tpu.matmul %57, %43, %cst_15 {dimension_numbers = #tpu.dot_dimension_numbers<[2], [1], [1], [2], [0, 0, 0, 1, 1, 2], [0], [0]>} : vector<1x8x8xbf16>, vector<1x8x8xbf16>, vector<1x8x8xf32> -> vector<1x8x8xf32>
    "tpu.trace_stop"() : () -> ()
    %59 = vector.extract_strided_slice %1 {offsets = [0, 0, 24], sizes = [1, 8, 8], strides = [1, 1, 1]} : vector<1x8x32xbf16> to vector<1x8x8xbf16>
    %60 = vector.extract_strided_slice %2 {offsets = [0, 0, 24], sizes = [1, 8, 8], strides = [1, 1, 1]} : vector<1x8x32xbf16> to vector<1x8x8xbf16>
    %61 = vector.extract_strided_slice %3 {offsets = [0, 0, 24], sizes = [1, 8, 8], strides = [1, 1, 1]} : vector<1x8x32xbf16> to vector<1x8x8xbf16>
    "tpu.trace_start"() <{level = 10 : i32, message = "bqd,bkd->bqk"}> : () -> ()
    %cst_16 = arith.constant dense<0.000000e+00> : vector<1x8x8xf32>
    %62 = tpu.matmul %59, %60, %cst_16 {dimension_numbers = #tpu.dot_dimension_numbers<[2], [2], [1], [1], [0, 0, 0, 1, 1, 1], [0], [0]>} : vector<1x8x8xbf16>, vector<1x8x8xbf16>, vector<1x8x8xf32> -> vector<1x8x8xf32>
    "tpu.trace_stop"() : () -> ()
    %63 = vector.broadcast %4 : vector<1x1x8xf32> to vector<1x8x8xf32>
    %64 = arith.addf %62, %63 : vector<1x8x8xf32>
    %cst_17 = arith.constant dense<0xFF800000> : vector<1x8xf32>
    %65 = vector.multi_reduction <maximumf>, %64, %cst_17 [2] : vector<1x8x8xf32> to vector<1x8xf32>
    %66 = vector.shape_cast %65 : vector<1x8xf32> to vector<1x8x1xf32>
    %67 = vector.broadcast %66 : vector<1x8x1xf32> to vector<1x8x8xf32>
    %68 = arith.subf %64, %67 : vector<1x8x8xf32>
    %69 = math.exp %68 : vector<1x8x8xf32>
    %cst_18 = arith.constant dense<0.000000e+00> : vector<1x8xf32>
    %70 = vector.multi_reduction <add>, %69, %cst_18 [2] : vector<1x8x8xf32> to vector<1x8xf32>
    %71 = vector.shape_cast %70 : vector<1x8xf32> to vector<1x8x1xf32>
    %72 = tpu.reciprocal %71 {approx = true} : vector<1x8x1xf32> -> vector<1x8x1xf32>
    %73 = vector.broadcast %72 : vector<1x8x1xf32> to vector<1x8x8xf32>
    %74 = arith.mulf %69, %73 : vector<1x8x8xf32>
    %75 = arith.truncf %74 : vector<1x8x8xf32> to vector<1x8x8xbf16>
    "tpu.trace_start"() <{level = 10 : i32, message = "bqk,bkd->bqd"}> : () -> ()
    %cst_19 = arith.constant dense<0.000000e+00> : vector<1x8x8xf32>
    %76 = tpu.matmul %75, %61, %cst_19 {dimension_numbers = #tpu.dot_dimension_numbers<[2], [1], [1], [2], [0, 0, 0, 1, 1, 2], [0], [0]>} : vector<1x8x8xbf16>, vector<1x8x8xbf16>, vector<1x8x8xf32> -> vector<1x8x8xf32>
    "tpu.trace_stop"() : () -> ()
    %77 = tpu.concatenate %22, %40, %58, %76 in 2 : vector<1x8x8xf32>, vector<1x8x8xf32>, vector<1x8x8xf32>, vector<1x8x8xf32> -> vector<1x8x32xf32>
    %78 = arith.truncf %77 : vector<1x8x32xf32> to vector<1x8x32xbf16>
    %c0_20 = arith.constant 0 : index
    %c0_21 = arith.constant 0 : index
    %c0_22 = arith.constant 0 : index
    %79 = vector.load %arg3[%c0_20, %c0_21, %c0_22] : memref<1x8x32xbf16, #tpu.memory_space<vmem>>, vector<1x8x32xbf16>
    tpu.vector_store %arg3[%c0_20, %c0_21, %c0_22], %78 {strides = array<i32>} : memref<1x8x32xbf16, #tpu.memory_space<vmem>>, vector<1x8x32xbf16>,
    return
  }
  func.func @transform_0(%arg0: i32) -> (i32, i32, i32) {
    %c0_i32 = arith.constant 0 : i32
    %c0_i32_0 = arith.constant 0 : i32
    %c0_i32_1 = arith.constant 0 : i32
    return %arg0, %c0_i32, %c0_i32_0 : i32, i32, i32
  }
  func.func @transform_1(%arg0: i32) -> (i32, i32, i32) {
    %c0_i32 = arith.constant 0 : i32
    %c0_i32_0 = arith.constant 0 : i32
    %c0_i32_1 = arith.constant 0 : i32
    return %arg0, %c0_i32, %c0_i32_0 : i32, i32, i32
  }
  func.func @transform_2(%arg0: i32) -> (i32, i32, i32) {
    %c0_i32 = arith.constant 0 : i32
    %c0_i32_0 = arith.constant 0 : i32
    %c0_i32_1 = arith.constant 0 : i32
    return %arg0, %c0_i32, %c0_i32_0 : i32, i32, i32
  }
}

module attributes {stable_mosaic.version = 11 : i64} {
  func.func @kernel(%arg0: i32, %arg1: i32, %arg2: memref<16x32xbf16, #tpu.memory_space<vmem>>, %arg3: memref<32x32xbf16, #tpu.memory_space<vmem>>, %arg4: memref<1x32xf32, #tpu.memory_space<vmem>>, %arg5: memref<16x32xbf16, #tpu.memory_space<vmem>>, %arg6: memref<1x32xf32, #tpu.memory_space<vmem>>, %arg7: memref<1x32xf32, #tpu.memory_space<vmem>>, %arg8: memref<16x32xbf16, #tpu.memory_space<vmem>>, %arg9: memref<16x32xf32, #tpu.memory_space<vmem>>) attributes {dimension_semantics = [#tpu.dimension_semantics<parallel>, #tpu.dimension_semantics<arbitrary>], iteration_bounds = array<i64: 1, 1>, scalar_prefetch = 0 : i64, scratch_operands = 1 : i64, tpu.core_type = #tpu.core_type<tc>, window_params = [{transform_indices = @transform_0, window_bounds = array<i64: 16, 32>}, {transform_indices = @transform_1, window_bounds = array<i64: 32, 32>}, {pipeline_mode = #tpu.pipeline_mode<synchronous>, transform_indices = @transform_2, window_bounds = array<i64: 1, 32>}, {transform_indices = @transform_3, window_bounds = array<i64: 16, 32>}, {pipeline_mode = #tpu.pipeline_mode<synchronous>, transform_indices = @transform_4, window_bounds = array<i64: 1, 32>}, {pipeline_mode = #tpu.pipeline_mode<synchronous>, transform_indices = @transform_5, window_bounds = array<i64: 1, 32>}, {transform_indices = @transform_6, window_bounds = array<i64: 16, 32>}]} {
    %c0_i32 = arith.constant 0 : i32
    %0 = arith.cmpi eq, %arg1, %c0_i32 : i32
    %1 = arith.extui %0 : i1 to i32
    %c0_i32_0 = arith.constant 0 : i32
    %2 = arith.cmpi ne, %1, %c0_i32_0 : i32
    scf.if %2 {
      %cst_10 = arith.constant 0.000000e+00 : f32
      %12 = vector.broadcast %cst_10 : f32 to vector<16x32xf32>
      %c0_11 = arith.constant 0 : index
      %c0_12 = arith.constant 0 : index
      %13 = vector.load %arg9[%c0_11, %c0_12] : memref<16x32xf32, #tpu.memory_space<vmem>>, vector<16x32xf32>
      tpu.vector_store %arg9[%c0_11, %c0_12], %12 {strides = array<i32>} : memref<16x32xf32, #tpu.memory_space<vmem>>, vector<16x32xf32>,
    } else {
    }
    %c0 = arith.constant 0 : index
    %c0_1 = arith.constant 0 : index
    %3 = vector.load %arg9[%c0, %c0_1] : memref<16x32xf32, #tpu.memory_space<vmem>>, vector<16x32xf32>
    %c0_2 = arith.constant 0 : index
    %c0_3 = arith.constant 0 : index
    %4 = vector.load %arg2[%c0_2, %c0_3] : memref<16x32xbf16, #tpu.memory_space<vmem>>, vector<16x32xbf16>
    %c0_4 = arith.constant 0 : index
    %c0_5 = arith.constant 0 : index
    %5 = vector.load %arg3[%c0_4, %c0_5] : memref<32x32xbf16, #tpu.memory_space<vmem>>, vector<32x32xbf16>
    %cst = arith.constant dense<0.000000e+00> : vector<16x32xf32>
    %6 = tpu.matmul %4, %5, %cst {dimension_numbers = #tpu.dot_dimension_numbers<[1], [0], [0], [1], [0, 0, 1, 1], [], []>} : vector<16x32xbf16>, vector<32x32xbf16>, vector<16x32xf32> -> vector<16x32xf32>
    %7 = arith.addf %3, %6 : vector<16x32xf32>
    %c0_6 = arith.constant 0 : index
    %c0_7 = arith.constant 0 : index
    %8 = vector.load %arg9[%c0_6, %c0_7] : memref<16x32xf32, #tpu.memory_space<vmem>>, vector<16x32xf32>
    tpu.vector_store %arg9[%c0_6, %c0_7], %7 {strides = array<i32>} : memref<16x32xf32, #tpu.memory_space<vmem>>, vector<16x32xf32>,
    %c0_i32_8 = arith.constant 0 : i32
    %9 = arith.cmpi eq, %arg1, %c0_i32_8 : i32
    %10 = arith.extui %9 : i1 to i32
    %c0_i32_9 = arith.constant 0 : i32
    %11 = arith.cmpi ne, %10, %c0_i32_9 : i32
    scf.if %11 {
      %c0_10 = arith.constant 0 : index
      %c0_11 = arith.constant 0 : index
      %12 = vector.load %arg9[%c0_10, %c0_11] : memref<16x32xf32, #tpu.memory_space<vmem>>, vector<16x32xf32>
      %c0_12 = arith.constant 0 : index
      %c0_13 = arith.constant 0 : index
      %13 = vector.load %arg4[%c0_12, %c0_13] : memref<1x32xf32, #tpu.memory_space<vmem>>, vector<1x32xf32>
      %c0_14 = arith.constant 0 : index
      %c0_15 = arith.constant 0 : index
      %14 = vector.load %arg5[%c0_14, %c0_15] : memref<16x32xbf16, #tpu.memory_space<vmem>>, vector<16x32xbf16>
      %c0_16 = arith.constant 0 : index
      %c0_17 = arith.constant 0 : index
      %15 = vector.load %arg6[%c0_16, %c0_17] : memref<1x32xf32, #tpu.memory_space<vmem>>, vector<1x32xf32>
      %c0_18 = arith.constant 0 : index
      %c0_19 = arith.constant 0 : index
      %16 = vector.load %arg7[%c0_18, %c0_19] : memref<1x32xf32, #tpu.memory_space<vmem>>, vector<1x32xf32>
      %17 = vector.broadcast %13 : vector<1x32xf32> to vector<16x32xf32>
      %18 = arith.addf %12, %17 : vector<16x32xf32>
      %19 = arith.extf %14 : vector<16x32xbf16> to vector<16x32xf32>
      %20 = arith.addf %18, %19 : vector<16x32xf32>
      %cst_20 = arith.constant dense<0.000000e+00> : vector<16xf32>
      %21 = vector.multi_reduction <add>, %20, %cst_20 [1] : vector<16x32xf32> to vector<16xf32>
      %22 = vector.shape_cast %21 : vector<16xf32> to vector<16x1xf32>
      %cst_21 = arith.constant 3.200000e+01 : f32
      %23 = vector.broadcast %cst_21 : f32 to vector<16x1xf32>
      %24 = arith.divf %22, %23 : vector<16x1xf32>
      %25 = vector.broadcast %24 : vector<16x1xf32> to vector<16x32xf32>
      %26 = arith.subf %20, %25 : vector<16x32xf32>
      %27 = arith.mulf %26, %26 : vector<16x32xf32>
      %cst_22 = arith.constant dense<0.000000e+00> : vector<16xf32>
      %28 = vector.multi_reduction <add>, %27, %cst_22 [1] : vector<16x32xf32> to vector<16xf32>
      %29 = vector.shape_cast %28 : vector<16xf32> to vector<16x1xf32>
      %cst_23 = arith.constant 3.200000e+01 : f32
      %30 = vector.broadcast %cst_23 : f32 to vector<16x1xf32>
      %31 = arith.divf %29, %30 : vector<16x1xf32>
      %32 = vector.broadcast %24 : vector<16x1xf32> to vector<16x32xf32>
      %33 = arith.subf %20, %32 : vector<16x32xf32>
      %cst_24 = arith.constant 9.99999996E-13 : f32
      %34 = vector.broadcast %cst_24 : f32 to vector<16x1xf32>
      %35 = arith.addf %31, %34 : vector<16x1xf32>
      %36 = math.rsqrt %35 : vector<16x1xf32>
      %37 = vector.broadcast %36 : vector<16x1xf32> to vector<16x32xf32>
      %38 = arith.mulf %33, %37 : vector<16x32xf32>
      %39 = vector.broadcast %15 : vector<1x32xf32> to vector<16x32xf32>
      %40 = arith.mulf %38, %39 : vector<16x32xf32>
      %41 = vector.broadcast %16 : vector<1x32xf32> to vector<16x32xf32>
      %42 = arith.addf %40, %41 : vector<16x32xf32>
      %43 = arith.truncf %42 : vector<16x32xf32> to vector<16x32xbf16>
      %c0_25 = arith.constant 0 : index
      %c0_26 = arith.constant 0 : index
      %44 = vector.load %arg8[%c0_25, %c0_26] : memref<16x32xbf16, #tpu.memory_space<vmem>>, vector<16x32xbf16>
      tpu.vector_store %arg8[%c0_25, %c0_26], %43 {strides = array<i32>} : memref<16x32xbf16, #tpu.memory_space<vmem>>, vector<16x32xbf16>,
    } else {
    }
    return
  }
  func.func @transform_0(%arg0: i32, %arg1: i32) -> (i32, i32) {
    %c0_i32 = arith.constant 0 : i32
    return %arg0, %arg1 : i32, i32
  }
  func.func @transform_1(%arg0: i32, %arg1: i32) -> (i32, i32) {
    %c0_i32 = arith.constant 0 : i32
    %c0_i32_0 = arith.constant 0 : i32
    return %arg1, %c0_i32 : i32, i32
  }
  func.func @transform_2(%arg0: i32, %arg1: i32) -> (i32, i32) {
    %c0_i32 = arith.constant 0 : i32
    %c0_i32_0 = arith.constant 0 : i32
    %c0_i32_1 = arith.constant 0 : i32
    return %c0_i32, %c0_i32_0 : i32, i32
  }
  func.func @transform_3(%arg0: i32, %arg1: i32) -> (i32, i32) {
    %c0_i32 = arith.constant 0 : i32
    %c0_i32_0 = arith.constant 0 : i32
    return %arg0, %c0_i32 : i32, i32
  }
  func.func @transform_4(%arg0: i32, %arg1: i32) -> (i32, i32) {
    %c0_i32 = arith.constant 0 : i32
    %c0_i32_0 = arith.constant 0 : i32
    %c0_i32_1 = arith.constant 0 : i32
    return %c0_i32, %c0_i32_0 : i32, i32
  }
  func.func @transform_5(%arg0: i32, %arg1: i32) -> (i32, i32) {
    %c0_i32 = arith.constant 0 : i32
    %c0_i32_0 = arith.constant 0 : i32
    %c0_i32_1 = arith.constant 0 : i32
    return %c0_i32, %c0_i32_0 : i32, i32
  }
  func.func @transform_6(%arg0: i32, %arg1: i32) -> (i32, i32) {
    %c0_i32 = arith.constant 0 : i32
    %c0_i32_0 = arith.constant 0 : i32
    return %arg0, %c0_i32 : i32, i32
  }
}

module attributes {stable_mosaic.version = 11 : i64} {
  func.func @kernel(%arg0: i32, %arg1: i32, %arg2: memref<16x64xbf16, #tpu.memory_space<vmem>>, %arg3: memref<64x32xbf16, #tpu.memory_space<vmem>>, %arg4: memref<1x32xf32, #tpu.memory_space<vmem>>, %arg5: memref<16x32xbf16, #tpu.memory_space<vmem>>, %arg6: memref<1x32xf32, #tpu.memory_space<vmem>>, %arg7: memref<1x32xf32, #tpu.memory_space<vmem>>, %arg8: memref<16x32xbf16, #tpu.memory_space<vmem>>, %arg9: memref<16x32xf32, #tpu.memory_space<vmem>>) attributes {dimension_semantics = [#tpu.dimension_semantics<parallel>, #tpu.dimension_semantics<arbitrary>], iteration_bounds = array<i64: 1, 1>, scalar_prefetch = 0 : i64, scratch_operands = 1 : i64, tpu.core_type = #tpu.core_type<tc>, window_params = [{transform_indices = @transform_0, window_bounds = array<i64: 16, 64>}, {transform_indices = @transform_1, window_bounds = array<i64: 64, 32>}, {pipeline_mode = #tpu.pipeline_mode<synchronous>, transform_indices = @transform_2, window_bounds = array<i64: 1, 32>}, {transform_indices = @transform_3, window_bounds = array<i64: 16, 32>}, {pipeline_mode = #tpu.pipeline_mode<synchronous>, transform_indices = @transform_4, window_bounds = array<i64: 1, 32>}, {pipeline_mode = #tpu.pipeline_mode<synchronous>, transform_indices = @transform_5, window_bounds = array<i64: 1, 32>}, {transform_indices = @transform_6, window_bounds = array<i64: 16, 32>}]} {
    %c0_i32 = arith.constant 0 : i32
    %0 = arith.cmpi eq, %arg1, %c0_i32 : i32
    %1 = arith.extui %0 : i1 to i32
    %c0_i32_0 = arith.constant 0 : i32
    %2 = arith.cmpi ne, %1, %c0_i32_0 : i32
    scf.if %2 {
      %cst_10 = arith.constant 0.000000e+00 : f32
      %12 = vector.broadcast %cst_10 : f32 to vector<16x32xf32>
      %c0_11 = arith.constant 0 : index
      %c0_12 = arith.constant 0 : index
      %13 = vector.load %arg9[%c0_11, %c0_12] : memref<16x32xf32, #tpu.memory_space<vmem>>, vector<16x32xf32>
      tpu.vector_store %arg9[%c0_11, %c0_12], %12 {strides = array<i32>} : memref<16x32xf32, #tpu.memory_space<vmem>>, vector<16x32xf32>,
    } else {
    }
    %c0 = arith.constant 0 : index
    %c0_1 = arith.constant 0 : index
    %3 = vector.load %arg9[%c0, %c0_1] : memref<16x32xf32, #tpu.memory_space<vmem>>, vector<16x32xf32>
    %c0_2 = arith.constant 0 : index
    %c0_3 = arith.constant 0 : index
    %4 = vector.load %arg2[%c0_2, %c0_3] : memref<16x64xbf16, #tpu.memory_space<vmem>>, vector<16x64xbf16>
    %c0_4 = arith.constant 0 : index
    %c0_5 = arith.constant 0 : index
    %5 = vector.load %arg3[%c0_4, %c0_5] : memref<64x32xbf16, #tpu.memory_space<vmem>>, vector<64x32xbf16>
    %cst = arith.constant dense<0.000000e+00> : vector<16x32xf32>
    %6 = tpu.matmul %4, %5, %cst {dimension_numbers = #tpu.dot_dimension_numbers<[1], [0], [0], [1], [0, 0, 1, 1], [], []>} : vector<16x64xbf16>, vector<64x32xbf16>, vector<16x32xf32> -> vector<16x32xf32>
    %7 = arith.addf %3, %6 : vector<16x32xf32>
    %c0_6 = arith.constant 0 : index
    %c0_7 = arith.constant 0 : index
    %8 = vector.load %arg9[%c0_6, %c0_7] : memref<16x32xf32, #tpu.memory_space<vmem>>, vector<16x32xf32>
    tpu.vector_store %arg9[%c0_6, %c0_7], %7 {strides = array<i32>} : memref<16x32xf32, #tpu.memory_space<vmem>>, vector<16x32xf32>,
    %c0_i32_8 = arith.constant 0 : i32
    %9 = arith.cmpi eq, %arg1, %c0_i32_8 : i32
    %10 = arith.extui %9 : i1 to i32
    %c0_i32_9 = arith.constant 0 : i32
    %11 = arith.cmpi ne, %10, %c0_i32_9 : i32
    scf.if %11 {
      %c0_10 = arith.constant 0 : index
      %c0_11 = arith.constant 0 : index
      %12 = vector.load %arg9[%c0_10, %c0_11] : memref<16x32xf32, #tpu.memory_space<vmem>>, vector<16x32xf32>
      %c0_12 = arith.constant 0 : index
      %c0_13 = arith.constant 0 : index
      %13 = vector.load %arg4[%c0_12, %c0_13] : memref<1x32xf32, #tpu.memory_space<vmem>>, vector<1x32xf32>
      %c0_14 = arith.constant 0 : index
      %c0_15 = arith.constant 0 : index
      %14 = vector.load %arg5[%c0_14, %c0_15] : memref<16x32xbf16, #tpu.memory_space<vmem>>, vector<16x32xbf16>
      %c0_16 = arith.constant 0 : index
      %c0_17 = arith.constant 0 : index
      %15 = vector.load %arg6[%c0_16, %c0_17] : memref<1x32xf32, #tpu.memory_space<vmem>>, vector<1x32xf32>
      %c0_18 = arith.constant 0 : index
      %c0_19 = arith.constant 0 : index
      %16 = vector.load %arg7[%c0_18, %c0_19] : memref<1x32xf32, #tpu.memory_space<vmem>>, vector<1x32xf32>
      %17 = vector.broadcast %13 : vector<1x32xf32> to vector<16x32xf32>
      %18 = arith.addf %12, %17 : vector<16x32xf32>
      %19 = arith.extf %14 : vector<16x32xbf16> to vector<16x32xf32>
      %20 = arith.addf %18, %19 : vector<16x32xf32>
      %cst_20 = arith.constant dense<0.000000e+00> : vector<16xf32>
      %21 = vector.multi_reduction <add>, %20, %cst_20 [1] : vector<16x32xf32> to vector<16xf32>
      %22 = vector.shape_cast %21 : vector<16xf32> to vector<16x1xf32>
      %cst_21 = arith.constant 3.200000e+01 : f32
      %23 = vector.broadcast %cst_21 : f32 to vector<16x1xf32>
      %24 = arith.divf %22, %23 : vector<16x1xf32>
      %25 = vector.broadcast %24 : vector<16x1xf32> to vector<16x32xf32>
      %26 = arith.subf %20, %25 : vector<16x32xf32>
      %27 = arith.mulf %26, %26 : vector<16x32xf32>
      %cst_22 = arith.constant dense<0.000000e+00> : vector<16xf32>
      %28 = vector.multi_reduction <add>, %27, %cst_22 [1] : vector<16x32xf32> to vector<16xf32>
      %29 = vector.shape_cast %28 : vector<16xf32> to vector<16x1xf32>
      %cst_23 = arith.constant 3.200000e+01 : f32
      %30 = vector.broadcast %cst_23 : f32 to vector<16x1xf32>
      %31 = arith.divf %29, %30 : vector<16x1xf32>
      %32 = vector.broadcast %24 : vector<16x1xf32> to vector<16x32xf32>
      %33 = arith.subf %20, %32 : vector<16x32xf32>
      %cst_24 = arith.constant 9.99999996E-13 : f32
      %34 = vector.broadcast %cst_24 : f32 to vector<16x1xf32>
      %35 = arith.addf %31, %34 : vector<16x1xf32>
      %36 = math.rsqrt %35 : vector<16x1xf32>
      %37 = vector.broadcast %36 : vector<16x1xf32> to vector<16x32xf32>
      %38 = arith.mulf %33, %37 : vector<16x32xf32>
      %39 = vector.broadcast %15 : vector<1x32xf32> to vector<16x32xf32>
      %40 = arith.mulf %38, %39 : vector<16x32xf32>
      %41 = vector.broadcast %16 : vector<1x32xf32> to vector<16x32xf32>
      %42 = arith.addf %40, %41 : vector<16x32xf32>
      %43 = arith.truncf %42 : vector<16x32xf32> to vector<16x32xbf16>
      %c0_25 = arith.constant 0 : index
      %c0_26 = arith.constant 0 : index
      %44 = vector.load %arg8[%c0_25, %c0_26] : memref<16x32xbf16, #tpu.memory_space<vmem>>, vector<16x32xbf16>
      tpu.vector_store %arg8[%c0_25, %c0_26], %43 {strides = array<i32>} : memref<16x32xbf16, #tpu.memory_space<vmem>>, vector<16x32xbf16>,
    } else {
    }
    return
  }
  func.func @transform_0(%arg0: i32, %arg1: i32) -> (i32, i32) {
    %c0_i32 = arith.constant 0 : i32
    return %arg0, %arg1 : i32, i32
  }
  func.func @transform_1(%arg0: i32, %arg1: i32) -> (i32, i32) {
    %c0_i32 = arith.constant 0 : i32
    %c0_i32_0 = arith.constant 0 : i32
    return %arg1, %c0_i32 : i32, i32
  }
  func.func @transform_2(%arg0: i32, %arg1: i32) -> (i32, i32) {
    %c0_i32 = arith.constant 0 : i32
    %c0_i32_0 = arith.constant 0 : i32
    %c0_i32_1 = arith.constant 0 : i32
    return %c0_i32, %c0_i32_0 : i32, i32
  }
  func.func @transform_3(%arg0: i32, %arg1: i32) -> (i32, i32) {
    %c0_i32 = arith.constant 0 : i32
    %c0_i32_0 = arith.constant 0 : i32
    return %arg0, %c0_i32 : i32, i32
  }
  func.func @transform_4(%arg0: i32, %arg1: i32) -> (i32, i32) {
    %c0_i32 = arith.constant 0 : i32
    %c0_i32_0 = arith.constant 0 : i32
    %c0_i32_1 = arith.constant 0 : i32
    return %c0_i32, %c0_i32_0 : i32, i32
  }
  func.func @transform_5(%arg0: i32, %arg1: i32) -> (i32, i32) {
    %c0_i32 = arith.constant 0 : i32
    %c0_i32_0 = arith.constant 0 : i32
    %c0_i32_1 = arith.constant 0 : i32
    return %c0_i32, %c0_i32_0 : i32, i32
  }
  func.func @transform_6(%arg0: i32, %arg1: i32) -> (i32, i32) {
    %c0_i32 = arith.constant 0 : i32
    %c0_i32_0 = arith.constant 0 : i32
    return %arg0, %c0_i32 : i32, i32
  }
}

module attributes {stable_mosaic.version = 11 : i64} {
  func.func @_gemm_kernel(%arg0: i32, %arg1: i32, %arg2: i32, %arg3: memref<16x32xbf16, #tpu.memory_space<vmem>>, %arg4: memref<32x64xbf16, #tpu.memory_space<vmem>>, %arg5: memref<1x64xf32, #tpu.memory_space<vmem>>, %arg6: memref<16x64xbf16, #tpu.memory_space<vmem>>, %arg7: memref<16x64xf32, #tpu.memory_space<vmem>>) attributes {dimension_semantics = [#tpu.dimension_semantics<parallel>, #tpu.dimension_semantics<parallel>, #tpu.dimension_semantics<arbitrary>], iteration_bounds = array<i64: 1, 1, 1>, scalar_prefetch = 0 : i64, scratch_operands = 1 : i64, tpu.core_type = #tpu.core_type<tc>, window_params = [{transform_indices = @transform_0, window_bounds = array<i64: 16, 32>}, {transform_indices = @transform_1, window_bounds = array<i64: 32, 64>}, {transform_indices = @transform_2, window_bounds = array<i64: 1, 64>}, {transform_indices = @transform_3, window_bounds = array<i64: 16, 64>}]} {
    %c0_i32 = arith.constant 0 : i32
    %0 = arith.cmpi eq, %arg2, %c0_i32 : i32
    %1 = arith.extui %0 : i1 to i32
    %c0_i32_0 = arith.constant 0 : i32
    %2 = arith.cmpi ne, %1, %c0_i32_0 : i32
    scf.if %2 {
      %cst_10 = arith.constant 0.000000e+00 : f32
      %12 = vector.broadcast %cst_10 : f32 to vector<16x64xf32>
      %c0_11 = arith.constant 0 : index
      %c0_12 = arith.constant 0 : index
      %13 = vector.load %arg7[%c0_11, %c0_12] : memref<16x64xf32, #tpu.memory_space<vmem>>, vector<16x64xf32>
      tpu.vector_store %arg7[%c0_11, %c0_12], %12 {strides = array<i32>} : memref<16x64xf32, #tpu.memory_space<vmem>>, vector<16x64xf32>,
    } else {
    }
    %c0 = arith.constant 0 : index
    %c0_1 = arith.constant 0 : index
    %3 = vector.load %arg7[%c0, %c0_1] : memref<16x64xf32, #tpu.memory_space<vmem>>, vector<16x64xf32>
    %c0_2 = arith.constant 0 : index
    %c0_3 = arith.constant 0 : index
    %4 = vector.load %arg3[%c0_2, %c0_3] : memref<16x32xbf16, #tpu.memory_space<vmem>>, vector<16x32xbf16>
    %c0_4 = arith.constant 0 : index
    %c0_5 = arith.constant 0 : index
    %5 = vector.load %arg4[%c0_4, %c0_5] : memref<32x64xbf16, #tpu.memory_space<vmem>>, vector<32x64xbf16>
    %cst = arith.constant dense<0.000000e+00> : vector<16x64xf32>
    %6 = tpu.matmul %4, %5, %cst {dimension_numbers = #tpu.dot_dimension_numbers<[1], [0], [0], [1], [0, 0, 1, 1], [], []>} : vector<16x32xbf16>, vector<32x64xbf16>, vector<16x64xf32> -> vector<16x64xf32>
    %7 = arith.addf %3, %6 : vector<16x64xf32>
    %c0_6 = arith.constant 0 : index
    %c0_7 = arith.constant 0 : index
    %8 = vector.load %arg7[%c0_6, %c0_7] : memref<16x64xf32, #tpu.memory_space<vmem>>, vector<16x64xf32>
    tpu.vector_store %arg7[%c0_6, %c0_7], %7 {strides = array<i32>} : memref<16x64xf32, #tpu.memory_space<vmem>>, vector<16x64xf32>,
    %c0_i32_8 = arith.constant 0 : i32
    %9 = arith.cmpi eq, %arg2, %c0_i32_8 : i32
    %10 = arith.extui %9 : i1 to i32
    %c0_i32_9 = arith.constant 0 : i32
    %11 = arith.cmpi ne, %10, %c0_i32_9 : i32
    scf.if %11 {
      %c0_10 = arith.constant 0 : index
      %c0_11 = arith.constant 0 : index
      %12 = vector.load %arg7[%c0_10, %c0_11] : memref<16x64xf32, #tpu.memory_space<vmem>>, vector<16x64xf32>
      %c0_12 = arith.constant 0 : index
      %c0_13 = arith.constant 0 : index
      %13 = vector.load %arg5[%c0_12, %c0_13] : memref<1x64xf32, #tpu.memory_space<vmem>>, vector<1x64xf32>
      %14 = vector.broadcast %13 : vector<1x64xf32> to vector<16x64xf32>
      %15 = arith.addf %12, %14 : vector<16x64xf32>
      %cst_14 = arith.constant 5.000000e-01 : f32
      %16 = vector.broadcast %cst_14 : f32 to vector<16x64xf32>
      %17 = arith.mulf %15, %16 : vector<16x64xf32>
      %cst_15 = arith.constant 0.707106769 : f32
      %18 = vector.broadcast %cst_15 : f32 to vector<16x64xf32>
      %19 = arith.mulf %15, %18 : vector<16x64xf32>
      %20 = math.erf %19 : vector<16x64xf32>
      %cst_16 = arith.constant 1.000000e+00 : f32
      %21 = vector.broadcast %cst_16 : f32 to vector<16x64xf32>
      %22 = arith.addf %21, %20 : vector<16x64xf32>
      %23 = arith.mulf %17, %22 : vector<16x64xf32>
      %24 = arith.truncf %23 : vector<16x64xf32> to vector<16x64xbf16>
      %c0_17 = arith.constant 0 : index
      %c0_18 = arith.constant 0 : index
      %25 = vector.load %arg6[%c0_17, %c0_18] : memref<16x64xbf16, #tpu.memory_space<vmem>>, vector<16x64xbf16>
      tpu.vector_store %arg6[%c0_17, %c0_18], %24 {strides = array<i32>} : memref<16x64xbf16, #tpu.memory_space<vmem>>, vector<16x64xbf16>,
    } else {
    }
    return
  }
  func.func @transform_0(%arg0: i32, %arg1: i32, %arg2: i32) -> (i32, i32) {
    %c0_i32 = arith.constant 0 : i32
    return %arg0, %arg2 : i32, i32
  }
  func.func @transform_1(%arg0: i32, %arg1: i32, %arg2: i32) -> (i32, i32) {
    %c0_i32 = arith.constant 0 : i32
    return %arg2, %arg1 : i32, i32
  }
  func.func @transform_2(%arg0: i32, %arg1: i32, %arg2: i32) -> (i32, i32) {
    %c0_i32 = arith.constant 0 : i32
    %c0_i32_0 = arith.constant 0 : i32
    return %c0_i32, %arg1 : i32, i32
  }
  func.func @transform_3(%arg0: i32, %arg1: i32, %arg2: i32) -> (i32, i32) {
    %c0_i32 = arith.constant 0 : i32
    return %arg0, %arg1 : i32, i32
  }
}

module attributes {stable_mosaic.version = 11 : i64} {
  func.func @_visn_kernel(%arg0: i32, %arg1: memref<8x16xf32, #tpu.memory_space<vmem>>, %arg2: memref<8x4xf32, #tpu.memory_space<vmem>>, %arg3: memref<16x32xbf16, #tpu.memory_space<vmem>>, %arg4: memref<1x32xf32, #tpu.memory_space<vmem>>, %arg5: memref<1x32xf32, #tpu.memory_space<vmem>>, %arg6: memref<1x32xf32, #tpu.memory_space<vmem>>, %arg7: memref<4x32xbf16, #tpu.memory_space<vmem>>, %arg8: memref<1x32xf32, #tpu.memory_space<vmem>>, %arg9: memref<1x32xf32, #tpu.memory_space<vmem>>, %arg10: memref<1x32xf32, #tpu.memory_space<vmem>>, %arg11: memref<8x32xbf16, #tpu.memory_space<vmem>>) attributes {dimension_semantics = [#tpu.dimension_semantics<parallel>], iteration_bounds = array<i64: 1>, scalar_prefetch = 0 : i64, scratch_operands = 0 : i64, tpu.core_type = #tpu.core_type<tc>, window_params = [{transform_indices = @transform_0, window_bounds = array<i64: 8, 16>}, {transform_indices = @transform_1, window_bounds = array<i64: 8, 4>}, {pipeline_mode = #tpu.pipeline_mode<synchronous>, transform_indices = @transform_2, window_bounds = array<i64: 16, 32>}, {pipeline_mode = #tpu.pipeline_mode<synchronous>, transform_indices = @transform_3, window_bounds = array<i64: 1, 32>}, {pipeline_mode = #tpu.pipeline_mode<synchronous>, transform_indices = @transform_4, window_bounds = array<i64: 1, 32>}, {pipeline_mode = #tpu.pipeline_mode<synchronous>, transform_indices = @transform_5, window_bounds = array<i64: 1, 32>}, {pipeline_mode = #tpu.pipeline_mode<synchronous>, transform_indices = @transform_6, window_bounds = array<i64: 4, 32>}, {pipeline_mode = #tpu.pipeline_mode<synchronous>, transform_indices = @transform_7, window_bounds = array<i64: 1, 32>}, {pipeline_mode = #tpu.pipeline_mode<synchronous>, transform_indices = @transform_8, window_bounds = array<i64: 1, 32>}, {pipeline_mode = #tpu.pipeline_mode<synchronous>, transform_indices = @transform_9, window_bounds = array<i64: 1, 32>}, {transform_indices = @transform_10, window_bounds = array<i64: 8, 32>}]} {
    %c0 = arith.constant 0 : index
    %c0_0 = arith.constant 0 : index
    %0 = vector.load %arg1[%c0, %c0_0] : memref<8x16xf32, #tpu.memory_space<vmem>>, vector<8x16xf32>
    %c0_1 = arith.constant 0 : index
    %c0_2 = arith.constant 0 : index
    %1 = vector.load %arg3[%c0_1, %c0_2] : memref<16x32xbf16, #tpu.memory_space<vmem>>, vector<16x32xbf16>
    %2 = arith.truncf %0 : vector<8x16xf32> to vector<8x16xbf16>
    %cst = arith.constant dense<0.000000e+00> : vector<8x32xf32>
    %3 = tpu.matmul %2, %1, %cst {dimension_numbers = #tpu.dot_dimension_numbers<[1], [0], [0], [1], [0, 0, 1, 1], [], []>} : vector<8x16xbf16>, vector<16x32xbf16>, vector<8x32xf32> -> vector<8x32xf32>
    %c0_3 = arith.constant 0 : index
    %c0_4 = arith.constant 0 : index
    %4 = vector.load %arg4[%c0_3, %c0_4] : memref<1x32xf32, #tpu.memory_space<vmem>>, vector<1x32xf32>
    %5 = vector.broadcast %4 : vector<1x32xf32> to vector<8x32xf32>
    %6 = arith.addf %3, %5 : vector<8x32xf32>
    %c0_5 = arith.constant 0 : index
    %c0_6 = arith.constant 0 : index
    %7 = vector.load %arg5[%c0_5, %c0_6] : memref<1x32xf32, #tpu.memory_space<vmem>>, vector<1x32xf32>
    %c0_7 = arith.constant 0 : index
    %c0_8 = arith.constant 0 : index
    %8 = vector.load %arg6[%c0_7, %c0_8] : memref<1x32xf32, #tpu.memory_space<vmem>>, vector<1x32xf32>
    %cst_9 = arith.constant dense<0.000000e+00> : vector<8xf32>
    %9 = vector.multi_reduction <add>, %6, %cst_9 [1] : vector<8x32xf32> to vector<8xf32>
    %10 = vector.shape_cast %9 : vector<8xf32> to vector<8x1xf32>
    %cst_10 = arith.constant 3.200000e+01 : f32
    %11 = vector.broadcast %cst_10 : f32 to vector<8x1xf32>
    %12 = arith.divf %10, %11 : vector<8x1xf32>
    %13 = vector.broadcast %12 : vector<8x1xf32> to vector<8x32xf32>
    %14 = arith.subf %6, %13 : vector<8x32xf32>
    %15 = arith.mulf %14, %14 : vector<8x32xf32>
    %cst_11 = arith.constant dense<0.000000e+00> : vector<8xf32>
    %16 = vector.multi_reduction <add>, %15, %cst_11 [1] : vector<8x32xf32> to vector<8xf32>
    %17 = vector.shape_cast %16 : vector<8xf32> to vector<8x1xf32>
    %cst_12 = arith.constant 3.200000e+01 : f32
    %18 = vector.broadcast %cst_12 : f32 to vector<8x1xf32>
    %19 = arith.divf %17, %18 : vector<8x1xf32>
    %20 = vector.broadcast %12 : vector<8x1xf32> to vector<8x32xf32>
    %21 = arith.subf %6, %20 : vector<8x32xf32>
    %cst_13 = arith.constant 9.99999996E-13 : f32
    %22 = vector.broadcast %cst_13 : f32 to vector<8x1xf32>
    %23 = arith.addf %19, %22 : vector<8x1xf32>
    %24 = math.rsqrt %23 : vector<8x1xf32>
    %25 = vector.broadcast %24 : vector<8x1xf32> to vector<8x32xf32>
    %26 = arith.mulf %21, %25 : vector<8x32xf32>
    %27 = vector.broadcast %7 : vector<1x32xf32> to vector<8x32xf32>
    %28 = arith.mulf %26, %27 : vector<8x32xf32>
    %29 = vector.broadcast %8 : vector<1x32xf32> to vector<8x32xf32>
    %30 = arith.addf %28, %29 : vector<8x32xf32>
    %c0_14 = arith.constant 0 : index
    %c0_15 = arith.constant 0 : index
    %31 = vector.load %arg2[%c0_14, %c0_15] : memref<8x4xf32, #tpu.memory_space<vmem>>, vector<8x4xf32>
    %c0_16 = arith.constant 0 : index
    %c0_17 = arith.constant 0 : index
    %32 = vector.load %arg7[%c0_16, %c0_17] : memref<4x32xbf16, #tpu.memory_space<vmem>>, vector<4x32xbf16>
    %33 = arith.truncf %31 : vector<8x4xf32> to vector<8x4xbf16>
    %cst_18 = arith.constant dense<0.000000e+00> : vector<8x32xf32>
    %34 = tpu.matmul %33, %32, %cst_18 {dimension_numbers = #tpu.dot_dimension_numbers<[1], [0], [0], [1], [0, 0, 1, 1], [], []>} : vector<8x4xbf16>, vector<4x32xbf16>, vector<8x32xf32> -> vector<8x32xf32>
    %c0_19 = arith.constant 0 : index
    %c0_20 = arith.constant 0 : index
    %35 = vector.load %arg8[%c0_19, %c0_20] : memref<1x32xf32, #tpu.memory_space<vmem>>, vector<1x32xf32>
    %36 = vector.broadcast %35 : vector<1x32xf32> to vector<8x32xf32>
    %37 = arith.addf %34, %36 : vector<8x32xf32>
    %c0_21 = arith.constant 0 : index
    %c0_22 = arith.constant 0 : index
    %38 = vector.load %arg9[%c0_21, %c0_22] : memref<1x32xf32, #tpu.memory_space<vmem>>, vector<1x32xf32>
    %c0_23 = arith.constant 0 : index
    %c0_24 = arith.constant 0 : index
    %39 = vector.load %arg10[%c0_23, %c0_24] : memref<1x32xf32, #tpu.memory_space<vmem>>, vector<1x32xf32>
    %cst_25 = arith.constant dense<0.000000e+00> : vector<8xf32>
    %40 = vector.multi_reduction <add>, %37, %cst_25 [1] : vector<8x32xf32> to vector<8xf32>
    %41 = vector.shape_cast %40 : vector<8xf32> to vector<8x1xf32>
    %cst_26 = arith.constant 3.200000e+01 : f32
    %42 = vector.broadcast %cst_26 : f32 to vector<8x1xf32>
    %43 = arith.divf %41, %42 : vector<8x1xf32>
    %44 = vector.broadcast %43 : vector<8x1xf32> to vector<8x32xf32>
    %45 = arith.subf %37, %44 : vector<8x32xf32>
    %46 = arith.mulf %45, %45 : vector<8x32xf32>
    %cst_27 = arith.constant dense<0.000000e+00> : vector<8xf32>
    %47 = vector.multi_reduction <add>, %46, %cst_27 [1] : vector<8x32xf32> to vector<8xf32>
    %48 = vector.shape_cast %47 : vector<8xf32> to vector<8x1xf32>
    %cst_28 = arith.constant 3.200000e+01 : f32
    %49 = vector.broadcast %cst_28 : f32 to vector<8x1xf32>
    %50 = arith.divf %48, %49 : vector<8x1xf32>
    %51 = vector.broadcast %43 : vector<8x1xf32> to vector<8x32xf32>
    %52 = arith.subf %37, %51 : vector<8x32xf32>
    %cst_29 = arith.constant 9.99999996E-13 : f32
    %53 = vector.broadcast %cst_29 : f32 to vector<8x1xf32>
    %54 = arith.addf %50, %53 : vector<8x1xf32>
    %55 = math.rsqrt %54 : vector<8x1xf32>
    %56 = vector.broadcast %55 : vector<8x1xf32> to vector<8x32xf32>
    %57 = arith.mulf %52, %56 : vector<8x32xf32>
    %58 = vector.broadcast %38 : vector<1x32xf32> to vector<8x32xf32>
    %59 = arith.mulf %57, %58 : vector<8x32xf32>
    %60 = vector.broadcast %39 : vector<1x32xf32> to vector<8x32xf32>
    %61 = arith.addf %59, %60 : vector<8x32xf32>
    %62 = arith.addf %30, %61 : vector<8x32xf32>
    %cst_30 = arith.constant 5.000000e-01 : f32
    %63 = vector.broadcast %cst_30 : f32 to vector<8x32xf32>
    %64 = arith.mulf %63, %62 : vector<8x32xf32>
    %65 = arith.truncf %64 : vector<8x32xf32> to vector<8x32xbf16>
    %c0_31 = arith.constant 0 : index
    %c0_32 = arith.constant 0 : index
    %66 = vector.load %arg11[%c0_31, %c0_32] : memref<8x32xbf16, #tpu.memory_space<vmem>>, vector<8x32xbf16>
    tpu.vector_store %arg11[%c0_31, %c0_32], %65 {strides = array<i32>} : memref<8x32xbf16, #tpu.memory_space<vmem>>, vector<8x32xbf16>,
    return
  }
  func.func @transform_0(%arg0: i32) -> (i32, i32) {
    %c0_i32 = arith.constant 0 : i32
    %c0_i32_0 = arith.constant 0 : i32
    return %arg0, %c0_i32 : i32, i32
  }
  func.func @transform_1(%arg0: i32) -> (i32, i32) {
    %c0_i32 = arith.constant 0 : i32
    %c0_i32_0 = arith.constant 0 : i32
    return %arg0, %c0_i32 : i32, i32
  }
  func.func @transform_2(%arg0: i32) -> (i32, i32) {
    %c0_i32 = arith.constant 0 : i32
    %c0_i32_0 = arith.constant 0 : i32
    %c0_i32_1 = arith.constant 0 : i32
    return %c0_i32, %c0_i32_0 : i32, i32
  }
  func.func @transform_3(%arg0: i32) -> (i32, i32) {
    %c0_i32 = arith.constant 0 : i32
    %c0_i32_0 = arith.constant 0 : i32
    %c0_i32_1 = arith.constant 0 : i32
    return %c0_i32, %c0_i32_0 : i32, i32
  }
  func.func @transform_4(%arg0: i32) -> (i32, i32) {
    %c0_i32 = arith.constant 0 : i32
    %c0_i32_0 = arith.constant 0 : i32
    %c0_i32_1 = arith.constant 0 : i32
    return %c0_i32, %c0_i32_0 : i32, i32
  }
  func.func @transform_5(%arg0: i32) -> (i32, i32) {
    %c0_i32 = arith.constant 0 : i32
    %c0_i32_0 = arith.constant 0 : i32
    %c0_i32_1 = arith.constant 0 : i32
    return %c0_i32, %c0_i32_0 : i32, i32
  }
  func.func @transform_6(%arg0: i32) -> (i32, i32) {
    %c0_i32 = arith.constant 0 : i32
    %c0_i32_0 = arith.constant 0 : i32
    %c0_i32_1 = arith.constant 0 : i32
    return %c0_i32, %c0_i32_0 : i32, i32
  }
  func.func @transform_7(%arg0: i32) -> (i32, i32) {
    %c0_i32 = arith.constant 0 : i32
    %c0_i32_0 = arith.constant 0 : i32
    %c0_i32_1 = arith.constant 0 : i32
    return %c0_i32, %c0_i32_0 : i32, i32
  }
  func.func @transform_8(%arg0: i32) -> (i32, i32) {
    %c0_i32 = arith.constant 0 : i32
    %c0_i32_0 = arith.constant 0 : i32
    %c0_i32_1 = arith.constant 0 : i32
    return %c0_i32, %c0_i32_0 : i32, i32
  }
  func.func @transform_9(%arg0: i32) -> (i32, i32) {
    %c0_i32 = arith.constant 0 : i32
    %c0_i32_0 = arith.constant 0 : i32
    %c0_i32_1 = arith.constant 0 : i32
    return %c0_i32, %c0_i32_0 : i32, i32
  }
  func.func @transform_10(%arg0: i32) -> (i32, i32) {
    %c0_i32 = arith.constant 0 : i32
    %c0_i32_0 = arith.constant 0 : i32
    return %arg0, %c0_i32 : i32, i32
  }
}

module attributes {stable_mosaic.version = 11 : i64} {
  func.func @kernel(%arg0: i32, %arg1: memref<1x4x96xbf16, #tpu.memory_space<vmem>>, %arg2: memref<1x4x32xbf16, #tpu.memory_space<vmem>>) attributes {dimension_semantics = [#tpu.dimension_semantics<parallel>], iteration_bounds = array<i64: 2>, scalar_prefetch = 0 : i64, scratch_operands = 0 : i64, tpu.core_type = #tpu.core_type<tc>, window_params = [{transform_indices = @transform_0, window_bounds = array<i64: 1, 4, 96>}, {transform_indices = @transform_1, window_bounds = array<i64: 1, 4, 32>}]} {
    %c0 = arith.constant 0 : index
    %c0_0 = arith.constant 0 : index
    %c0_1 = arith.constant 0 : index
    %0 = vector.load %arg1[%c0, %c0_0, %c0_1] : memref<1x4x96xbf16, #tpu.memory_space<vmem>>, vector<1x4x96xbf16>
    %1 = vector.extract_strided_slice %0 {offsets = [0, 0, 0], sizes = [1, 4, 32], strides = [1, 1, 1]} : vector<1x4x96xbf16> to vector<1x4x32xbf16>
    %2 = vector.extract_strided_slice %0 {offsets = [0, 0, 32], sizes = [1, 4, 32], strides = [1, 1, 1]} : vector<1x4x96xbf16> to vector<1x4x32xbf16>
    %3 = vector.extract_strided_slice %0 {offsets = [0, 0, 64], sizes = [1, 4, 32], strides = [1, 1, 1]} : vector<1x4x96xbf16> to vector<1x4x32xbf16>
    %4 = vector.extract_strided_slice %1 {offsets = [0, 0, 0], sizes = [1, 4, 8], strides = [1, 1, 1]} : vector<1x4x32xbf16> to vector<1x4x8xbf16>
    %5 = vector.extract_strided_slice %2 {offsets = [0, 0, 0], sizes = [1, 4, 8], strides = [1, 1, 1]} : vector<1x4x32xbf16> to vector<1x4x8xbf16>
    %6 = vector.extract_strided_slice %3 {offsets = [0, 0, 0], sizes = [1, 4, 8], strides = [1, 1, 1]} : vector<1x4x32xbf16> to vector<1x4x8xbf16>
    "tpu.trace_start"() <{level = 10 : i32, message = "bqd,bkd->bqk"}> : () -> ()
    %cst = arith.constant dense<0.000000e+00> : vector<1x4x4xf32>
    %7 = tpu.matmul %4, %5, %cst {dimension_numbers = #tpu.dot_dimension_numbers<[2], [2], [1], [1], [0, 0, 0, 1, 1, 1], [0], [0]>} : vector<1x4x8xbf16>, vector<1x4x8xbf16>, vector<1x4x4xf32> -> vector<1x4x4xf32>
    "tpu.trace_stop"() : () -> ()
    %cst_2 = arith.constant dense<0xFF800000> : vector<1x4xf32>
    %8 = vector.multi_reduction <maximumf>, %7, %cst_2 [2] : vector<1x4x4xf32> to vector<1x4xf32>
    %9 = vector.shape_cast %8 : vector<1x4xf32> to vector<1x4x1xf32>
    %10 = vector.broadcast %9 : vector<1x4x1xf32> to vector<1x4x4xf32>
    %11 = arith.subf %7, %10 : vector<1x4x4xf32>
    %12 = math.exp %11 : vector<1x4x4xf32>
    %cst_3 = arith.constant dense<0.000000e+00> : vector<1x4xf32>
    %13 = vector.multi_reduction <add>, %12, %cst_3 [2] : vector<1x4x4xf32> to vector<1x4xf32>
    %14 = vector.shape_cast %13 : vector<1x4xf32> to vector<1x4x1xf32>
    %15 = tpu.reciprocal %14 {approx = true} : vector<1x4x1xf32> -> vector<1x4x1xf32>
    %16 = vector.broadcast %15 : vector<1x4x1xf32> to vector<1x4x4xf32>
    %17 = arith.mulf %12, %16 : vector<1x4x4xf32>
    %18 = arith.truncf %17 : vector<1x4x4xf32> to vector<1x4x4xbf16>
    "tpu.trace_start"() <{level = 10 : i32, message = "bqk,bkd->bqd"}> : () -> ()
    %cst_4 = arith.constant dense<0.000000e+00> : vector<1x4x8xf32>
    %19 = tpu.matmul %18, %6, %cst_4 {dimension_numbers = #tpu.dot_dimension_numbers<[2], [1], [1], [2], [0, 0, 0, 1, 1, 2], [0], [0]>} : vector<1x4x4xbf16>, vector<1x4x8xbf16>, vector<1x4x8xf32> -> vector<1x4x8xf32>
    "tpu.trace_stop"() : () -> ()
    %20 = vector.extract_strided_slice %1 {offsets = [0, 0, 8], sizes = [1, 4, 8], strides = [1, 1, 1]} : vector<1x4x32xbf16> to vector<1x4x8xbf16>
    %21 = vector.extract_strided_slice %2 {offsets = [0, 0, 8], sizes = [1, 4, 8], strides = [1, 1, 1]} : vector<1x4x32xbf16> to vector<1x4x8xbf16>
    %22 = vector.extract_strided_slice %3 {offsets = [0, 0, 8], sizes = [1, 4, 8], strides = [1, 1, 1]} : vector<1x4x32xbf16> to vector<1x4x8xbf16>
    "tpu.trace_start"() <{level = 10 : i32, message = "bqd,bkd->bqk"}> : () -> ()
    %cst_5 = arith.constant dense<0.000000e+00> : vector<1x4x4xf32>
    %23 = tpu.matmul %20, %21, %cst_5 {dimension_numbers = #tpu.dot_dimension_numbers<[2], [2], [1], [1], [0, 0, 0, 1, 1, 1], [0], [0]>} : vector<1x4x8xbf16>, vector<1x4x8xbf16>, vector<1x4x4xf32> -> vector<1x4x4xf32>
    "tpu.trace_stop"() : () -> ()
    %cst_6 = arith.constant dense<0xFF800000> : vector<1x4xf32>
    %24 = vector.multi_reduction <maximumf>, %23, %cst_6 [2] : vector<1x4x4xf32> to vector<1x4xf32>
    %25 = vector.shape_cast %24 : vector<1x4xf32> to vector<1x4x1xf32>
    %26 = vector.broadcast %25 : vector<1x4x1xf32> to vector<1x4x4xf32>
    %27 = arith.subf %23, %26 : vector<1x4x4xf32>
    %28 = math.exp %27 : vector<1x4x4xf32>
    %cst_7 = arith.constant dense<0.000000e+00> : vector<1x4xf32>
    %29 = vector.multi_reduction <add>, %28, %cst_7 [2] : vector<1x4x4xf32> to vector<1x4xf32>
    %30 = vector.shape_cast %29 : vector<1x4xf32> to vector<1x4x1xf32>
    %31 = tpu.reciprocal %30 {approx = true} : vector<1x4x1xf32> -> vector<1x4x1xf32>
    %32 = vector.broadcast %31 : vector<1x4x1xf32> to vector<1x4x4xf32>
    %33 = arith.mulf %28, %32 : vector<1x4x4xf32>
    %34 = arith.truncf %33 : vector<1x4x4xf32> to vector<1x4x4xbf16>
    "tpu.trace_start"() <{level = 10 : i32, message = "bqk,bkd->bqd"}> : () -> ()
    %cst_8 = arith.constant dense<0.000000e+00> : vector<1x4x8xf32>
    %35 = tpu.matmul %34, %22, %cst_8 {dimension_numbers = #tpu.dot_dimension_numbers<[2], [1], [1], [2], [0, 0, 0, 1, 1, 2], [0], [0]>} : vector<1x4x4xbf16>, vector<1x4x8xbf16>, vector<1x4x8xf32> -> vector<1x4x8xf32>
    "tpu.trace_stop"() : () -> ()
    %36 = vector.extract_strided_slice %1 {offsets = [0, 0, 16], sizes = [1, 4, 8], strides = [1, 1, 1]} : vector<1x4x32xbf16> to vector<1x4x8xbf16>
    %37 = vector.extract_strided_slice %2 {offsets = [0, 0, 16], sizes = [1, 4, 8], strides = [1, 1, 1]} : vector<1x4x32xbf16> to vector<1x4x8xbf16>
    %38 = vector.extract_strided_slice %3 {offsets = [0, 0, 16], sizes = [1, 4, 8], strides = [1, 1, 1]} : vector<1x4x32xbf16> to vector<1x4x8xbf16>
    "tpu.trace_start"() <{level = 10 : i32, message = "bqd,bkd->bqk"}> : () -> ()
    %cst_9 = arith.constant dense<0.000000e+00> : vector<1x4x4xf32>
    %39 = tpu.matmul %36, %37, %cst_9 {dimension_numbers = #tpu.dot_dimension_numbers<[2], [2], [1], [1], [0, 0, 0, 1, 1, 1], [0], [0]>} : vector<1x4x8xbf16>, vector<1x4x8xbf16>, vector<1x4x4xf32> -> vector<1x4x4xf32>
    "tpu.trace_stop"() : () -> ()
    %cst_10 = arith.constant dense<0xFF800000> : vector<1x4xf32>
    %40 = vector.multi_reduction <maximumf>, %39, %cst_10 [2] : vector<1x4x4xf32> to vector<1x4xf32>
    %41 = vector.shape_cast %40 : vector<1x4xf32> to vector<1x4x1xf32>
    %42 = vector.broadcast %41 : vector<1x4x1xf32> to vector<1x4x4xf32>
    %43 = arith.subf %39, %42 : vector<1x4x4xf32>
    %44 = math.exp %43 : vector<1x4x4xf32>
    %cst_11 = arith.constant dense<0.000000e+00> : vector<1x4xf32>
    %45 = vector.multi_reduction <add>, %44, %cst_11 [2] : vector<1x4x4xf32> to vector<1x4xf32>
    %46 = vector.shape_cast %45 : vector<1x4xf32> to vector<1x4x1xf32>
    %47 = tpu.reciprocal %46 {approx = true} : vector<1x4x1xf32> -> vector<1x4x1xf32>
    %48 = vector.broadcast %47 : vector<1x4x1xf32> to vector<1x4x4xf32>
    %49 = arith.mulf %44, %48 : vector<1x4x4xf32>
    %50 = arith.truncf %49 : vector<1x4x4xf32> to vector<1x4x4xbf16>
    "tpu.trace_start"() <{level = 10 : i32, message = "bqk,bkd->bqd"}> : () -> ()
    %cst_12 = arith.constant dense<0.000000e+00> : vector<1x4x8xf32>
    %51 = tpu.matmul %50, %38, %cst_12 {dimension_numbers = #tpu.dot_dimension_numbers<[2], [1], [1], [2], [0, 0, 0, 1, 1, 2], [0], [0]>} : vector<1x4x4xbf16>, vector<1x4x8xbf16>, vector<1x4x8xf32> -> vector<1x4x8xf32>
    "tpu.trace_stop"() : () -> ()
    %52 = vector.extract_strided_slice %1 {offsets = [0, 0, 24], sizes = [1, 4, 8], strides = [1, 1, 1]} : vector<1x4x32xbf16> to vector<1x4x8xbf16>
    %53 = vector.extract_strided_slice %2 {offsets = [0, 0, 24], sizes = [1, 4, 8], strides = [1, 1, 1]} : vector<1x4x32xbf16> to vector<1x4x8xbf16>
    %54 = vector.extract_strided_slice %3 {offsets = [0, 0, 24], sizes = [1, 4, 8], strides = [1, 1, 1]} : vector<1x4x32xbf16> to vector<1x4x8xbf16>
    "tpu.trace_start"() <{level = 10 : i32, message = "bqd,bkd->bqk"}> : () -> ()
    %cst_13 = arith.constant dense<0.000000e+00> : vector<1x4x4xf32>
    %55 = tpu.matmul %52, %53, %cst_13 {dimension_numbers = #tpu.dot_dimension_numbers<[2], [2], [1], [1], [0, 0, 0, 1, 1, 1], [0], [0]>} : vector<1x4x8xbf16>, vector<1x4x8xbf16>, vector<1x4x4xf32> -> vector<1x4x4xf32>
    "tpu.trace_stop"() : () -> ()
    %cst_14 = arith.constant dense<0xFF800000> : vector<1x4xf32>
    %56 = vector.multi_reduction <maximumf>, %55, %cst_14 [2] : vector<1x4x4xf32> to vector<1x4xf32>
    %57 = vector.shape_cast %56 : vector<1x4xf32> to vector<1x4x1xf32>
    %58 = vector.broadcast %57 : vector<1x4x1xf32> to vector<1x4x4xf32>
    %59 = arith.subf %55, %58 : vector<1x4x4xf32>
    %60 = math.exp %59 : vector<1x4x4xf32>
    %cst_15 = arith.constant dense<0.000000e+00> : vector<1x4xf32>
    %61 = vector.multi_reduction <add>, %60, %cst_15 [2] : vector<1x4x4xf32> to vector<1x4xf32>
    %62 = vector.shape_cast %61 : vector<1x4xf32> to vector<1x4x1xf32>
    %63 = tpu.reciprocal %62 {approx = true} : vector<1x4x1xf32> -> vector<1x4x1xf32>
    %64 = vector.broadcast %63 : vector<1x4x1xf32> to vector<1x4x4xf32>
    %65 = arith.mulf %60, %64 : vector<1x4x4xf32>
    %66 = arith.truncf %65 : vector<1x4x4xf32> to vector<1x4x4xbf16>
    "tpu.trace_start"() <{level = 10 : i32, message = "bqk,bkd->bqd"}> : () -> ()
    %cst_16 = arith.constant dense<0.000000e+00> : vector<1x4x8xf32>
    %67 = tpu.matmul %66, %54, %cst_16 {dimension_numbers = #tpu.dot_dimension_numbers<[2], [1], [1], [2], [0, 0, 0, 1, 1, 2], [0], [0]>} : vector<1x4x4xbf16>, vector<1x4x8xbf16>, vector<1x4x8xf32> -> vector<1x4x8xf32>
    "tpu.trace_stop"() : () -> ()
    %68 = tpu.concatenate %19, %35, %51, %67 in 2 : vector<1x4x8xf32>, vector<1x4x8xf32>, vector<1x4x8xf32>, vector<1x4x8xf32> -> vector<1x4x32xf32>
    %69 = arith.truncf %68 : vector<1x4x32xf32> to vector<1x4x32xbf16>
    %c0_17 = arith.constant 0 : index
    %c0_18 = arith.constant 0 : index
    %c0_19 = arith.constant 0 : index
    %70 = vector.load %arg2[%c0_17, %c0_18, %c0_19] : memref<1x4x32xbf16, #tpu.memory_space<vmem>>, vector<1x4x32xbf16>
    tpu.vector_store %arg2[%c0_17, %c0_18, %c0_19], %69 {strides = array<i32>} : memref<1x4x32xbf16, #tpu.memory_space<vmem>>, vector<1x4x32xbf16>,
    return
  }
  func.func @transform_0(%arg0: i32) -> (i32, i32, i32) {
    %c0_i32 = arith.constant 0 : i32
    %c0_i32_0 = arith.constant 0 : i32
    %c0_i32_1 = arith.constant 0 : i32
    return %arg0, %c0_i32, %c0_i32_0 : i32, i32, i32
  }
  func.func @transform_1(%arg0: i32) -> (i32, i32, i32) {
    %c0_i32 = arith.constant 0 : i32
    %c0_i32_0 = arith.constant 0 : i32
    %c0_i32_1 = arith.constant 0 : i32
    return %arg0, %c0_i32, %c0_i32_0 : i32, i32, i32
  }
}

module attributes {stable_mosaic.version = 11 : i64} {
  func.func @_gemm_kernel(%arg0: i32, %arg1: i32, %arg2: i32, %arg3: memref<8x32xbf16, #tpu.memory_space<vmem>>, %arg4: memref<32x96xbf16, #tpu.memory_space<vmem>>, %arg5: memref<1x96xf32, #tpu.memory_space<vmem>>, %arg6: memref<8x96xbf16, #tpu.memory_space<vmem>>, %arg7: memref<8x96xf32, #tpu.memory_space<vmem>>) attributes {dimension_semantics = [#tpu.dimension_semantics<parallel>, #tpu.dimension_semantics<parallel>, #tpu.dimension_semantics<arbitrary>], iteration_bounds = array<i64: 1, 1, 1>, scalar_prefetch = 0 : i64, scratch_operands = 1 : i64, tpu.core_type = #tpu.core_type<tc>, window_params = [{transform_indices = @transform_0, window_bounds = array<i64: 8, 32>}, {transform_indices = @transform_1, window_bounds = array<i64: 32, 96>}, {transform_indices = @transform_2, window_bounds = array<i64: 1, 96>}, {transform_indices = @transform_3, window_bounds = array<i64: 8, 96>}]} {
    %c0_i32 = arith.constant 0 : i32
    %0 = arith.cmpi eq, %arg2, %c0_i32 : i32
    %1 = arith.extui %0 : i1 to i32
    %c0_i32_0 = arith.constant 0 : i32
    %2 = arith.cmpi ne, %1, %c0_i32_0 : i32
    scf.if %2 {
      %cst_10 = arith.constant 0.000000e+00 : f32
      %12 = vector.broadcast %cst_10 : f32 to vector<8x96xf32>
      %c0_11 = arith.constant 0 : index
      %c0_12 = arith.constant 0 : index
      %13 = vector.load %arg7[%c0_11, %c0_12] : memref<8x96xf32, #tpu.memory_space<vmem>>, vector<8x96xf32>
      tpu.vector_store %arg7[%c0_11, %c0_12], %12 {strides = array<i32>} : memref<8x96xf32, #tpu.memory_space<vmem>>, vector<8x96xf32>,
    } else {
    }
    %c0 = arith.constant 0 : index
    %c0_1 = arith.constant 0 : index
    %3 = vector.load %arg7[%c0, %c0_1] : memref<8x96xf32, #tpu.memory_space<vmem>>, vector<8x96xf32>
    %c0_2 = arith.constant 0 : index
    %c0_3 = arith.constant 0 : index
    %4 = vector.load %arg3[%c0_2, %c0_3] : memref<8x32xbf16, #tpu.memory_space<vmem>>, vector<8x32xbf16>
    %c0_4 = arith.constant 0 : index
    %c0_5 = arith.constant 0 : index
    %5 = vector.load %arg4[%c0_4, %c0_5] : memref<32x96xbf16, #tpu.memory_space<vmem>>, vector<32x96xbf16>
    %cst = arith.constant dense<0.000000e+00> : vector<8x96xf32>
    %6 = tpu.matmul %4, %5, %cst {dimension_numbers = #tpu.dot_dimension_numbers<[1], [0], [0], [1], [0, 0, 1, 1], [], []>} : vector<8x32xbf16>, vector<32x96xbf16>, vector<8x96xf32> -> vector<8x96xf32>
    %7 = arith.addf %3, %6 : vector<8x96xf32>
    %c0_6 = arith.constant 0 : index
    %c0_7 = arith.constant 0 : index
    %8 = vector.load %arg7[%c0_6, %c0_7] : memref<8x96xf32, #tpu.memory_space<vmem>>, vector<8x96xf32>
    tpu.vector_store %arg7[%c0_6, %c0_7], %7 {strides = array<i32>} : memref<8x96xf32, #tpu.memory_space<vmem>>, vector<8x96xf32>,
    %c0_i32_8 = arith.constant 0 : i32
    %9 = arith.cmpi eq, %arg2, %c0_i32_8 : i32
    %10 = arith.extui %9 : i1 to i32
    %c0_i32_9 = arith.constant 0 : i32
    %11 = arith.cmpi ne, %10, %c0_i32_9 : i32
    scf.if %11 {
      %c0_10 = arith.constant 0 : index
      %c0_11 = arith.constant 0 : index
      %12 = vector.load %arg7[%c0_10, %c0_11] : memref<8x96xf32, #tpu.memory_space<vmem>>, vector<8x96xf32>
      %c0_12 = arith.constant 0 : index
      %c0_13 = arith.constant 0 : index
      %13 = vector.load %arg5[%c0_12, %c0_13] : memref<1x96xf32, #tpu.memory_space<vmem>>, vector<1x96xf32>
      %14 = vector.broadcast %13 : vector<1x96xf32> to vector<8x96xf32>
      %15 = arith.addf %12, %14 : vector<8x96xf32>
      %16 = arith.truncf %15 : vector<8x96xf32> to vector<8x96xbf16>
      %c0_14 = arith.constant 0 : index
      %c0_15 = arith.constant 0 : index
      %17 = vector.load %arg6[%c0_14, %c0_15] : memref<8x96xbf16, #tpu.memory_space<vmem>>, vector<8x96xbf16>
      tpu.vector_store %arg6[%c0_14, %c0_15], %16 {strides = array<i32>} : memref<8x96xbf16, #tpu.memory_space<vmem>>, vector<8x96xbf16>,
    } else {
    }
    return
  }
  func.func @transform_0(%arg0: i32, %arg1: i32, %arg2: i32) -> (i32, i32) {
    %c0_i32 = arith.constant 0 : i32
    return %arg0, %arg2 : i32, i32
  }
  func.func @transform_1(%arg0: i32, %arg1: i32, %arg2: i32) -> (i32, i32) {
    %c0_i32 = arith.constant 0 : i32
    return %arg2, %arg1 : i32, i32
  }
  func.func @transform_2(%arg0: i32, %arg1: i32, %arg2: i32) -> (i32, i32) {
    %c0_i32 = arith.constant 0 : i32
    %c0_i32_0 = arith.constant 0 : i32
    return %c0_i32, %arg1 : i32, i32
  }
  func.func @transform_3(%arg0: i32, %arg1: i32, %arg2: i32) -> (i32, i32) {
    %c0_i32 = arith.constant 0 : i32
    return %arg0, %arg1 : i32, i32
  }
}

module attributes {stable_mosaic.version = 11 : i64} {
  func.func @_gemm_kernel(%arg0: i32, %arg1: i32, %arg2: i32, %arg3: memref<8x32xbf16, #tpu.memory_space<vmem>>, %arg4: memref<32x64xbf16, #tpu.memory_space<vmem>>, %arg5: memref<1x64xf32, #tpu.memory_space<vmem>>, %arg6: memref<8x64xbf16, #tpu.memory_space<vmem>>, %arg7: memref<8x64xf32, #tpu.memory_space<vmem>>) attributes {dimension_semantics = [#tpu.dimension_semantics<parallel>, #tpu.dimension_semantics<parallel>, #tpu.dimension_semantics<arbitrary>], iteration_bounds = array<i64: 1, 1, 1>, scalar_prefetch = 0 : i64, scratch_operands = 1 : i64, tpu.core_type = #tpu.core_type<tc>, window_params = [{transform_indices = @transform_0, window_bounds = array<i64: 8, 32>}, {transform_indices = @transform_1, window_bounds = array<i64: 32, 64>}, {transform_indices = @transform_2, window_bounds = array<i64: 1, 64>}, {transform_indices = @transform_3, window_bounds = array<i64: 8, 64>}]} {
    %c0_i32 = arith.constant 0 : i32
    %0 = arith.cmpi eq, %arg2, %c0_i32 : i32
    %1 = arith.extui %0 : i1 to i32
    %c0_i32_0 = arith.constant 0 : i32
    %2 = arith.cmpi ne, %1, %c0_i32_0 : i32
    scf.if %2 {
      %cst_10 = arith.constant 0.000000e+00 : f32
      %12 = vector.broadcast %cst_10 : f32 to vector<8x64xf32>
      %c0_11 = arith.constant 0 : index
      %c0_12 = arith.constant 0 : index
      %13 = vector.load %arg7[%c0_11, %c0_12] : memref<8x64xf32, #tpu.memory_space<vmem>>, vector<8x64xf32>
      tpu.vector_store %arg7[%c0_11, %c0_12], %12 {strides = array<i32>} : memref<8x64xf32, #tpu.memory_space<vmem>>, vector<8x64xf32>,
    } else {
    }
    %c0 = arith.constant 0 : index
    %c0_1 = arith.constant 0 : index
    %3 = vector.load %arg7[%c0, %c0_1] : memref<8x64xf32, #tpu.memory_space<vmem>>, vector<8x64xf32>
    %c0_2 = arith.constant 0 : index
    %c0_3 = arith.constant 0 : index
    %4 = vector.load %arg3[%c0_2, %c0_3] : memref<8x32xbf16, #tpu.memory_space<vmem>>, vector<8x32xbf16>
    %c0_4 = arith.constant 0 : index
    %c0_5 = arith.constant 0 : index
    %5 = vector.load %arg4[%c0_4, %c0_5] : memref<32x64xbf16, #tpu.memory_space<vmem>>, vector<32x64xbf16>
    %cst = arith.constant dense<0.000000e+00> : vector<8x64xf32>
    %6 = tpu.matmul %4, %5, %cst {dimension_numbers = #tpu.dot_dimension_numbers<[1], [0], [0], [1], [0, 0, 1, 1], [], []>} : vector<8x32xbf16>, vector<32x64xbf16>, vector<8x64xf32> -> vector<8x64xf32>
    %7 = arith.addf %3, %6 : vector<8x64xf32>
    %c0_6 = arith.constant 0 : index
    %c0_7 = arith.constant 0 : index
    %8 = vector.load %arg7[%c0_6, %c0_7] : memref<8x64xf32, #tpu.memory_space<vmem>>, vector<8x64xf32>
    tpu.vector_store %arg7[%c0_6, %c0_7], %7 {strides = array<i32>} : memref<8x64xf32, #tpu.memory_space<vmem>>, vector<8x64xf32>,
    %c0_i32_8 = arith.constant 0 : i32
    %9 = arith.cmpi eq, %arg2, %c0_i32_8 : i32
    %10 = arith.extui %9 : i1 to i32
    %c0_i32_9 = arith.constant 0 : i32
    %11 = arith.cmpi ne, %10, %c0_i32_9 : i32
    scf.if %11 {
      %c0_10 = arith.constant 0 : index
      %c0_11 = arith.constant 0 : index
      %12 = vector.load %arg7[%c0_10, %c0_11] : memref<8x64xf32, #tpu.memory_space<vmem>>, vector<8x64xf32>
      %c0_12 = arith.constant 0 : index
      %c0_13 = arith.constant 0 : index
      %13 = vector.load %arg5[%c0_12, %c0_13] : memref<1x64xf32, #tpu.memory_space<vmem>>, vector<1x64xf32>
      %14 = vector.broadcast %13 : vector<1x64xf32> to vector<8x64xf32>
      %15 = arith.addf %12, %14 : vector<8x64xf32>
      %cst_14 = arith.constant 5.000000e-01 : f32
      %16 = vector.broadcast %cst_14 : f32 to vector<8x64xf32>
      %17 = arith.mulf %15, %16 : vector<8x64xf32>
      %cst_15 = arith.constant 0.707106769 : f32
      %18 = vector.broadcast %cst_15 : f32 to vector<8x64xf32>
      %19 = arith.mulf %15, %18 : vector<8x64xf32>
      %20 = math.erf %19 : vector<8x64xf32>
      %cst_16 = arith.constant 1.000000e+00 : f32
      %21 = vector.broadcast %cst_16 : f32 to vector<8x64xf32>
      %22 = arith.addf %21, %20 : vector<8x64xf32>
      %23 = arith.mulf %17, %22 : vector<8x64xf32>
      %24 = arith.truncf %23 : vector<8x64xf32> to vector<8x64xbf16>
      %c0_17 = arith.constant 0 : index
      %c0_18 = arith.constant 0 : index
      %25 = vector.load %arg6[%c0_17, %c0_18] : memref<8x64xbf16, #tpu.memory_space<vmem>>, vector<8x64xbf16>
      tpu.vector_store %arg6[%c0_17, %c0_18], %24 {strides = array<i32>} : memref<8x64xbf16, #tpu.memory_space<vmem>>, vector<8x64xbf16>,
    } else {
    }
    return
  }
  func.func @transform_0(%arg0: i32, %arg1: i32, %arg2: i32) -> (i32, i32) {
    %c0_i32 = arith.constant 0 : i32
    return %arg0, %arg2 : i32, i32
  }
  func.func @transform_1(%arg0: i32, %arg1: i32, %arg2: i32) -> (i32, i32) {
    %c0_i32 = arith.constant 0 : i32
    return %arg2, %arg1 : i32, i32
  }
  func.func @transform_2(%arg0: i32, %arg1: i32, %arg2: i32) -> (i32, i32) {
    %c0_i32 = arith.constant 0 : i32
    %c0_i32_0 = arith.constant 0 : i32
    return %c0_i32, %arg1 : i32, i32
  }
  func.func @transform_3(%arg0: i32, %arg1: i32, %arg2: i32) -> (i32, i32) {
    %c0_i32 = arith.constant 0 : i32
    return %arg0, %arg1 : i32, i32
  }
}

module attributes {stable_mosaic.version = 11 : i64} {
  func.func @kernel(%arg0: i32, %arg1: i32, %arg2: memref<8x32xbf16, #tpu.memory_space<vmem>>, %arg3: memref<32x32xbf16, #tpu.memory_space<vmem>>, %arg4: memref<1x32xf32, #tpu.memory_space<vmem>>, %arg5: memref<8x32xbf16, #tpu.memory_space<vmem>>, %arg6: memref<1x32xf32, #tpu.memory_space<vmem>>, %arg7: memref<1x32xf32, #tpu.memory_space<vmem>>, %arg8: memref<8x32xbf16, #tpu.memory_space<vmem>>, %arg9: memref<8x32xf32, #tpu.memory_space<vmem>>) attributes {dimension_semantics = [#tpu.dimension_semantics<parallel>, #tpu.dimension_semantics<arbitrary>], iteration_bounds = array<i64: 1, 1>, scalar_prefetch = 0 : i64, scratch_operands = 1 : i64, tpu.core_type = #tpu.core_type<tc>, window_params = [{transform_indices = @transform_0, window_bounds = array<i64: 8, 32>}, {transform_indices = @transform_1, window_bounds = array<i64: 32, 32>}, {pipeline_mode = #tpu.pipeline_mode<synchronous>, transform_indices = @transform_2, window_bounds = array<i64: 1, 32>}, {transform_indices = @transform_3, window_bounds = array<i64: 8, 32>}, {pipeline_mode = #tpu.pipeline_mode<synchronous>, transform_indices = @transform_4, window_bounds = array<i64: 1, 32>}, {pipeline_mode = #tpu.pipeline_mode<synchronous>, transform_indices = @transform_5, window_bounds = array<i64: 1, 32>}, {transform_indices = @transform_6, window_bounds = array<i64: 8, 32>}]} {
    %c0_i32 = arith.constant 0 : i32
    %0 = arith.cmpi eq, %arg1, %c0_i32 : i32
    %1 = arith.extui %0 : i1 to i32
    %c0_i32_0 = arith.constant 0 : i32
    %2 = arith.cmpi ne, %1, %c0_i32_0 : i32
    scf.if %2 {
      %cst_10 = arith.constant 0.000000e+00 : f32
      %12 = vector.broadcast %cst_10 : f32 to vector<8x32xf32>
      %c0_11 = arith.constant 0 : index
      %c0_12 = arith.constant 0 : index
      %13 = vector.load %arg9[%c0_11, %c0_12] : memref<8x32xf32, #tpu.memory_space<vmem>>, vector<8x32xf32>
      tpu.vector_store %arg9[%c0_11, %c0_12], %12 {strides = array<i32>} : memref<8x32xf32, #tpu.memory_space<vmem>>, vector<8x32xf32>,
    } else {
    }
    %c0 = arith.constant 0 : index
    %c0_1 = arith.constant 0 : index
    %3 = vector.load %arg9[%c0, %c0_1] : memref<8x32xf32, #tpu.memory_space<vmem>>, vector<8x32xf32>
    %c0_2 = arith.constant 0 : index
    %c0_3 = arith.constant 0 : index
    %4 = vector.load %arg2[%c0_2, %c0_3] : memref<8x32xbf16, #tpu.memory_space<vmem>>, vector<8x32xbf16>
    %c0_4 = arith.constant 0 : index
    %c0_5 = arith.constant 0 : index
    %5 = vector.load %arg3[%c0_4, %c0_5] : memref<32x32xbf16, #tpu.memory_space<vmem>>, vector<32x32xbf16>
    %cst = arith.constant dense<0.000000e+00> : vector<8x32xf32>
    %6 = tpu.matmul %4, %5, %cst {dimension_numbers = #tpu.dot_dimension_numbers<[1], [0], [0], [1], [0, 0, 1, 1], [], []>} : vector<8x32xbf16>, vector<32x32xbf16>, vector<8x32xf32> -> vector<8x32xf32>
    %7 = arith.addf %3, %6 : vector<8x32xf32>
    %c0_6 = arith.constant 0 : index
    %c0_7 = arith.constant 0 : index
    %8 = vector.load %arg9[%c0_6, %c0_7] : memref<8x32xf32, #tpu.memory_space<vmem>>, vector<8x32xf32>
    tpu.vector_store %arg9[%c0_6, %c0_7], %7 {strides = array<i32>} : memref<8x32xf32, #tpu.memory_space<vmem>>, vector<8x32xf32>,
    %c0_i32_8 = arith.constant 0 : i32
    %9 = arith.cmpi eq, %arg1, %c0_i32_8 : i32
    %10 = arith.extui %9 : i1 to i32
    %c0_i32_9 = arith.constant 0 : i32
    %11 = arith.cmpi ne, %10, %c0_i32_9 : i32
    scf.if %11 {
      %c0_10 = arith.constant 0 : index
      %c0_11 = arith.constant 0 : index
      %12 = vector.load %arg9[%c0_10, %c0_11] : memref<8x32xf32, #tpu.memory_space<vmem>>, vector<8x32xf32>
      %c0_12 = arith.constant 0 : index
      %c0_13 = arith.constant 0 : index
      %13 = vector.load %arg4[%c0_12, %c0_13] : memref<1x32xf32, #tpu.memory_space<vmem>>, vector<1x32xf32>
      %c0_14 = arith.constant 0 : index
      %c0_15 = arith.constant 0 : index
      %14 = vector.load %arg5[%c0_14, %c0_15] : memref<8x32xbf16, #tpu.memory_space<vmem>>, vector<8x32xbf16>
      %c0_16 = arith.constant 0 : index
      %c0_17 = arith.constant 0 : index
      %15 = vector.load %arg6[%c0_16, %c0_17] : memref<1x32xf32, #tpu.memory_space<vmem>>, vector<1x32xf32>
      %c0_18 = arith.constant 0 : index
      %c0_19 = arith.constant 0 : index
      %16 = vector.load %arg7[%c0_18, %c0_19] : memref<1x32xf32, #tpu.memory_space<vmem>>, vector<1x32xf32>
      %17 = vector.broadcast %13 : vector<1x32xf32> to vector<8x32xf32>
      %18 = arith.addf %12, %17 : vector<8x32xf32>
      %19 = arith.extf %14 : vector<8x32xbf16> to vector<8x32xf32>
      %20 = arith.addf %18, %19 : vector<8x32xf32>
      %cst_20 = arith.constant dense<0.000000e+00> : vector<8xf32>
      %21 = vector.multi_reduction <add>, %20, %cst_20 [1] : vector<8x32xf32> to vector<8xf32>
      %22 = vector.shape_cast %21 : vector<8xf32> to vector<8x1xf32>
      %cst_21 = arith.constant 3.200000e+01 : f32
      %23 = vector.broadcast %cst_21 : f32 to vector<8x1xf32>
      %24 = arith.divf %22, %23 : vector<8x1xf32>
      %25 = vector.broadcast %24 : vector<8x1xf32> to vector<8x32xf32>
      %26 = arith.subf %20, %25 : vector<8x32xf32>
      %27 = arith.mulf %26, %26 : vector<8x32xf32>
      %cst_22 = arith.constant dense<0.000000e+00> : vector<8xf32>
      %28 = vector.multi_reduction <add>, %27, %cst_22 [1] : vector<8x32xf32> to vector<8xf32>
      %29 = vector.shape_cast %28 : vector<8xf32> to vector<8x1xf32>
      %cst_23 = arith.constant 3.200000e+01 : f32
      %30 = vector.broadcast %cst_23 : f32 to vector<8x1xf32>
      %31 = arith.divf %29, %30 : vector<8x1xf32>
      %32 = vector.broadcast %24 : vector<8x1xf32> to vector<8x32xf32>
      %33 = arith.subf %20, %32 : vector<8x32xf32>
      %cst_24 = arith.constant 9.99999996E-13 : f32
      %34 = vector.broadcast %cst_24 : f32 to vector<8x1xf32>
      %35 = arith.addf %31, %34 : vector<8x1xf32>
      %36 = math.rsqrt %35 : vector<8x1xf32>
      %37 = vector.broadcast %36 : vector<8x1xf32> to vector<8x32xf32>
      %38 = arith.mulf %33, %37 : vector<8x32xf32>
      %39 = vector.broadcast %15 : vector<1x32xf32> to vector<8x32xf32>
      %40 = arith.mulf %38, %39 : vector<8x32xf32>
      %41 = vector.broadcast %16 : vector<1x32xf32> to vector<8x32xf32>
      %42 = arith.addf %40, %41 : vector<8x32xf32>
      %43 = arith.truncf %42 : vector<8x32xf32> to vector<8x32xbf16>
      %c0_25 = arith.constant 0 : index
      %c0_26 = arith.constant 0 : index
      %44 = vector.load %arg8[%c0_25, %c0_26] : memref<8x32xbf16, #tpu.memory_space<vmem>>, vector<8x32xbf16>
      tpu.vector_store %arg8[%c0_25, %c0_26], %43 {strides = array<i32>} : memref<8x32xbf16, #tpu.memory_space<vmem>>, vector<8x32xbf16>,
    } else {
    }
    return
  }
  func.func @transform_0(%arg0: i32, %arg1: i32) -> (i32, i32) {
    %c0_i32 = arith.constant 0 : i32
    return %arg0, %arg1 : i32, i32
  }
  func.func @transform_1(%arg0: i32, %arg1: i32) -> (i32, i32) {
    %c0_i32 = arith.constant 0 : i32
    %c0_i32_0 = arith.constant 0 : i32
    return %arg1, %c0_i32 : i32, i32
  }
  func.func @transform_2(%arg0: i32, %arg1: i32) -> (i32, i32) {
    %c0_i32 = arith.constant 0 : i32
    %c0_i32_0 = arith.constant 0 : i32
    %c0_i32_1 = arith.constant 0 : i32
    return %c0_i32, %c0_i32_0 : i32, i32
  }
  func.func @transform_3(%arg0: i32, %arg1: i32) -> (i32, i32) {
    %c0_i32 = arith.constant 0 : i32
    %c0_i32_0 = arith.constant 0 : i32
    return %arg0, %c0_i32 : i32, i32
  }
  func.func @transform_4(%arg0: i32, %arg1: i32) -> (i32, i32) {
    %c0_i32 = arith.constant 0 : i32
    %c0_i32_0 = arith.constant 0 : i32
    %c0_i32_1 = arith.constant 0 : i32
    return %c0_i32, %c0_i32_0 : i32, i32
  }
  func.func @transform_5(%arg0: i32, %arg1: i32) -> (i32, i32) {
    %c0_i32 = arith.constant 0 : i32
    %c0_i32_0 = arith.constant 0 : i32
    %c0_i32_1 = arith.constant 0 : i32
    return %c0_i32, %c0_i32_0 : i32, i32
  }
  func.func @transform_6(%arg0: i32, %arg1: i32) -> (i32, i32) {
    %c0_i32 = arith.constant 0 : i32
    %c0_i32_0 = arith.constant 0 : i32
    return %arg0, %c0_i32 : i32, i32
  }
}

module attributes {stable_mosaic.version = 11 : i64} {
  func.func @kernel(%arg0: i32, %arg1: memref<1x8x96xbf16, #tpu.memory_space<vmem>>, %arg2: memref<1x4x96xbf16, #tpu.memory_space<vmem>>, %arg3: memref<1x8x32xbf16, #tpu.memory_space<vmem>>) attributes {dimension_semantics = [#tpu.dimension_semantics<parallel>], iteration_bounds = array<i64: 2>, scalar_prefetch = 0 : i64, scratch_operands = 0 : i64, tpu.core_type = #tpu.core_type<tc>, window_params = [{transform_indices = @transform_0, window_bounds = array<i64: 1, 8, 96>}, {transform_indices = @transform_1, window_bounds = array<i64: 1, 4, 96>}, {transform_indices = @transform_2, window_bounds = array<i64: 1, 8, 32>}]} {
    %c0 = arith.constant 0 : index
    %c0_0 = arith.constant 0 : index
    %c0_1 = arith.constant 0 : index
    %0 = vector.load %arg1[%c0, %c0_0, %c0_1] : memref<1x8x96xbf16, #tpu.memory_space<vmem>>, vector<1x8x96xbf16>
    %c0_2 = arith.constant 0 : index
    %c0_3 = arith.constant 0 : index
    %c0_4 = arith.constant 0 : index
    %1 = vector.load %arg2[%c0_2, %c0_3, %c0_4] : memref<1x4x96xbf16, #tpu.memory_space<vmem>>, vector<1x4x96xbf16>
    %2 = vector.extract_strided_slice %0 {offsets = [0, 0, 0], sizes = [1, 8, 32], strides = [1, 1, 1]} : vector<1x8x96xbf16> to vector<1x8x32xbf16>
    %3 = vector.extract_strided_slice %1 {offsets = [0, 0, 32], sizes = [1, 4, 32], strides = [1, 1, 1]} : vector<1x4x96xbf16> to vector<1x4x32xbf16>
    %4 = vector.extract_strided_slice %1 {offsets = [0, 0, 64], sizes = [1, 4, 32], strides = [1, 1, 1]} : vector<1x4x96xbf16> to vector<1x4x32xbf16>
    %5 = vector.extract_strided_slice %2 {offsets = [0, 0, 0], sizes = [1, 8, 8], strides = [1, 1, 1]} : vector<1x8x32xbf16> to vector<1x8x8xbf16>
    %6 = vector.extract_strided_slice %3 {offsets = [0, 0, 0], sizes = [1, 4, 8], strides = [1, 1, 1]} : vector<1x4x32xbf16> to vector<1x4x8xbf16>
    %7 = vector.extract_strided_slice %4 {offsets = [0, 0, 0], sizes = [1, 4, 8], strides = [1, 1, 1]} : vector<1x4x32xbf16> to vector<1x4x8xbf16>
    "tpu.trace_start"() <{level = 10 : i32, message = "bqd,bkd->bqk"}> : () -> ()
    %cst = arith.constant dense<0.000000e+00> : vector<1x8x4xf32>
    %8 = tpu.matmul %5, %6, %cst {dimension_numbers = #tpu.dot_dimension_numbers<[2], [2], [1], [1], [0, 0, 0, 1, 1, 1], [0], [0]>} : vector<1x8x8xbf16>, vector<1x4x8xbf16>, vector<1x8x4xf32> -> vector<1x8x4xf32>
    "tpu.trace_stop"() : () -> ()
    %cst_5 = arith.constant dense<0xFF800000> : vector<1x8xf32>
    %9 = vector.multi_reduction <maximumf>, %8, %cst_5 [2] : vector<1x8x4xf32> to vector<1x8xf32>
    %10 = vector.shape_cast %9 : vector<1x8xf32> to vector<1x8x1xf32>
    %11 = vector.broadcast %10 : vector<1x8x1xf32> to vector<1x8x4xf32>
    %12 = arith.subf %8, %11 : vector<1x8x4xf32>
    %13 = math.exp %12 : vector<1x8x4xf32>
    %cst_6 = arith.constant dense<0.000000e+00> : vector<1x8xf32>
    %14 = vector.multi_reduction <add>, %13, %cst_6 [2] : vector<1x8x4xf32> to vector<1x8xf32>
    %15 = vector.shape_cast %14 : vector<1x8xf32> to vector<1x8x1xf32>
    %16 = tpu.reciprocal %15 {approx = true} : vector<1x8x1xf32> -> vector<1x8x1xf32>
    %17 = vector.broadcast %16 : vector<1x8x1xf32> to vector<1x8x4xf32>
    %18 = arith.mulf %13, %17 : vector<1x8x4xf32>
    %19 = arith.truncf %18 : vector<1x8x4xf32> to vector<1x8x4xbf16>
    "tpu.trace_start"() <{level = 10 : i32, message = "bqk,bkd->bqd"}> : () -> ()
    %cst_7 = arith.constant dense<0.000000e+00> : vector<1x8x8xf32>
    %20 = tpu.matmul %19, %7, %cst_7 {dimension_numbers = #tpu.dot_dimension_numbers<[2], [1], [1], [2], [0, 0, 0, 1, 1, 2], [0], [0]>} : vector<1x8x4xbf16>, vector<1x4x8xbf16>, vector<1x8x8xf32> -> vector<1x8x8xf32>
    "tpu.trace_stop"() : () -> ()
    %21 = vector.extract_strided_slice %2 {offsets = [0, 0, 8], sizes = [1, 8, 8], strides = [1, 1, 1]} : vector<1x8x32xbf16> to vector<1x8x8xbf16>
    %22 = vector.extract_strided_slice %3 {offsets = [0, 0, 8], sizes = [1, 4, 8], strides = [1, 1, 1]} : vector<1x4x32xbf16> to vector<1x4x8xbf16>
    %23 = vector.extract_strided_slice %4 {offsets = [0, 0, 8], sizes = [1, 4, 8], strides = [1, 1, 1]} : vector<1x4x32xbf16> to vector<1x4x8xbf16>
    "tpu.trace_start"() <{level = 10 : i32, message = "bqd,bkd->bqk"}> : () -> ()
    %cst_8 = arith.constant dense<0.000000e+00> : vector<1x8x4xf32>
    %24 = tpu.matmul %21, %22, %cst_8 {dimension_numbers = #tpu.dot_dimension_numbers<[2], [2], [1], [1], [0, 0, 0, 1, 1, 1], [0], [0]>} : vector<1x8x8xbf16>, vector<1x4x8xbf16>, vector<1x8x4xf32> -> vector<1x8x4xf32>
    "tpu.trace_stop"() : () -> ()
    %cst_9 = arith.constant dense<0xFF800000> : vector<1x8xf32>
    %25 = vector.multi_reduction <maximumf>, %24, %cst_9 [2] : vector<1x8x4xf32> to vector<1x8xf32>
    %26 = vector.shape_cast %25 : vector<1x8xf32> to vector<1x8x1xf32>
    %27 = vector.broadcast %26 : vector<1x8x1xf32> to vector<1x8x4xf32>
    %28 = arith.subf %24, %27 : vector<1x8x4xf32>
    %29 = math.exp %28 : vector<1x8x4xf32>
    %cst_10 = arith.constant dense<0.000000e+00> : vector<1x8xf32>
    %30 = vector.multi_reduction <add>, %29, %cst_10 [2] : vector<1x8x4xf32> to vector<1x8xf32>
    %31 = vector.shape_cast %30 : vector<1x8xf32> to vector<1x8x1xf32>
    %32 = tpu.reciprocal %31 {approx = true} : vector<1x8x1xf32> -> vector<1x8x1xf32>
    %33 = vector.broadcast %32 : vector<1x8x1xf32> to vector<1x8x4xf32>
    %34 = arith.mulf %29, %33 : vector<1x8x4xf32>
    %35 = arith.truncf %34 : vector<1x8x4xf32> to vector<1x8x4xbf16>
    "tpu.trace_start"() <{level = 10 : i32, message = "bqk,bkd->bqd"}> : () -> ()
    %cst_11 = arith.constant dense<0.000000e+00> : vector<1x8x8xf32>
    %36 = tpu.matmul %35, %23, %cst_11 {dimension_numbers = #tpu.dot_dimension_numbers<[2], [1], [1], [2], [0, 0, 0, 1, 1, 2], [0], [0]>} : vector<1x8x4xbf16>, vector<1x4x8xbf16>, vector<1x8x8xf32> -> vector<1x8x8xf32>
    "tpu.trace_stop"() : () -> ()
    %37 = vector.extract_strided_slice %2 {offsets = [0, 0, 16], sizes = [1, 8, 8], strides = [1, 1, 1]} : vector<1x8x32xbf16> to vector<1x8x8xbf16>
    %38 = vector.extract_strided_slice %3 {offsets = [0, 0, 16], sizes = [1, 4, 8], strides = [1, 1, 1]} : vector<1x4x32xbf16> to vector<1x4x8xbf16>
    %39 = vector.extract_strided_slice %4 {offsets = [0, 0, 16], sizes = [1, 4, 8], strides = [1, 1, 1]} : vector<1x4x32xbf16> to vector<1x4x8xbf16>
    "tpu.trace_start"() <{level = 10 : i32, message = "bqd,bkd->bqk"}> : () -> ()
    %cst_12 = arith.constant dense<0.000000e+00> : vector<1x8x4xf32>
    %40 = tpu.matmul %37, %38, %cst_12 {dimension_numbers = #tpu.dot_dimension_numbers<[2], [2], [1], [1], [0, 0, 0, 1, 1, 1], [0], [0]>} : vector<1x8x8xbf16>, vector<1x4x8xbf16>, vector<1x8x4xf32> -> vector<1x8x4xf32>
    "tpu.trace_stop"() : () -> ()
    %cst_13 = arith.constant dense<0xFF800000> : vector<1x8xf32>
    %41 = vector.multi_reduction <maximumf>, %40, %cst_13 [2] : vector<1x8x4xf32> to vector<1x8xf32>
    %42 = vector.shape_cast %41 : vector<1x8xf32> to vector<1x8x1xf32>
    %43 = vector.broadcast %42 : vector<1x8x1xf32> to vector<1x8x4xf32>
    %44 = arith.subf %40, %43 : vector<1x8x4xf32>
    %45 = math.exp %44 : vector<1x8x4xf32>
    %cst_14 = arith.constant dense<0.000000e+00> : vector<1x8xf32>
    %46 = vector.multi_reduction <add>, %45, %cst_14 [2] : vector<1x8x4xf32> to vector<1x8xf32>
    %47 = vector.shape_cast %46 : vector<1x8xf32> to vector<1x8x1xf32>
    %48 = tpu.reciprocal %47 {approx = true} : vector<1x8x1xf32> -> vector<1x8x1xf32>
    %49 = vector.broadcast %48 : vector<1x8x1xf32> to vector<1x8x4xf32>
    %50 = arith.mulf %45, %49 : vector<1x8x4xf32>
    %51 = arith.truncf %50 : vector<1x8x4xf32> to vector<1x8x4xbf16>
    "tpu.trace_start"() <{level = 10 : i32, message = "bqk,bkd->bqd"}> : () -> ()
    %cst_15 = arith.constant dense<0.000000e+00> : vector<1x8x8xf32>
    %52 = tpu.matmul %51, %39, %cst_15 {dimension_numbers = #tpu.dot_dimension_numbers<[2], [1], [1], [2], [0, 0, 0, 1, 1, 2], [0], [0]>} : vector<1x8x4xbf16>, vector<1x4x8xbf16>, vector<1x8x8xf32> -> vector<1x8x8xf32>
    "tpu.trace_stop"() : () -> ()
    %53 = vector.extract_strided_slice %2 {offsets = [0, 0, 24], sizes = [1, 8, 8], strides = [1, 1, 1]} : vector<1x8x32xbf16> to vector<1x8x8xbf16>
    %54 = vector.extract_strided_slice %3 {offsets = [0, 0, 24], sizes = [1, 4, 8], strides = [1, 1, 1]} : vector<1x4x32xbf16> to vector<1x4x8xbf16>
    %55 = vector.extract_strided_slice %4 {offsets = [0, 0, 24], sizes = [1, 4, 8], strides = [1, 1, 1]} : vector<1x4x32xbf16> to vector<1x4x8xbf16>
    "tpu.trace_start"() <{level = 10 : i32, message = "bqd,bkd->bqk"}> : () -> ()
    %cst_16 = arith.constant dense<0.000000e+00> : vector<1x8x4xf32>
    %56 = tpu.matmul %53, %54, %cst_16 {dimension_numbers = #tpu.dot_dimension_numbers<[2], [2], [1], [1], [0, 0, 0, 1, 1, 1], [0], [0]>} : vector<1x8x8xbf16>, vector<1x4x8xbf16>, vector<1x8x4xf32> -> vector<1x8x4xf32>
    "tpu.trace_stop"() : () -> ()
    %cst_17 = arith.constant dense<0xFF800000> : vector<1x8xf32>
    %57 = vector.multi_reduction <maximumf>, %56, %cst_17 [2] : vector<1x8x4xf32> to vector<1x8xf32>
    %58 = vector.shape_cast %57 : vector<1x8xf32> to vector<1x8x1xf32>
    %59 = vector.broadcast %58 : vector<1x8x1xf32> to vector<1x8x4xf32>
    %60 = arith.subf %56, %59 : vector<1x8x4xf32>
    %61 = math.exp %60 : vector<1x8x4xf32>
    %cst_18 = arith.constant dense<0.000000e+00> : vector<1x8xf32>
    %62 = vector.multi_reduction <add>, %61, %cst_18 [2] : vector<1x8x4xf32> to vector<1x8xf32>
    %63 = vector.shape_cast %62 : vector<1x8xf32> to vector<1x8x1xf32>
    %64 = tpu.reciprocal %63 {approx = true} : vector<1x8x1xf32> -> vector<1x8x1xf32>
    %65 = vector.broadcast %64 : vector<1x8x1xf32> to vector<1x8x4xf32>
    %66 = arith.mulf %61, %65 : vector<1x8x4xf32>
    %67 = arith.truncf %66 : vector<1x8x4xf32> to vector<1x8x4xbf16>
    "tpu.trace_start"() <{level = 10 : i32, message = "bqk,bkd->bqd"}> : () -> ()
    %cst_19 = arith.constant dense<0.000000e+00> : vector<1x8x8xf32>
    %68 = tpu.matmul %67, %55, %cst_19 {dimension_numbers = #tpu.dot_dimension_numbers<[2], [1], [1], [2], [0, 0, 0, 1, 1, 2], [0], [0]>} : vector<1x8x4xbf16>, vector<1x4x8xbf16>, vector<1x8x8xf32> -> vector<1x8x8xf32>
    "tpu.trace_stop"() : () -> ()
    %69 = tpu.concatenate %20, %36, %52, %68 in 2 : vector<1x8x8xf32>, vector<1x8x8xf32>, vector<1x8x8xf32>, vector<1x8x8xf32> -> vector<1x8x32xf32>
    %70 = arith.truncf %69 : vector<1x8x32xf32> to vector<1x8x32xbf16>
    %c0_20 = arith.constant 0 : index
    %c0_21 = arith.constant 0 : index
    %c0_22 = arith.constant 0 : index
    %71 = vector.load %arg3[%c0_20, %c0_21, %c0_22] : memref<1x8x32xbf16, #tpu.memory_space<vmem>>, vector<1x8x32xbf16>
    tpu.vector_store %arg3[%c0_20, %c0_21, %c0_22], %70 {strides = array<i32>} : memref<1x8x32xbf16, #tpu.memory_space<vmem>>, vector<1x8x32xbf16>,
    return
  }
  func.func @transform_0(%arg0: i32) -> (i32, i32, i32) {
    %c0_i32 = arith.constant 0 : i32
    %c0_i32_0 = arith.constant 0 : i32
    %c0_i32_1 = arith.constant 0 : i32
    return %arg0, %c0_i32, %c0_i32_0 : i32, i32, i32
  }
  func.func @transform_1(%arg0: i32) -> (i32, i32, i32) {
    %c0_i32 = arith.constant 0 : i32
    %c0_i32_0 = arith.constant 0 : i32
    %c0_i32_1 = arith.constant 0 : i32
    return %arg0, %c0_i32, %c0_i32_0 : i32, i32, i32
  }
  func.func @transform_2(%arg0: i32) -> (i32, i32, i32) {
    %c0_i32 = arith.constant 0 : i32
    %c0_i32_0 = arith.constant 0 : i32
    %c0_i32_1 = arith.constant 0 : i32
    return %arg0, %c0_i32, %c0_i32_0 : i32, i32, i32
  }
}

module attributes {stable_mosaic.version = 11 : i64} {
  func.func @kernel(%arg0: i32, %arg1: i32, %arg2: memref<8x64xbf16, #tpu.memory_space<vmem>>, %arg3: memref<64x32xbf16, #tpu.memory_space<vmem>>, %arg4: memref<1x32xf32, #tpu.memory_space<vmem>>, %arg5: memref<8x32xbf16, #tpu.memory_space<vmem>>, %arg6: memref<1x32xf32, #tpu.memory_space<vmem>>, %arg7: memref<1x32xf32, #tpu.memory_space<vmem>>, %arg8: memref<8x32xbf16, #tpu.memory_space<vmem>>, %arg9: memref<8x32xf32, #tpu.memory_space<vmem>>) attributes {dimension_semantics = [#tpu.dimension_semantics<parallel>, #tpu.dimension_semantics<arbitrary>], iteration_bounds = array<i64: 1, 1>, scalar_prefetch = 0 : i64, scratch_operands = 1 : i64, tpu.core_type = #tpu.core_type<tc>, window_params = [{transform_indices = @transform_0, window_bounds = array<i64: 8, 64>}, {transform_indices = @transform_1, window_bounds = array<i64: 64, 32>}, {pipeline_mode = #tpu.pipeline_mode<synchronous>, transform_indices = @transform_2, window_bounds = array<i64: 1, 32>}, {transform_indices = @transform_3, window_bounds = array<i64: 8, 32>}, {pipeline_mode = #tpu.pipeline_mode<synchronous>, transform_indices = @transform_4, window_bounds = array<i64: 1, 32>}, {pipeline_mode = #tpu.pipeline_mode<synchronous>, transform_indices = @transform_5, window_bounds = array<i64: 1, 32>}, {transform_indices = @transform_6, window_bounds = array<i64: 8, 32>}]} {
    %c0_i32 = arith.constant 0 : i32
    %0 = arith.cmpi eq, %arg1, %c0_i32 : i32
    %1 = arith.extui %0 : i1 to i32
    %c0_i32_0 = arith.constant 0 : i32
    %2 = arith.cmpi ne, %1, %c0_i32_0 : i32
    scf.if %2 {
      %cst_10 = arith.constant 0.000000e+00 : f32
      %12 = vector.broadcast %cst_10 : f32 to vector<8x32xf32>
      %c0_11 = arith.constant 0 : index
      %c0_12 = arith.constant 0 : index
      %13 = vector.load %arg9[%c0_11, %c0_12] : memref<8x32xf32, #tpu.memory_space<vmem>>, vector<8x32xf32>
      tpu.vector_store %arg9[%c0_11, %c0_12], %12 {strides = array<i32>} : memref<8x32xf32, #tpu.memory_space<vmem>>, vector<8x32xf32>,
    } else {
    }
    %c0 = arith.constant 0 : index
    %c0_1 = arith.constant 0 : index
    %3 = vector.load %arg9[%c0, %c0_1] : memref<8x32xf32, #tpu.memory_space<vmem>>, vector<8x32xf32>
    %c0_2 = arith.constant 0 : index
    %c0_3 = arith.constant 0 : index
    %4 = vector.load %arg2[%c0_2, %c0_3] : memref<8x64xbf16, #tpu.memory_space<vmem>>, vector<8x64xbf16>
    %c0_4 = arith.constant 0 : index
    %c0_5 = arith.constant 0 : index
    %5 = vector.load %arg3[%c0_4, %c0_5] : memref<64x32xbf16, #tpu.memory_space<vmem>>, vector<64x32xbf16>
    %cst = arith.constant dense<0.000000e+00> : vector<8x32xf32>
    %6 = tpu.matmul %4, %5, %cst {dimension_numbers = #tpu.dot_dimension_numbers<[1], [0], [0], [1], [0, 0, 1, 1], [], []>} : vector<8x64xbf16>, vector<64x32xbf16>, vector<8x32xf32> -> vector<8x32xf32>
    %7 = arith.addf %3, %6 : vector<8x32xf32>
    %c0_6 = arith.constant 0 : index
    %c0_7 = arith.constant 0 : index
    %8 = vector.load %arg9[%c0_6, %c0_7] : memref<8x32xf32, #tpu.memory_space<vmem>>, vector<8x32xf32>
    tpu.vector_store %arg9[%c0_6, %c0_7], %7 {strides = array<i32>} : memref<8x32xf32, #tpu.memory_space<vmem>>, vector<8x32xf32>,
    %c0_i32_8 = arith.constant 0 : i32
    %9 = arith.cmpi eq, %arg1, %c0_i32_8 : i32
    %10 = arith.extui %9 : i1 to i32
    %c0_i32_9 = arith.constant 0 : i32
    %11 = arith.cmpi ne, %10, %c0_i32_9 : i32
    scf.if %11 {
      %c0_10 = arith.constant 0 : index
      %c0_11 = arith.constant 0 : index
      %12 = vector.load %arg9[%c0_10, %c0_11] : memref<8x32xf32, #tpu.memory_space<vmem>>, vector<8x32xf32>
      %c0_12 = arith.constant 0 : index
      %c0_13 = arith.constant 0 : index
      %13 = vector.load %arg4[%c0_12, %c0_13] : memref<1x32xf32, #tpu.memory_space<vmem>>, vector<1x32xf32>
      %c0_14 = arith.constant 0 : index
      %c0_15 = arith.constant 0 : index
      %14 = vector.load %arg5[%c0_14, %c0_15] : memref<8x32xbf16, #tpu.memory_space<vmem>>, vector<8x32xbf16>
      %c0_16 = arith.constant 0 : index
      %c0_17 = arith.constant 0 : index
      %15 = vector.load %arg6[%c0_16, %c0_17] : memref<1x32xf32, #tpu.memory_space<vmem>>, vector<1x32xf32>
      %c0_18 = arith.constant 0 : index
      %c0_19 = arith.constant 0 : index
      %16 = vector.load %arg7[%c0_18, %c0_19] : memref<1x32xf32, #tpu.memory_space<vmem>>, vector<1x32xf32>
      %17 = vector.broadcast %13 : vector<1x32xf32> to vector<8x32xf32>
      %18 = arith.addf %12, %17 : vector<8x32xf32>
      %19 = arith.extf %14 : vector<8x32xbf16> to vector<8x32xf32>
      %20 = arith.addf %18, %19 : vector<8x32xf32>
      %cst_20 = arith.constant dense<0.000000e+00> : vector<8xf32>
      %21 = vector.multi_reduction <add>, %20, %cst_20 [1] : vector<8x32xf32> to vector<8xf32>
      %22 = vector.shape_cast %21 : vector<8xf32> to vector<8x1xf32>
      %cst_21 = arith.constant 3.200000e+01 : f32
      %23 = vector.broadcast %cst_21 : f32 to vector<8x1xf32>
      %24 = arith.divf %22, %23 : vector<8x1xf32>
      %25 = vector.broadcast %24 : vector<8x1xf32> to vector<8x32xf32>
      %26 = arith.subf %20, %25 : vector<8x32xf32>
      %27 = arith.mulf %26, %26 : vector<8x32xf32>
      %cst_22 = arith.constant dense<0.000000e+00> : vector<8xf32>
      %28 = vector.multi_reduction <add>, %27, %cst_22 [1] : vector<8x32xf32> to vector<8xf32>
      %29 = vector.shape_cast %28 : vector<8xf32> to vector<8x1xf32>
      %cst_23 = arith.constant 3.200000e+01 : f32
      %30 = vector.broadcast %cst_23 : f32 to vector<8x1xf32>
      %31 = arith.divf %29, %30 : vector<8x1xf32>
      %32 = vector.broadcast %24 : vector<8x1xf32> to vector<8x32xf32>
      %33 = arith.subf %20, %32 : vector<8x32xf32>
      %cst_24 = arith.constant 9.99999996E-13 : f32
      %34 = vector.broadcast %cst_24 : f32 to vector<8x1xf32>
      %35 = arith.addf %31, %34 : vector<8x1xf32>
      %36 = math.rsqrt %35 : vector<8x1xf32>
      %37 = vector.broadcast %36 : vector<8x1xf32> to vector<8x32xf32>
      %38 = arith.mulf %33, %37 : vector<8x32xf32>
      %39 = vector.broadcast %15 : vector<1x32xf32> to vector<8x32xf32>
      %40 = arith.mulf %38, %39 : vector<8x32xf32>
      %41 = vector.broadcast %16 : vector<1x32xf32> to vector<8x32xf32>
      %42 = arith.addf %40, %41 : vector<8x32xf32>
      %43 = arith.truncf %42 : vector<8x32xf32> to vector<8x32xbf16>
      %c0_25 = arith.constant 0 : index
      %c0_26 = arith.constant 0 : index
      %44 = vector.load %arg8[%c0_25, %c0_26] : memref<8x32xbf16, #tpu.memory_space<vmem>>, vector<8x32xbf16>
      tpu.vector_store %arg8[%c0_25, %c0_26], %43 {strides = array<i32>} : memref<8x32xbf16, #tpu.memory_space<vmem>>, vector<8x32xbf16>,
    } else {
    }
    return
  }
  func.func @transform_0(%arg0: i32, %arg1: i32) -> (i32, i32) {
    %c0_i32 = arith.constant 0 : i32
    return %arg0, %arg1 : i32, i32
  }
  func.func @transform_1(%arg0: i32, %arg1: i32) -> (i32, i32) {
    %c0_i32 = arith.constant 0 : i32
    %c0_i32_0 = arith.constant 0 : i32
    return %arg1, %c0_i32 : i32, i32
  }
  func.func @transform_2(%arg0: i32, %arg1: i32) -> (i32, i32) {
    %c0_i32 = arith.constant 0 : i32
    %c0_i32_0 = arith.constant 0 : i32
    %c0_i32_1 = arith.constant 0 : i32
    return %c0_i32, %c0_i32_0 : i32, i32
  }
  func.func @transform_3(%arg0: i32, %arg1: i32) -> (i32, i32) {
    %c0_i32 = arith.constant 0 : i32
    %c0_i32_0 = arith.constant 0 : i32
    return %arg0, %c0_i32 : i32, i32
  }
  func.func @transform_4(%arg0: i32, %arg1: i32) -> (i32, i32) {
    %c0_i32 = arith.constant 0 : i32
    %c0_i32_0 = arith.constant 0 : i32
    %c0_i32_1 = arith.constant 0 : i32
    return %c0_i32, %c0_i32_0 : i32, i32
  }
  func.func @transform_5(%arg0: i32, %arg1: i32) -> (i32, i32) {
    %c0_i32 = arith.constant 0 : i32
    %c0_i32_0 = arith.constant 0 : i32
    %c0_i32_1 = arith.constant 0 : i32
    return %c0_i32, %c0_i32_0 : i32, i32
  }
  func.func @transform_6(%arg0: i32, %arg1: i32) -> (i32, i32) {
    %c0_i32 = arith.constant 0 : i32
    %c0_i32_0 = arith.constant 0 : i32
    return %arg0, %c0_i32 : i32, i32
  }
}

module attributes {stable_mosaic.version = 11 : i64} {
  func.func @kernel(%arg0: i32, %arg1: i32, %arg2: memref<16x32xbf16, #tpu.memory_space<vmem>>, %arg3: memref<32x32xbf16, #tpu.memory_space<vmem>>, %arg4: memref<1x32xf32, #tpu.memory_space<vmem>>, %arg5: memref<1x32xf32, #tpu.memory_space<vmem>>, %arg6: memref<1x32xf32, #tpu.memory_space<vmem>>, %arg7: memref<16x32xbf16, #tpu.memory_space<vmem>>, %arg8: memref<16x32xf32, #tpu.memory_space<vmem>>) attributes {dimension_semantics = [#tpu.dimension_semantics<parallel>, #tpu.dimension_semantics<arbitrary>], iteration_bounds = array<i64: 1, 1>, scalar_prefetch = 0 : i64, scratch_operands = 1 : i64, tpu.core_type = #tpu.core_type<tc>, window_params = [{transform_indices = @transform_0, window_bounds = array<i64: 16, 32>}, {transform_indices = @transform_1, window_bounds = array<i64: 32, 32>}, {pipeline_mode = #tpu.pipeline_mode<synchronous>, transform_indices = @transform_2, window_bounds = array<i64: 1, 32>}, {pipeline_mode = #tpu.pipeline_mode<synchronous>, transform_indices = @transform_3, window_bounds = array<i64: 1, 32>}, {pipeline_mode = #tpu.pipeline_mode<synchronous>, transform_indices = @transform_4, window_bounds = array<i64: 1, 32>}, {transform_indices = @transform_5, window_bounds = array<i64: 16, 32>}]} {
    %c0_i32 = arith.constant 0 : i32
    %0 = arith.cmpi eq, %arg1, %c0_i32 : i32
    %1 = arith.extui %0 : i1 to i32
    %c0_i32_0 = arith.constant 0 : i32
    %2 = arith.cmpi ne, %1, %c0_i32_0 : i32
    scf.if %2 {
      %cst_10 = arith.constant 0.000000e+00 : f32
      %12 = vector.broadcast %cst_10 : f32 to vector<16x32xf32>
      %c0_11 = arith.constant 0 : index
      %c0_12 = arith.constant 0 : index
      %13 = vector.load %arg8[%c0_11, %c0_12] : memref<16x32xf32, #tpu.memory_space<vmem>>, vector<16x32xf32>
      tpu.vector_store %arg8[%c0_11, %c0_12], %12 {strides = array<i32>} : memref<16x32xf32, #tpu.memory_space<vmem>>, vector<16x32xf32>,
    } else {
    }
    %c0 = arith.constant 0 : index
    %c0_1 = arith.constant 0 : index
    %3 = vector.load %arg8[%c0, %c0_1] : memref<16x32xf32, #tpu.memory_space<vmem>>, vector<16x32xf32>
    %c0_2 = arith.constant 0 : index
    %c0_3 = arith.constant 0 : index
    %4 = vector.load %arg2[%c0_2, %c0_3] : memref<16x32xbf16, #tpu.memory_space<vmem>>, vector<16x32xbf16>
    %c0_4 = arith.constant 0 : index
    %c0_5 = arith.constant 0 : index
    %5 = vector.load %arg3[%c0_4, %c0_5] : memref<32x32xbf16, #tpu.memory_space<vmem>>, vector<32x32xbf16>
    %cst = arith.constant dense<0.000000e+00> : vector<16x32xf32>
    %6 = tpu.matmul %4, %5, %cst {dimension_numbers = #tpu.dot_dimension_numbers<[1], [0], [0], [1], [0, 0, 1, 1], [], []>} : vector<16x32xbf16>, vector<32x32xbf16>, vector<16x32xf32> -> vector<16x32xf32>
    %7 = arith.addf %3, %6 : vector<16x32xf32>
    %c0_6 = arith.constant 0 : index
    %c0_7 = arith.constant 0 : index
    %8 = vector.load %arg8[%c0_6, %c0_7] : memref<16x32xf32, #tpu.memory_space<vmem>>, vector<16x32xf32>
    tpu.vector_store %arg8[%c0_6, %c0_7], %7 {strides = array<i32>} : memref<16x32xf32, #tpu.memory_space<vmem>>, vector<16x32xf32>,
    %c0_i32_8 = arith.constant 0 : i32
    %9 = arith.cmpi eq, %arg1, %c0_i32_8 : i32
    %10 = arith.extui %9 : i1 to i32
    %c0_i32_9 = arith.constant 0 : i32
    %11 = arith.cmpi ne, %10, %c0_i32_9 : i32
    scf.if %11 {
      %c0_10 = arith.constant 0 : index
      %c0_11 = arith.constant 0 : index
      %12 = vector.load %arg8[%c0_10, %c0_11] : memref<16x32xf32, #tpu.memory_space<vmem>>, vector<16x32xf32>
      %c0_12 = arith.constant 0 : index
      %c0_13 = arith.constant 0 : index
      %13 = vector.load %arg4[%c0_12, %c0_13] : memref<1x32xf32, #tpu.memory_space<vmem>>, vector<1x32xf32>
      %c0_14 = arith.constant 0 : index
      %c0_15 = arith.constant 0 : index
      %14 = vector.load %arg5[%c0_14, %c0_15] : memref<1x32xf32, #tpu.memory_space<vmem>>, vector<1x32xf32>
      %c0_16 = arith.constant 0 : index
      %c0_17 = arith.constant 0 : index
      %15 = vector.load %arg6[%c0_16, %c0_17] : memref<1x32xf32, #tpu.memory_space<vmem>>, vector<1x32xf32>
      %16 = vector.broadcast %13 : vector<1x32xf32> to vector<16x32xf32>
      %17 = arith.addf %12, %16 : vector<16x32xf32>
      %cst_18 = arith.constant 5.000000e-01 : f32
      %18 = vector.broadcast %cst_18 : f32 to vector<16x32xf32>
      %19 = arith.mulf %17, %18 : vector<16x32xf32>
      %cst_19 = arith.constant 0.707106769 : f32
      %20 = vector.broadcast %cst_19 : f32 to vector<16x32xf32>
      %21 = arith.mulf %17, %20 : vector<16x32xf32>
      %22 = math.erf %21 : vector<16x32xf32>
      %cst_20 = arith.constant 1.000000e+00 : f32
      %23 = vector.broadcast %cst_20 : f32 to vector<16x32xf32>
      %24 = arith.addf %23, %22 : vector<16x32xf32>
      %25 = arith.mulf %19, %24 : vector<16x32xf32>
      %cst_21 = arith.constant dense<0.000000e+00> : vector<16xf32>
      %26 = vector.multi_reduction <add>, %25, %cst_21 [1] : vector<16x32xf32> to vector<16xf32>
      %27 = vector.shape_cast %26 : vector<16xf32> to vector<16x1xf32>
      %cst_22 = arith.constant 3.200000e+01 : f32
      %28 = vector.broadcast %cst_22 : f32 to vector<16x1xf32>
      %29 = arith.divf %27, %28 : vector<16x1xf32>
      %30 = vector.broadcast %29 : vector<16x1xf32> to vector<16x32xf32>
      %31 = arith.subf %25, %30 : vector<16x32xf32>
      %32 = arith.mulf %31, %31 : vector<16x32xf32>
      %cst_23 = arith.constant dense<0.000000e+00> : vector<16xf32>
      %33 = vector.multi_reduction <add>, %32, %cst_23 [1] : vector<16x32xf32> to vector<16xf32>
      %34 = vector.shape_cast %33 : vector<16xf32> to vector<16x1xf32>
      %cst_24 = arith.constant 3.200000e+01 : f32
      %35 = vector.broadcast %cst_24 : f32 to vector<16x1xf32>
      %36 = arith.divf %34, %35 : vector<16x1xf32>
      %37 = vector.broadcast %29 : vector<16x1xf32> to vector<16x32xf32>
      %38 = arith.subf %25, %37 : vector<16x32xf32>
      %cst_25 = arith.constant 9.99999996E-13 : f32
      %39 = vector.broadcast %cst_25 : f32 to vector<16x1xf32>
      %40 = arith.addf %36, %39 : vector<16x1xf32>
      %41 = math.rsqrt %40 : vector<16x1xf32>
      %42 = vector.broadcast %41 : vector<16x1xf32> to vector<16x32xf32>
      %43 = arith.mulf %38, %42 : vector<16x32xf32>
      %44 = vector.broadcast %14 : vector<1x32xf32> to vector<16x32xf32>
      %45 = arith.mulf %43, %44 : vector<16x32xf32>
      %46 = vector.broadcast %15 : vector<1x32xf32> to vector<16x32xf32>
      %47 = arith.addf %45, %46 : vector<16x32xf32>
      %48 = arith.truncf %47 : vector<16x32xf32> to vector<16x32xbf16>
      %c0_26 = arith.constant 0 : index
      %c0_27 = arith.constant 0 : index
      %49 = vector.load %arg7[%c0_26, %c0_27] : memref<16x32xbf16, #tpu.memory_space<vmem>>, vector<16x32xbf16>
      tpu.vector_store %arg7[%c0_26, %c0_27], %48 {strides = array<i32>} : memref<16x32xbf16, #tpu.memory_space<vmem>>, vector<16x32xbf16>,
    } else {
    }
    return
  }
  func.func @transform_0(%arg0: i32, %arg1: i32) -> (i32, i32) {
    %c0_i32 = arith.constant 0 : i32
    return %arg0, %arg1 : i32, i32
  }
  func.func @transform_1(%arg0: i32, %arg1: i32) -> (i32, i32) {
    %c0_i32 = arith.constant 0 : i32
    %c0_i32_0 = arith.constant 0 : i32
    return %arg1, %c0_i32 : i32, i32
  }
  func.func @transform_2(%arg0: i32, %arg1: i32) -> (i32, i32) {
    %c0_i32 = arith.constant 0 : i32
    %c0_i32_0 = arith.constant 0 : i32
    %c0_i32_1 = arith.constant 0 : i32
    return %c0_i32, %c0_i32_0 : i32, i32
  }
  func.func @transform_3(%arg0: i32, %arg1: i32) -> (i32, i32) {
    %c0_i32 = arith.constant 0 : i32
    %c0_i32_0 = arith.constant 0 : i32
    %c0_i32_1 = arith.constant 0 : i32
    return %c0_i32, %c0_i32_0 : i32, i32
  }
  func.func @transform_4(%arg0: i32, %arg1: i32) -> (i32, i32) {
    %c0_i32 = arith.constant 0 : i32
    %c0_i32_0 = arith.constant 0 : i32
    %c0_i32_1 = arith.constant 0 : i32
    return %c0_i32, %c0_i32_0 : i32, i32
  }
  func.func @transform_5(%arg0: i32, %arg1: i32) -> (i32, i32) {
    %c0_i32 = arith.constant 0 : i32
    %c0_i32_0 = arith.constant 0 : i32
    return %arg0, %c0_i32 : i32, i32
  }
}

module attributes {stable_mosaic.version = 11 : i64} {
  func.func @_gemm_kernel(%arg0: i32, %arg1: i32, %arg2: i32, %arg3: memref<16x32xbf16, #tpu.memory_space<vmem>>, %arg4: memref<256x32xbf16, #tpu.memory_space<vmem>>, %arg5: memref<1x256xf32, #tpu.memory_space<vmem>>, %arg6: memref<16x256xf32, #tpu.memory_space<vmem>>, %arg7: memref<16x256xf32, #tpu.memory_space<vmem>>) attributes {dimension_semantics = [#tpu.dimension_semantics<parallel>, #tpu.dimension_semantics<parallel>, #tpu.dimension_semantics<arbitrary>], iteration_bounds = array<i64: 1, 1, 1>, scalar_prefetch = 0 : i64, scratch_operands = 1 : i64, tpu.core_type = #tpu.core_type<tc>, window_params = [{transform_indices = @transform_0, window_bounds = array<i64: 16, 32>}, {transform_indices = @transform_1, window_bounds = array<i64: 256, 32>}, {transform_indices = @transform_2, window_bounds = array<i64: 1, 256>}, {transform_indices = @transform_3, window_bounds = array<i64: 16, 256>}]} {
    %c0_i32 = arith.constant 0 : i32
    %0 = arith.cmpi eq, %arg2, %c0_i32 : i32
    %1 = arith.extui %0 : i1 to i32
    %c0_i32_0 = arith.constant 0 : i32
    %2 = arith.cmpi ne, %1, %c0_i32_0 : i32
    scf.if %2 {
      %cst_10 = arith.constant 0.000000e+00 : f32
      %12 = vector.broadcast %cst_10 : f32 to vector<16x256xf32>
      %c0_11 = arith.constant 0 : index
      %c0_12 = arith.constant 0 : index
      %13 = vector.load %arg7[%c0_11, %c0_12] : memref<16x256xf32, #tpu.memory_space<vmem>>, vector<16x256xf32>
      tpu.vector_store %arg7[%c0_11, %c0_12], %12 {strides = array<i32>} : memref<16x256xf32, #tpu.memory_space<vmem>>, vector<16x256xf32>,
    } else {
    }
    %c0 = arith.constant 0 : index
    %c0_1 = arith.constant 0 : index
    %3 = vector.load %arg7[%c0, %c0_1] : memref<16x256xf32, #tpu.memory_space<vmem>>, vector<16x256xf32>
    %c0_2 = arith.constant 0 : index
    %c0_3 = arith.constant 0 : index
    %4 = vector.load %arg3[%c0_2, %c0_3] : memref<16x32xbf16, #tpu.memory_space<vmem>>, vector<16x32xbf16>
    %c0_4 = arith.constant 0 : index
    %c0_5 = arith.constant 0 : index
    %5 = vector.load %arg4[%c0_4, %c0_5] : memref<256x32xbf16, #tpu.memory_space<vmem>>, vector<256x32xbf16>
    %cst = arith.constant dense<0.000000e+00> : vector<16x256xf32>
    %6 = tpu.matmul %4, %5, %cst {dimension_numbers = #tpu.dot_dimension_numbers<[1], [1], [0], [0], [0, 0, 1, 0], [], []>} : vector<16x32xbf16>, vector<256x32xbf16>, vector<16x256xf32> -> vector<16x256xf32>
    %7 = arith.addf %3, %6 : vector<16x256xf32>
    %c0_6 = arith.constant 0 : index
    %c0_7 = arith.constant 0 : index
    %8 = vector.load %arg7[%c0_6, %c0_7] : memref<16x256xf32, #tpu.memory_space<vmem>>, vector<16x256xf32>
    tpu.vector_store %arg7[%c0_6, %c0_7], %7 {strides = array<i32>} : memref<16x256xf32, #tpu.memory_space<vmem>>, vector<16x256xf32>,
    %c0_i32_8 = arith.constant 0 : i32
    %9 = arith.cmpi eq, %arg2, %c0_i32_8 : i32
    %10 = arith.extui %9 : i1 to i32
    %c0_i32_9 = arith.constant 0 : i32
    %11 = arith.cmpi ne, %10, %c0_i32_9 : i32
    scf.if %11 {
      %c0_10 = arith.constant 0 : index
      %c0_11 = arith.constant 0 : index
      %12 = vector.load %arg7[%c0_10, %c0_11] : memref<16x256xf32, #tpu.memory_space<vmem>>, vector<16x256xf32>
      %c0_12 = arith.constant 0 : index
      %c0_13 = arith.constant 0 : index
      %13 = vector.load %arg5[%c0_12, %c0_13] : memref<1x256xf32, #tpu.memory_space<vmem>>, vector<1x256xf32>
      %14 = vector.broadcast %13 : vector<1x256xf32> to vector<16x256xf32>
      %15 = arith.addf %12, %14 : vector<16x256xf32>
      %c0_14 = arith.constant 0 : index
      %c0_15 = arith.constant 0 : index
      %16 = vector.load %arg6[%c0_14, %c0_15] : memref<16x256xf32, #tpu.memory_space<vmem>>, vector<16x256xf32>
      tpu.vector_store %arg6[%c0_14, %c0_15], %15 {strides = array<i32>} : memref<16x256xf32, #tpu.memory_space<vmem>>, vector<16x256xf32>,
    } else {
    }
    return
  }
  func.func @transform_0(%arg0: i32, %arg1: i32, %arg2: i32) -> (i32, i32) {
    %c0_i32 = arith.constant 0 : i32
    return %arg0, %arg2 : i32, i32
  }
  func.func @transform_1(%arg0: i32, %arg1: i32, %arg2: i32) -> (i32, i32) {
    %c0_i32 = arith.constant 0 : i32
    return %arg1, %arg2 : i32, i32
  }
  func.func @transform_2(%arg0: i32, %arg1: i32, %arg2: i32) -> (i32, i32) {
    %c0_i32 = arith.constant 0 : i32
    %c0_i32_0 = arith.constant 0 : i32
    return %c0_i32, %arg1 : i32, i32
  }
  func.func @transform_3(%arg0: i32, %arg1: i32, %arg2: i32) -> (i32, i32) {
    %c0_i32 = arith.constant 0 : i32
    return %arg0, %arg1 : i32, i32
  }
}

</mosaic_0001>

<bundles_post_ra>
// kernel: xtec_forward.30
= control target key start
LH: loop header
LB: loop body
LE: loop exit
PB: predicated region body
PF: predicated region fallthrough
CT: control target
= control target key end

     0   :  { %vm19_vm0 = vcmask 785408   ;;  %v151_v0 = vmov 0.0   ;;  %vm152_vm1 = vmmov 0   ;;  %vm47_vm2 = vcmask 261120   ;;  %s195_s1 = inlined_call_operand.vmem [shape: bf16[32,96], index: 1, kind: input, shape index: {}]   ;;  %s196_s0 = inlined_call_operand.vmem [shape: bf16[16,32], index: 0, kind: input, shape index: {}]   ;;  %s197_s2 = inlined_call_operand.vmem [shape: f32[1,96], index: 2, kind: input, shape index: {}]   ;;  %s198_s3 = inlined_call_operand.vmem [shape: bf16[16,96], index: 3, kind: output, shape index: {}]  }
   0x1   :  { %138 = vmatprep.subr.bf16.mxu0 %v151_v0  ;;  %v148_v1 = vld [vmem:[%s195_s1] sm:$0xff]   ;;  %142 = vmatprep.mubr.msk.bf16.mxu0 %vm152_vm1, %v151_v0  ;;  %20 = vst.msk [vmem:[#allocation2] sm:$0xff] %vm19_vm0, %v151_v0  ;;  %21 = vst.msk [vmem:[#allocation2 + $0x8] sm:$0xff] %vm19_vm0, %v151_v0  ;;  %v149_v2 = vld [vmem:[%s195_s1 + $0x8] sm:$0xff]   ;;  %vm119_vm3 = vcmask 781312  }
   0x2   :  { %139 = vmatpush3.bf16.msra.mxu0 %v148_v1  ;;  %v150_v3 = vld [vmem:[%s196_s0] sm:$0xff]  }
   0x3   :  { %140 = vmatprep.subr.bf16.mxu0 %v151_v0  ;;  %v130_v12 = vld [vmem:[%s197_s2] ss:$0 sm:$0xff] }
   0x6   :  { %141 = vmatpush3.bf16.msra.mxu0 %v149_v2 }
   0x8   :  { %v22_v4 = vld [vmem:[#allocation2] sm:$0xff]  ;;  %v23_v6 = vld [vmem:[#allocation2 + $0x8] sm:$0xff] }
   0x9   :  { %143 = vmatmul.mubr.msk.bf16.vlgmr.msra.gmra.mrb[0].mxu0 %vm47_vm2, %v150_v3 }
  0xdc   :  { %v85_v5 = vpop.f32.mrb[0].mxu0 }
  0xdd   :  { %v92_v7 = vadd.f32 %v85_v5, %v22_v4  ;;  %v144_v8 = vpop.f32.mrb[1].mxu0 }
  0xde   :  { %v88_v9 = vpop.f32.mrb[2].mxu0 }
  0xdf   :  { %95 = vst.msk [vmem:[#allocation2] sm:$0xff] %vm19_vm0, %v92_v7  ;;  %v93_v10 = vadd.f32 %v88_v9, %v23_v6  ;;  %v145_v11 = vpop.f32.mrb[3].mxu0 }
  0xe1   :  { %96 = vst.msk [vmem:[#allocation2 + $0x8] sm:$0xff] %vm19_vm0, %v93_v10 }
  0xe6   :  { %v100_v13 = vld [vmem:[#allocation2] sm:$0xff] }
  0xe7   :  { %v109_v14 = vadd.f32 %v130_v12, %v100_v13 }
  0xe8   :  { %v101_v15 = vld [vmem:[#allocation2 + $0x8] sm:$0xff] }
  0xe9   :  { %v133_v16 = vpack.c.bf16 %v109_v14, %v109_v14  ;;  %v110_v17 = vadd.f32 %v130_v12, %v101_v15 }
  0xeb   :  { %120 = vst.msk [vmem:[%s198_s3] sm:$0xf] %vm119_vm3, %v133_v16  ;;  %v134_v18 = vpack.c.bf16 %v110_v17, %v110_v17 }
  0xed   :  { %121 = vst.msk [vmem:[%s198_s3 + $0x4] sm:$0xf] %vm119_vm3, %v134_v18 }

// kernel: xtec_forward.28
= control target key start
LH: loop header
LB: loop body
LE: loop exit
PB: predicated region body
PF: predicated region fallthrough
CT: control target
= control target key end

     0   :  { %vm18_vm0 = vcmask 261120   ;;  %vm70_vm1 = vcmask 257024   ;;  %s129_s0 = inlined_call_operand.vmem [shape: f32[16,32], index: 0, kind: input, shape index: {}]   ;;  %s130_s1 = inlined_call_operand.vmem [shape: f32[1,32], index: 1, kind: input, shape index: {}]   ;;  %s131_s2 = inlined_call_operand.vmem [shape: f32[1,32], index: 2, kind: input, shape index: {}]   ;;  %s132_s3 = inlined_call_operand.vmem [shape: bf16[16,32], index: 3, kind: output, shape index: {}]  }
   0x1   :  { %v14_v0 = vld [vmem:[%s129_s0] sm:$0xff]  ;;  %v15_v1 = vld [vmem:[%s129_s0 + $0x8] sm:$0xff] }
   0x2   :  { %v19_v2 = vsel %vm18_vm0, %v14_v0, 0.0  ;;  %v22_v3 = vsel %vm18_vm0, %v15_v1, 0.0  ;;  %v77_v21 = vld [vmem:[%s130_s1] ss:$0 sm:$0xff] }
   0x3   :  { %20 = vadd.xlane.f32.xlu0 %v19_v2  ;;  %v78_v23 = vld [vmem:[%s131_s2] ss:$0 sm:$0xff] }
   0x7   :  { %23 = vadd.xlane.f32.xlu0 %v22_v3 }
  0x90   :  { %v21_v4 = vpop.xlane.xlu0 %20 }
  0x91   :  { %v26_v5 = vmul.f32 0.03125, %v21_v4 }
  0x93   :  { %v28_v6 = vsub.f32 %v14_v0, %v26_v5 }
  0x94   :  { %v24_v7 = vpop.xlane.xlu0 %23 }
  0x95   :  { %v27_v8 = vmul.f32 0.03125, %v24_v7  ;;  %v30_v9 = vmul.f32 %v28_v6, %v28_v6 }
  0x97   :  { %v29_v10 = vsub.f32 %v15_v1, %v27_v8  ;;  %v32_v11 = vsel %vm18_vm0, %v30_v9, 0.0 }
  0x98   :  { %33 = vadd.xlane.f32.xlu1 %v32_v11 }
  0x99   :  { %v31_v12 = vmul.f32 %v29_v10, %v29_v10 }
  0x9b   :  { %v35_v13 = vsel %vm18_vm0, %v31_v12, 0.0 }
  0x9c   :  { %36 = vadd.xlane.f32.xlu1 %v35_v13 }
 0x125   :  { %v34_v14 = vpop.xlane.xlu1 %33 }
 0x126   :  { %v38_v15 = vmul.f32 0.03125, %v34_v14 }
 0x128   :  { %v40_v16 = vadd.f32 1e-12, %v38_v15 }
 0x129   :  { %v37_v17 = vpop.xlane.xlu1 %36 }
 0x12a   :  { %83 = vrsqrt.f32 %v40_v16  ;;  %v39_v18 = vmul.f32 0.03125, %v37_v17 }
 0x12c   :  { %v41_v19 = vadd.f32 1e-12, %v39_v18 }
 0x12e   :  { %85 = vrsqrt.f32 %v41_v19 }
 0x134   :  { %v84_v20 = vpop.eup %83 }
 0x135   :  { %v44_v22 = vmul.f32 %v84_v20, %v28_v6 }
 0x137   :  { %v52_v24 = vmul.f32 %v77_v21, %v44_v22 }
 0x138   :  { %v86_v25 = vpop.eup %85 }
 0x139   :  { %v60_v26 = vadd.f32 %v78_v23, %v52_v24  ;;  %v45_v27 = vmul.f32 %v86_v25, %v29_v10 }
 0x13b   :  { %v81_v28 = vpack.c.bf16 %v60_v26, %v60_v26  ;;  %v53_v29 = vmul.f32 %v77_v21, %v45_v27 }
 0x13d   :  { %71 = vst.msk [vmem:[%s132_s3] sm:$0xf] %vm70_vm1, %v81_v28  ;;  %v61_v30 = vadd.f32 %v78_v23, %v53_v29 }
 0x13f   :  { %v82_v31 = vpack.c.bf16 %v61_v30, %v61_v30 }
 0x141   :  { %72 = vst.msk [vmem:[%s132_s3 + $0x4] sm:$0xf] %vm70_vm1, %v82_v31 }

// kernel: xtec_forward.32
= control target key start
LH: loop header
LB: loop body
LE: loop exit
PB: predicated region body
PF: predicated region fallthrough
CT: control target
= control target key end

     0   :  { %vm28_vm0 = vcmask 261120   ;;  %v220_v0 = vmov 0.0   ;;  %vm221_vm1 = vmmov 0   ;;  %vm178_vm2 = vcmask 257024   ;;  %s293_s1 = inlined_call_operand.vmem [shape: bf16[32,32], index: 1, kind: input, shape index: {}]   ;;  %s294_s0 = inlined_call_operand.vmem [shape: bf16[16,32], index: 0, kind: input, shape index: {}]   ;;  %s295_s3 = inlined_call_operand.vmem [shape: bf16[16,32], index: 3, kind: input, shape index: {}]   ;;  %s296_s2 = inlined_call_operand.vmem [shape: f32[1,32], index: 2, kind: input, shape index: {}, may-alias: {2,5}]   ;;  %s297_s4 = inlined_call_operand.vmem [shape: f32[1,32], index: 4, kind: input, shape index: {}]   ;;  %s298_s5 = inlined_call_operand.vmem [shape: f32[1,32], index: 5, kind: input, shape index: {}, may-alias: {2,5}]   ;;  %s299_s6 = inlined_call_operand.vmem [shape: bf16[16,32], index: 6, kind: output, shape index: {}]  }
   0x1   :  { %203 = vmatprep.subr.bf16.mxu0 %v220_v0  ;;  %v213_v1 = vld [vmem:[%s293_s1] sm:$0xff]   ;;  %207 = vmatprep.mubr.msk.bf16.mxu0 %vm221_vm1, %v220_v0  ;;  %29 = vst.msk [vmem:[#allocation2] sm:$0xff] %vm28_vm0, %v220_v0  ;;  %30 = vst.msk [vmem:[#allocation2 + $0x8] sm:$0xff] %vm28_vm0, %v220_v0  ;;  %v214_v2 = vld [vmem:[%s293_s1 + $0x8] sm:$0xff]  }
   0x2   :  { %204 = vmatpush3.bf16.msra.mxu0 %v213_v1  ;;  %v215_v3 = vld [vmem:[%s294_s0] sm:$0xff]  }
   0x3   :  { %205 = vmatprep.subr.bf16.mxu0 %v220_v0  ;;  %v197_v12 = vld [vmem:[%s295_s3] sm:$0xff]  }
   0x4   :  { %v189_v13 = vld [vmem:[%s296_s2] ss:$0 sm:$0xff]  ;;  %v198_v14 = vunpack.c.l.bf16 %v197_v12  ;;  %v199_v17 = vunpack.c.h.bf16 %v197_v12 }
   0x5   :  { %v190_v41 = vld [vmem:[%s297_s4] ss:$0 sm:$0xff] }
   0x6   :  { %206 = vmatpush3.bf16.msra.mxu0 %v214_v2  ;;  %v191_v43 = vld [vmem:[%s298_s5] ss:$0 sm:$0xff] }
   0x8   :  { %v31_v4 = vld [vmem:[#allocation2] sm:$0xff]  ;;  %v32_v6 = vld [vmem:[#allocation2 + $0x8] sm:$0xff] }
   0x9   :  { %208 = vmatmul.mubr.msk.bf16.vlgmr.msra.gmra.mrb[0].mxu0 %vm28_vm0, %v215_v3 }
  0xdc   :  { %v94_v5 = vpop.f32.mrb[0].mxu0 }
  0xdd   :  { %v101_v7 = vadd.f32 %v94_v5, %v31_v4  ;;  %v209_v8 = vpop.f32.mrb[1].mxu0 }
  0xde   :  { %v97_v9 = vpop.f32.mrb[2].mxu0 }
  0xdf   :  { %103 = vst.msk [vmem:[#allocation2] sm:$0xff] %vm28_vm0, %v101_v7  ;;  %v102_v10 = vadd.f32 %v97_v9, %v32_v6  ;;  %v210_v11 = vpop.f32.mrb[3].mxu0 }
  0xe1   :  { %104 = vst.msk [vmem:[#allocation2 + $0x8] sm:$0xff] %vm28_vm0, %v102_v10 }
  0xe6   :  { %v108_v15 = vld [vmem:[#allocation2] sm:$0xff] }
  0xe7   :  { %v121_v16 = vadd.f32 %v189_v13, %v108_v15 }
  0xe8   :  { %v109_v18 = vld [vmem:[#allocation2 + $0x8] sm:$0xff] }
  0xe9   :  { %v125_v19 = vadd.f32 %v198_v14, %v121_v16  ;;  %v122_v20 = vadd.f32 %v189_v13, %v109_v18 }
  0xeb   :  { %v127_v21 = vsel %vm28_vm0, %v125_v19, 0.0  ;;  %v126_v22 = vadd.f32 %v199_v17, %v122_v20 }
  0xec   :  { %128 = vadd.xlane.f32.xlu0 %v127_v21 }
  0xed   :  { %v130_v23 = vsel %vm28_vm0, %v126_v22, 0.0 }
  0xf0   :  { %131 = vadd.xlane.f32.xlu0 %v130_v23 }
 0x179   :  { %v129_v24 = vpop.xlane.xlu0 %128 }
 0x17a   :  { %v134_v25 = vmul.f32 0.03125, %v129_v24 }
 0x17c   :  { %v136_v26 = vsub.f32 %v125_v19, %v134_v25 }
 0x17d   :  { %v132_v27 = vpop.xlane.xlu0 %131 }
 0x17e   :  { %v135_v28 = vmul.f32 0.03125, %v132_v27  ;;  %v138_v29 = vmul.f32 %v136_v26, %v136_v26 }
 0x180   :  { %v137_v30 = vsub.f32 %v126_v22, %v135_v28  ;;  %v140_v31 = vsel %vm28_vm0, %v138_v29, 0.0 }
 0x181   :  { %141 = vadd.xlane.f32.xlu1 %v140_v31 }
 0x182   :  { %v139_v32 = vmul.f32 %v137_v30, %v137_v30 }
 0x184   :  { %v143_v33 = vsel %vm28_vm0, %v139_v32, 0.0 }
 0x185   :  { %144 = vadd.xlane.f32.xlu1 %v143_v33 }
 0x20e   :  { %v142_v34 = vpop.xlane.xlu1 %141 }
 0x20f   :  { %v146_v35 = vmul.f32 0.03125, %v142_v34 }
 0x211   :  { %v148_v36 = vadd.f32 1e-12, %v146_v35 }
 0x212   :  { %v145_v37 = vpop.xlane.xlu1 %144 }
 0x213   :  { %216 = vrsqrt.f32 %v148_v36  ;;  %v147_v38 = vmul.f32 0.03125, %v145_v37 }
 0x215   :  { %v149_v39 = vadd.f32 1e-12, %v147_v38 }
 0x217   :  { %218 = vrsqrt.f32 %v149_v39 }
 0x21d   :  { %v217_v40 = vpop.eup %216 }
 0x21e   :  { %v152_v42 = vmul.f32 %v217_v40, %v136_v26 }
 0x220   :  { %v160_v44 = vmul.f32 %v190_v41, %v152_v42 }
 0x221   :  { %v219_v45 = vpop.eup %218 }
 0x222   :  { %v168_v46 = vadd.f32 %v191_v43, %v160_v44  ;;  %v153_v47 = vmul.f32 %v219_v45, %v137_v30 }
 0x224   :  { %v194_v48 = vpack.c.bf16 %v168_v46, %v168_v46  ;;  %v161_v49 = vmul.f32 %v190_v41, %v153_v47 }
 0x226   :  { %179 = vst.msk [vmem:[%s299_s6] sm:$0xf] %vm178_vm2, %v194_v48  ;;  %v169_v50 = vadd.f32 %v191_v43, %v161_v49 }
 0x228   :  { %v195_v51 = vpack.c.bf16 %v169_v50, %v169_v50 }
 0x22a   :  { %180 = vst.msk [vmem:[%s299_s6 + $0x4] sm:$0xf] %vm178_vm2, %v195_v51 }

// kernel: xtec_forward.31
= control target key start
LH: loop header
LB: loop body
LE: loop exit
PB: predicated region body
PF: predicated region fallthrough
CT: control target
= control target key end

     0   :  { %s850_s9 = smov 0   ;;  %s949_s0 = inlined_call_operand.vmem [shape: bf16[2,8,96], index: 0, kind: input, shape index: {}]   ;;  %s950_s1 = inlined_call_operand.vmem [shape: f32[2,1,8], index: 1, kind: input, shape index: {}]   ;;  %s951_s2 = inlined_call_operand.vmem [shape: bf16[2,8,32], index: 2, kind: output, shape index: {}]  }
   0x1 LB: > { %s687_s10 = sadd.s32 4294967295, %s817_s9   ;;  %p691_p0 = scmp.ge.s32.totalorder %s817_s9, 1  ;;  %s817_s9 = sphi %s850_s9, %s12_s9  }
   0x2   : > { %p119_p1 = scmp.lt.s32.totalorder %s817_s9, 3 }
   0x4   : > { %p120_p2 = pnand %p691_p0, %p119_p1 }
   0x5   : > { %p142_p3 = scmp.lt.s32.totalorder (!%p120_p2), %s687_s10, 1  ;;  %v819_v0 = vmov (!%p120_p2), 0.0   ;;  %vm820_vm0 = vmmov (!%p120_p2), 0   ;;  %s821_s15 = smov (!%p120_p2), 96   ;;  %vm167_vm1 = vcmask (!%p120_p2), 64512   ;;  %vm231_vm2 = vcmask (!%p120_p2), 1043456  }
   0x6   : > { %123 = sbr.rel (%p120_p2) target bundleno = 1602 (0x642), region = 28  ;;  %722 = vmatprep.subr.bf16.mxu0 (!%p120_p2), %v819_v0  ;;  %724 = vmatprep.mubr.msk.bf16.mxu0 (!%p120_p2), %vm820_vm0, %v819_v0  ;;  %s822_s16 = smov (!%p120_p2), 64   ;;  %vm618_vm3 = vcmask (!%p120_p2), 130048   ;;  %vm620_vm4 = vcmask (!%p120_p2), 195584   ;;  %vm623_vm5 = vcmask (!%p120_p2), 257024  }
   0x7   : > { %728 = vmatprep.subr.bf16.mxu1 (!%p120_p2), %v819_v0  ;;  %730 = vmatprep.mubr.msk.bf16.mxu1 (!%p120_p2), %vm820_vm0, %v819_v0  ;;  %s823_s17 = smov (!%p120_p2), 88   ;;  %s824_s21 = smov (!%p120_p2), 72  }
   0x8   : > { %s825_s22 = smov (!%p120_p2), 120   ;;  %s826_s23 = smov (!%p120_p2), 80  }
   0x9   : > { %s827_s24 = smov (!%p120_p2), 112   ;;  %s828_s25 = smov (!%p120_p2), 104  }
   0xa   : > { %s829_s26 = smov (!%p120_p2), 56   ;;  %s830_s27 = smov (!%p120_p2), 48  }
   0xb   : > { %s831_s28 = smov (!%p120_p2), 40   ;;  %s832_s29 = smov (!%p120_p2), 8  }
   0xc   : > { %s833_s30 = smov (!%p120_p2), 16   ;;  %s834_s3 = smov (!%p120_p2), 24  }
   0xd   : > { %s953_s10 = smov (!%p142_p3, %s687_s10), 1 }
   0xe   : > { %s692_s11 = sshll.u32 %s953_s10, 2  ;;  %s148_s20 = scalar_lea.vmem %s950_s1, %s953_s10 }
   0xf   : > { %s145_s14 = scalar_lea.vmem %s949_s0, %s692_s11  ;;  %v886_v5 = vld [vmem:[%s148_s20] ss:$0 sm:$0xff]  ;;  %s152_s6 = scalar_lea.vmem %s951_s2, %s692_s11 }
  0x10   : > { %v154_v1 = vld [vmem:[%s145_s14] sm:$0xf] }
  0x11   : > { %v872_v2 = vcombine.low %v154_v1, %v154_v1 }
  0x13   : > { %165 = vrot.lane.b32.xlu0 %v872_v2, %s821_s15  ;;  %226 = vrot.lane.b32.xlu1 %v872_v2, %s822_s16 }
  0x17   : > { %277 = vrot.lane.b32.xlu1 %v872_v2, %s823_s17 }
  0x85   : > { %v166_v3 = vpop.permute.xlu0 %165  ;;  %v227_v12 = vpop.permute.xlu1 %226 }
  0x86   : > { %v172_v4 = vsel %vm167_vm1, %v166_v3, 0  ;;  %v233_v13 = vsel %vm231_vm2, %v227_v12, 0 }
  0x87   : > { %723 = vmatpush3.bf16.xpose.msra.mxu0 %v172_v4  ;;  %729 = vmatpush3.bf16.msra.mxu1 %v233_v13 }
  0x88   : > { %740 = vmatprep.subr.bf16.mxu0 %v819_v0  ;;  %734 = vmatprep.subr.bf16.mxu1 %v819_v0 }
  0x89   : > { %v278_v19 = vpop.permute.xlu1 %277 }
  0x8a   : > { %v283_v25 = vsel %vm167_vm1, %v278_v19, 0 }
  0x8e   : > { %725 = vmatmul.mubr.msk.bf16.vlgmr.msra.gmra.mrb[0].mxu0 %vm167_vm1, %v154_v1 }
  0x8f   : > { %742 = vmatprep.mubr.msk.bf16.mxu0 %vm820_vm0, %v819_v0 }
 0x161   : > { %v208_v6 = vpop.f32.mrb[0].mxu0 }
 0x162   : > { %v209_v7 = vadd.f32 %v886_v5, %v208_v6  ;;  %v726_v8 = vpop.f32.mrb[1].mxu0 }
 0x163   : > { %v211_v9 = vpop.f32.mrb[2].mxu0 }
 0x164   : > { %v727_v10 = vpop.f32.mrb[3].mxu0  ;;  %v214_v11 = vsel %vm167_vm1, %v209_v7, -inf }
 0x165   : > { %215 = vmax.xlane.f32.xlu0 %v214_v11 }
 0x17b   : > { %497 = vrot.lane.b32.xlu0 %v872_v2, %s824_s21 }
 0x1f2   : > { %v216_v14 = vpop.xlane.xlu0 %215 }
 0x1f3   : > { %v217_v15 = vsub.f32 %v209_v7, %v216_v14 }
 0x1f5   : > { %v218_v16 = vmul.f32 1.442695, %v217_v15 }
 0x1f6   : > { %v498_v28 = vpop.permute.xlu0 %497 }
 0x1f7   : > { %795 = vpow2.f32 %v218_v16  ;;  %v503_v30 = vsel %vm167_vm1, %v498_v28, 0 }
 0x201   : > { %v796_v17 = vpop.eup %795 }
 0x202   : > { %v220_v18 = vsel %vm167_vm1, %v796_v17, 0.0 }
 0x203   : > { %221 = vadd.xlane.f32.xlu1 %v220_v18 }
 0x214   : > { %275 = vrot.lane.b32.xlu1 %v872_v2, %s825_s22 }
 0x218   : > { %387 = vrot.lane.b32.xlu1 %v872_v2, %s826_s23 }
 0x21c   : > { %385 = vrot.lane.b32.xlu1 %v872_v2, %s827_s24 }
 0x220   : > { %495 = vrot.lane.b32.xlu1 %v872_v2, %s828_s25 }
 0x290   : > { %v222_v20 = vpop.xlane.xlu1 %221 }
 0x291   : > { %797 = vrcp.f32 %v222_v20 }
 0x294   : > { %v276_v23 = vpop.permute.xlu1 %275 }
 0x298   : > { %v388_v26 = vpop.permute.xlu1 %387 }
 0x299   : > { %v393_v27 = vsel %vm167_vm1, %v388_v26, 0 }
 0x29b   : > { %v798_v21 = vpop.eup %797 }
 0x29c   : > { %v224_v22 = vmul.f32 %v798_v21, %v796_v17  ;;  %v386_v29 = vpop.permute.xlu1 %385 }
 0x29e   : > { %v225_v24 = vpack.c.bf16 %v224_v22, %v224_v22 }
 0x2a0   : > { %731 = vmatmul.mubr.msk.bf16.vlgmr.msra.gmra.mrb[0].mxu1 %vm167_vm1, %v225_v24  ;;  %v496_v31 = vpop.permute.xlu1 %495 }
 0x2a1   : > { %735 = vmatpush3.bf16.xpose.msra.mxu1 %v283_v25  ;;  %736 = vmatprep.mubr.msk.bf16.mxu1 %vm820_vm0, %v819_v0 }
 0x2a2   : > { %746 = vmatprep.subr.bf16.mxu1 %v819_v0 }
 0x2a8   : > { %737 = vmatmul.mubr.msk.bf16.vlgmr.msra.gmra.mrb[4].mxu1 %vm167_vm1, %v276_v23 }
 0x2a9   : > { %747 = vmatpush3.bf16.xpose.msra.mxu1 %v393_v27  ;;  %748 = vmatprep.mubr.msk.bf16.mxu1 %vm820_vm0, %v819_v0 }
 0x2aa   : > { %758 = vmatprep.subr.bf16.mxu1 %v819_v0 }
 0x2b0   : > { %749 = vmatmul.mubr.msk.bf16.vlgmr.msra.gmra.mrb[8].mxu1 %vm167_vm1, %v386_v29 }
 0x2b1   : > { %759 = vmatpush3.bf16.xpose.msra.mxu1 %v503_v30  ;;  %760 = vmatprep.mubr.msk.bf16.mxu1 %vm820_vm0, %v819_v0 }
 0x2b8   : > { %761 = vmatmul.mubr.msk.bf16.vlgmr.msra.gmra.mrb[12].mxu1 %vm167_vm1, %v496_v31 }
 0x373   : > { %v913_v32 = vpop.f32.mrb[0].mxu1 }
 0x374   : > { %v732_v33 = vpop.f32.mrb[1].mxu1 }
 0x375   : > { %v272_v34 = vpop.f32.mrb[2].mxu1 }
 0x376   : > { %v733_v35 = vpop.f32.mrb[3].mxu1 }
 0x37b   : > { %v319_v36 = vpop.f32.mrb[4].mxu1 }
 0x37c   : > { %v320_v37 = vadd.f32 %v886_v5, %v319_v36  ;;  %v738_v38 = vpop.f32.mrb[5].mxu1 }
 0x37d   : > { %v322_v39 = vpop.f32.mrb[6].mxu1 }
 0x37e   : > { %v739_v40 = vpop.f32.mrb[7].mxu1  ;;  %v325_v41 = vsel %vm167_vm1, %v320_v37, -inf }
 0x37f   : > { %326 = vmax.xlane.f32.xlu1 %v325_v41 }
 0x383   : > { %v429_v42 = vpop.f32.mrb[8].mxu1 }
 0x384   : > { %v430_v43 = vadd.f32 %v886_v5, %v429_v42  ;;  %v750_v44 = vpop.f32.mrb[9].mxu1 }
 0x385   : > { %v432_v45 = vpop.f32.mrb[10].mxu1 }
 0x386   : > { %v435_v46 = vsel %vm167_vm1, %v430_v43, -inf  ;;  %v751_v47 = vpop.f32.mrb[11].mxu1 }
 0x387   : > { %436 = vmax.xlane.f32.xlu0 %v435_v46 }
 0x38b   : > { %v539_v48 = vpop.f32.mrb[12].mxu1 }
 0x38c   : > { %v540_v49 = vadd.f32 %v886_v5, %v539_v48  ;;  %v762_v50 = vpop.f32.mrb[13].mxu1 }
 0x38d   : > { %v542_v51 = vpop.f32.mrb[14].mxu1 }
 0x38e   : > { %v545_v52 = vsel %vm167_vm1, %v540_v49, -inf  ;;  %v763_v53 = vpop.f32.mrb[15].mxu1 }
 0x38f   : > { %546 = vmax.xlane.f32.xlu1 %v545_v52 }
 0x40c   : > { %v327_v54 = vpop.xlane.xlu1 %326 }
 0x40d   : > { %v328_v55 = vsub.f32 %v320_v37, %v327_v54 }
 0x40f   : > { %v329_v56 = vmul.f32 1.442695, %v328_v55 }
 0x411   : > { %799 = vpow2.f32 %v329_v56 }
 0x414   : > { %v437_v1 = vpop.xlane.xlu0 %436 }
 0x415   : > { %v438_v3 = vsub.f32 %v430_v43, %v437_v1 }
 0x417   : > { %v439_v4 = vmul.f32 1.442695, %v438_v3 }
 0x41b   : > { %v800_v57 = vpop.eup %799 }
 0x41c   : > { %v547_v58 = vpop.xlane.xlu1 %546  ;;  %v331_v59 = vsel %vm167_vm1, %v800_v57, 0.0 }
 0x41d   : > { %v548_v60 = vsub.f32 %v540_v49, %v547_v58  ;;  %332 = vadd.xlane.f32.xlu1 %v331_v59 }
 0x41f   : > { %v549_v61 = vmul.f32 1.442695, %v548_v60 }
 0x421   : > { %801 = vpow2.f32 %v549_v61 }
 0x422   : > { %803 = vpow2.f32 %v439_v4 }
 0x42b   : > { %v802_v62 = vpop.eup %801 }
 0x42c   : > { %v551_v63 = vsel %vm167_vm1, %v802_v62, 0.0  ;;  %v804_v5 = vpop.eup %803 }
 0x42d   : > { %552 = vadd.xlane.f32.xlu0 %v551_v63  ;;  %v441_v6 = vsel %vm167_vm1, %v804_v5, 0.0 }
 0x42e   : > { %337 = vrot.lane.b32.xlu1 %v872_v2, %s829_s26 }
 0x443   : > { %447 = vrot.lane.b32.xlu0 %v872_v2, %s830_s27 }
 0x452   : > { %442 = vadd.xlane.f32.xlu1 %v441_v6 }
 0x463   : > { %557 = vrot.lane.b32.xlu1 %v872_v2, %s831_s28 }
 0x4aa   : > { %v333_v7 = vpop.xlane.xlu1 %332 }
 0x4ab   : > { %805 = vrcp.f32 %v333_v7 }
 0x4ae   : > { %v338_v8 = vpop.permute.xlu1 %337 }
 0x4af   : > { %v343_v9 = vsel %vm231_vm2, %v338_v8, 0 }
 0x4b0   : > { %741 = vmatpush3.bf16.msra.mxu0 %v343_v9 }
 0x4b1   : > { %752 = vmatprep.subr.bf16.mxu0 %v819_v0 }
 0x4b5   : > { %v806_v10 = vpop.eup %805 }
 0x4b6   : > { %v335_v11 = vmul.f32 %v806_v10, %v800_v57 }
 0x4b8   : > { %v336_v12 = vpack.c.bf16 %v335_v11, %v335_v11 }
 0x4ba   : > { %743 = vmatmul.mubr.msk.bf16.vlgmr.msra.gmra.mrb[4].mxu0 %vm167_vm1, %v336_v12  ;;  %v553_v13 = vpop.xlane.xlu0 %552 }
 0x4bb   : > { %754 = vmatprep.mubr.msk.bf16.mxu0 %vm820_vm0, %v819_v0 }
 0x4be   : > { %v448_v14 = vpop.permute.xlu0 %447 }
 0x4bf   : > { %v453_v2 = vsel %vm231_vm2, %v448_v14, 0 }
 0x4c0   : > { %753 = vmatpush3.bf16.msra.mxu0 %v453_v2 }
 0x4c1   : > { %764 = vmatprep.subr.bf16.mxu0 %v819_v0 }
 0x4df   : > { %v443_v15 = vpop.xlane.xlu1 %442 }
 0x4e0   : > { %807 = vrcp.f32 %v443_v15 }
 0x4e1   : > { %809 = vrcp.f32 %v553_v13 }
 0x4e3   : > { %v558_v17 = vpop.permute.xlu1 %557 }
 0x4e4   : > { %v563_v19 = vsel %vm231_vm2, %v558_v17, 0 }
 0x4ea   : > { %v808_v16 = vpop.eup %807 }
 0x4eb   : > { %v445_v18 = vmul.f32 %v808_v16, %v804_v5  ;;  %v810_v21 = vpop.eup %809 }
 0x4ec   : > { %v555_v22 = vmul.f32 %v810_v21, %v802_v62 }
 0x4ed   : > { %v446_v20 = vpack.c.bf16 %v445_v18, %v445_v18 }
 0x4ee   : > { %v556_v23 = vpack.c.bf16 %v555_v22, %v555_v22 }
 0x4ef   : > { %755 = vmatmul.mubr.msk.bf16.vlgmr.msra.gmra.mrb[8].mxu0 %vm167_vm1, %v446_v20 }
 0x4f0   : > { %765 = vmatpush3.bf16.msra.mxu0 %v563_v19  ;;  %766 = vmatprep.mubr.msk.bf16.mxu0 %vm820_vm0, %v819_v0 }
 0x4f7   : > { %767 = vmatmul.mubr.msk.bf16.vlgmr.msra.gmra.mrb[12].mxu0 %vm167_vm1, %v556_v23 }
 0x58d   : > { %v379_v24 = vpop.f32.mrb[4].mxu0 }
 0x58e   : > { %606 = vrot.lane.b32.xlu1 %v379_v24, %s832_s29  ;;  %v744_v25 = vpop.f32.mrb[5].mxu0 }
 0x58f   : > { %v382_v26 = vpop.f32.mrb[6].mxu0 }
 0x590   : > { %v745_v27 = vpop.f32.mrb[7].mxu0 }
 0x5c2   : > { %v489_v28 = vpop.f32.mrb[8].mxu0 }
 0x5c3   : > { %610 = vrot.lane.b32.xlu0 %v489_v28, %s833_s30  ;;  %v756_v29 = vpop.f32.mrb[9].mxu0 }
 0x5c4   : > { %v492_v30 = vpop.f32.mrb[10].mxu0 }
 0x5c5   : > { %v757_v31 = vpop.f32.mrb[11].mxu0 }
 0x5ca   : > { %v599_v33 = vpop.f32.mrb[12].mxu0 }
 0x5cb   : > { %614 = vrot.lane.b32.xlu1 %v599_v33, %s834_s3  ;;  %v768_v0 = vpop.f32.mrb[13].mxu0 }
 0x5cc   : > { %v602_v34 = vpop.f32.mrb[14].mxu0 }
 0x5cd   : > { %v769_v35 = vpop.f32.mrb[15].mxu0 }
 0x600   : > { %v607_v36 = vpop.permute.xlu1 %606 }
 0x601   : > { %v617_v38 = vsel %vm167_vm1, %v913_v32, %v607_v36 }
 0x635   : > { %v611_v37 = vpop.permute.xlu0 %610 }
 0x636   : > { %v619_v39 = vsel %vm618_vm3, %v617_v38, %v611_v37 }
 0x63d   : > { %v615_v40 = vpop.permute.xlu1 %614 }
 0x63e   : > { %v621_v41 = vsel %vm620_vm4, %v619_v39, %v615_v40 }
 0x63f   : > { %v622_v42 = vpack.c.bf16 %v621_v41, %v621_v41 }
 0x641   : > { %624 = vst.msk [vmem:[%s152_s6] sm:$0xf] %vm623_vm5, %v622_v42 }
 0x642 PF: > { %s12_s9 = sadd.s32 1, %s817_s9  }
 0x643   : > { %p9_p4 = scmp.ge.s32.totalorder %s12_s9, 4  }
 0x645   :  { %11 = sbr.rel (!%p9_p4) target bundleno = 1 (0x1), region = 61 }

// kernel: xtec_forward.34
= control target key start
LH: loop header
LB: loop body
LE: loop exit
PB: predicated region body
PF: predicated region fallthrough
CT: control target
= control target key end

     0   :  { %vm28_vm0 = vcmask 261120   ;;  %v247_v0 = vmov 0.0   ;;  %vm248_vm1 = vmmov 0   ;;  %vm72_vm2 = vcmask 523264   ;;  %s325_s1 = inlined_call_operand.vmem [shape: bf16[64,32], index: 1, kind: input, shape index: {}]   ;;  %s326_s0 = inlined_call_operand.vmem [shape: bf16[16,64], index: 0, kind: input, shape index: {}]   ;;  %s327_s3 = inlined_call_operand.vmem [shape: bf16[16,32], index: 3, kind: input, shape index: {}]   ;;  %s328_s2 = inlined_call_operand.vmem [shape: f32[1,32], index: 2, kind: input, shape index: {}, may-alias: {2,5}]   ;;  %s329_s4 = inlined_call_operand.vmem [shape: f32[1,32], index: 4, kind: input, shape index: {}]   ;;  %s330_s5 = inlined_call_operand.vmem [shape: f32[1,32], index: 5, kind: input, shape index: {}, may-alias: {2,5}]   ;;  %s331_s6 = inlined_call_operand.vmem [shape: bf16[16,32], index: 6, kind: output, shape index: {}]  }
   0x1   :  { %224 = vmatprep.subr.bf16.mxu0 %v247_v0  ;;  %v238_v1 = vld [vmem:[%s325_s1] sm:$0xff]   ;;  %232 = vmatprep.mubr.msk.bf16.mxu0 %vm248_vm1, %v247_v0  ;;  %29 = vst.msk [vmem:[#allocation2] sm:$0xff] %vm28_vm0, %v247_v0  ;;  %30 = vst.msk [vmem:[#allocation2 + $0x8] sm:$0xff] %vm28_vm0, %v247_v0  ;;  %v239_v2 = vld [vmem:[%s325_s1 + $0x8] sm:$0xff]   ;;  %vm195_vm3 = vcmask 257024  }
   0x2   :  { %225 = vmatpush3.bf16.msra.mxu0 %v238_v1  ;;  %v240_v3 = vld [vmem:[%s325_s1 + $0x10] sm:$0xff]   ;;  %v241_v4 = vld [vmem:[%s325_s1 + $0x18] sm:$0xff]   ;;  %v242_v5 = vld [vmem:[%s326_s0] sm:$0xff]  }
   0x3   :  { %226 = vmatprep.subr.bf16.mxu0 %v247_v0  ;;  %v216_v14 = vld [vmem:[%s327_s3] sm:$0xff]  }
   0x4   :  { %v208_v15 = vld [vmem:[%s328_s2] ss:$0 sm:$0xff]  ;;  %v217_v16 = vunpack.c.l.bf16 %v216_v14  ;;  %v218_v19 = vunpack.c.h.bf16 %v216_v14 }
   0x5   :  { %v209_v43 = vld [vmem:[%s329_s4] ss:$0 sm:$0xff] }
   0x6   :  { %227 = vmatpush3.bf16.msra.mxu0 %v239_v2  ;;  %v210_v45 = vld [vmem:[%s330_s5] ss:$0 sm:$0xff] }
   0x7   :  { %228 = vmatprep.subr.bf16.mxu0 %v247_v0 }
   0x8   :  { %v31_v6 = vld [vmem:[#allocation2] sm:$0xff]  ;;  %v32_v8 = vld [vmem:[#allocation2 + $0x8] sm:$0xff] }
   0xa   :  { %229 = vmatpush3.bf16.msra.mxu0 %v240_v3 }
   0xb   :  { %230 = vmatprep.subr.bf16.mxu0 %v247_v0 }
   0xe   :  { %231 = vmatpush3.bf16.msra.mxu0 %v241_v4 }
  0x11   :  { %233 = vmatmul.mubr.msk.bf16.vlgmr.msra.gmra.mrb[0].mxu0 %vm72_vm2, %v242_v5 }
  0xe4   :  { %v110_v7 = vpop.f32.mrb[0].mxu0 }
  0xe5   :  { %v117_v9 = vadd.f32 %v110_v7, %v31_v6  ;;  %v234_v10 = vpop.f32.mrb[1].mxu0 }
  0xe6   :  { %v113_v11 = vpop.f32.mrb[2].mxu0 }
  0xe7   :  { %120 = vst.msk [vmem:[#allocation2] sm:$0xff] %vm28_vm0, %v117_v9  ;;  %v118_v12 = vadd.f32 %v113_v11, %v32_v8  ;;  %v235_v13 = vpop.f32.mrb[3].mxu0 }
  0xe9   :  { %121 = vst.msk [vmem:[#allocation2 + $0x8] sm:$0xff] %vm28_vm0, %v118_v12 }
  0xee   :  { %v125_v17 = vld [vmem:[#allocation2] sm:$0xff] }
  0xef   :  { %v138_v18 = vadd.f32 %v208_v15, %v125_v17 }
  0xf0   :  { %v126_v20 = vld [vmem:[#allocation2 + $0x8] sm:$0xff] }
  0xf1   :  { %v142_v21 = vadd.f32 %v217_v16, %v138_v18  ;;  %v139_v22 = vadd.f32 %v208_v15, %v126_v20 }
  0xf3   :  { %v144_v23 = vsel %vm28_vm0, %v142_v21, 0.0  ;;  %v143_v24 = vadd.f32 %v218_v19, %v139_v22 }
  0xf4   :  { %145 = vadd.xlane.f32.xlu0 %v144_v23 }
  0xf5   :  { %v147_v25 = vsel %vm28_vm0, %v143_v24, 0.0 }
  0xf8   :  { %148 = vadd.xlane.f32.xlu0 %v147_v25 }
 0x181   :  { %v146_v26 = vpop.xlane.xlu0 %145 }
 0x182   :  { %v151_v27 = vmul.f32 0.03125, %v146_v26 }
 0x184   :  { %v153_v28 = vsub.f32 %v142_v21, %v151_v27 }
 0x185   :  { %v149_v29 = vpop.xlane.xlu0 %148 }
 0x186   :  { %v152_v30 = vmul.f32 0.03125, %v149_v29  ;;  %v155_v31 = vmul.f32 %v153_v28, %v153_v28 }
 0x188   :  { %v154_v32 = vsub.f32 %v143_v24, %v152_v30  ;;  %v157_v33 = vsel %vm28_vm0, %v155_v31, 0.0 }
 0x189   :  { %158 = vadd.xlane.f32.xlu1 %v157_v33 }
 0x18a   :  { %v156_v34 = vmul.f32 %v154_v32, %v154_v32 }
 0x18c   :  { %v160_v35 = vsel %vm28_vm0, %v156_v34, 0.0 }
 0x18d   :  { %161 = vadd.xlane.f32.xlu1 %v160_v35 }
 0x216   :  { %v159_v36 = vpop.xlane.xlu1 %158 }
 0x217   :  { %v163_v37 = vmul.f32 0.03125, %v159_v36 }
 0x219   :  { %v165_v38 = vadd.f32 1e-12, %v163_v37 }
 0x21a   :  { %v162_v39 = vpop.xlane.xlu1 %161 }
 0x21b   :  { %243 = vrsqrt.f32 %v165_v38  ;;  %v164_v40 = vmul.f32 0.03125, %v162_v39 }
 0x21d   :  { %v166_v41 = vadd.f32 1e-12, %v164_v40 }
 0x21f   :  { %245 = vrsqrt.f32 %v166_v41 }
 0x225   :  { %v244_v42 = vpop.eup %243 }
 0x226   :  { %v169_v44 = vmul.f32 %v244_v42, %v153_v28 }
 0x228   :  { %v177_v46 = vmul.f32 %v209_v43, %v169_v44 }
 0x229   :  { %v246_v47 = vpop.eup %245 }
 0x22a   :  { %v185_v48 = vadd.f32 %v210_v45, %v177_v46  ;;  %v170_v49 = vmul.f32 %v246_v47, %v154_v32 }
 0x22c   :  { %v213_v50 = vpack.c.bf16 %v185_v48, %v185_v48  ;;  %v178_v51 = vmul.f32 %v209_v43, %v170_v49 }
 0x22e   :  { %196 = vst.msk [vmem:[%s331_s6] sm:$0xf] %vm195_vm3, %v213_v50  ;;  %v186_v52 = vadd.f32 %v210_v45, %v178_v51 }
 0x230   :  { %v214_v53 = vpack.c.bf16 %v186_v52, %v186_v52 }
 0x232   :  { %197 = vst.msk [vmem:[%s331_s6 + $0x4] sm:$0xf] %vm195_vm3, %v214_v53 }

// kernel: xtec_forward.33
= control target key start
LH: loop header
LB: loop body
LE: loop exit
PB: predicated region body
PF: predicated region fallthrough
CT: control target
= control target key end

     0   :  { %vm19_vm0 = vcmask 523264   ;;  %v165_v0 = vmov 0.0   ;;  %vm166_vm1 = vmmov 0   ;;  %vm47_vm2 = vcmask 261120   ;;  %s209_s1 = inlined_call_operand.vmem [shape: bf16[32,64], index: 1, kind: input, shape index: {}]   ;;  %s210_s0 = inlined_call_operand.vmem [shape: bf16[16,32], index: 0, kind: input, shape index: {}]   ;;  %s211_s2 = inlined_call_operand.vmem [shape: f32[1,64], index: 2, kind: input, shape index: {}]   ;;  %s212_s3 = inlined_call_operand.vmem [shape: bf16[16,64], index: 3, kind: output, shape index: {}]  }
   0x1   :  { %148 = vmatprep.subr.bf16.mxu0 %v165_v0  ;;  %v158_v1 = vld [vmem:[%s209_s1] sm:$0xff]   ;;  %152 = vmatprep.mubr.msk.bf16.mxu0 %vm166_vm1, %v165_v0  ;;  %20 = vst.msk [vmem:[#allocation2] sm:$0xff] %vm19_vm0, %v165_v0  ;;  %21 = vst.msk [vmem:[#allocation2 + $0x8] sm:$0xff] %vm19_vm0, %v165_v0  ;;  %v159_v2 = vld [vmem:[%s209_s1 + $0x8] sm:$0xff]   ;;  %vm129_vm3 = vcmask 519168  }
   0x2   :  { %149 = vmatpush3.bf16.msra.mxu0 %v158_v1  ;;  %v160_v3 = vld [vmem:[%s210_s0] sm:$0xff]  }
   0x3   :  { %150 = vmatprep.subr.bf16.mxu0 %v165_v0  ;;  %v140_v12 = vld [vmem:[%s211_s2] ss:$0 sm:$0xff] }
   0x6   :  { %151 = vmatpush3.bf16.msra.mxu0 %v159_v2 }
   0x8   :  { %v22_v4 = vld [vmem:[#allocation2] sm:$0xff]  ;;  %v23_v6 = vld [vmem:[#allocation2 + $0x8] sm:$0xff] }
   0x9   :  { %153 = vmatmul.mubr.msk.bf16.vlgmr.msra.gmra.mrb[0].mxu0 %vm47_vm2, %v160_v3 }
  0xdc   :  { %v85_v5 = vpop.f32.mrb[0].mxu0 }
  0xdd   :  { %v92_v7 = vadd.f32 %v85_v5, %v22_v4  ;;  %v154_v8 = vpop.f32.mrb[1].mxu0 }
  0xde   :  { %v88_v9 = vpop.f32.mrb[2].mxu0 }
  0xdf   :  { %95 = vst.msk [vmem:[#allocation2] sm:$0xff] %vm19_vm0, %v92_v7  ;;  %v93_v10 = vadd.f32 %v88_v9, %v23_v6  ;;  %v155_v11 = vpop.f32.mrb[3].mxu0 }
  0xe1   :  { %96 = vst.msk [vmem:[#allocation2 + $0x8] sm:$0xff] %vm19_vm0, %v93_v10 }
  0xe6   :  { %v100_v13 = vld [vmem:[#allocation2] sm:$0xff] }
  0xe7   :  { %v109_v14 = vadd.f32 %v140_v12, %v100_v13 }
  0xe8   :  { %v101_v15 = vld [vmem:[#allocation2 + $0x8] sm:$0xff] }
  0xe9   :  { %v113_v16 = vmul.f32 0.70710677, %v109_v14  ;;  %v110_v17 = vadd.f32 %v140_v12, %v101_v15  ;;  %v111_v20 = vmul.f32 0.5, %v109_v14 }
  0xeb   :  { %161 = verf.f32 %v113_v16  ;;  %v114_v18 = vmul.f32 0.70710677, %v110_v17  ;;  %v112_v24 = vmul.f32 0.5, %v110_v17 }
  0xed   :  { %163 = verf.f32 %v114_v18 }
  0xf5   :  { %v162_v19 = vpop.eup %161 }
  0xf6   :  { %v117_v21 = vadd.f32 1.0, %v162_v19 }
  0xf7   :  { %v164_v22 = vpop.eup %163 }
  0xf8   :  { %v119_v23 = vmul.f32 %v117_v21, %v111_v20  ;;  %v118_v25 = vadd.f32 1.0, %v164_v22 }
  0xfa   :  { %v143_v26 = vpack.c.bf16 %v119_v23, %v119_v23  ;;  %v120_v27 = vmul.f32 %v118_v25, %v112_v24 }
  0xfc   :  { %130 = vst.msk [vmem:[%s212_s3] sm:$0xf] %vm129_vm3, %v143_v26  ;;  %v144_v28 = vpack.c.bf16 %v120_v27, %v120_v27 }
  0xfe   :  { %131 = vst.msk [vmem:[%s212_s3 + $0x4] sm:$0xf] %vm129_vm3, %v144_v28 }

// kernel: xtec_forward.29
= control target key start
LH: loop header
LB: loop body
LE: loop exit
PB: predicated region body
PF: predicated region fallthrough
CT: control target
= control target key end

     0   :  { %vm142_vm0 = vcmask 1041408   ;;  %v256_v0 = vmov 0.0   ;;  %vm257_vm1 = vmmov 0   ;;  %vm53_vm2 = vcmask 130048   ;;  %s350_s2 = inlined_call_operand.vmem [shape: bf16[16,32], index: 2, kind: input, shape index: {}]   ;;  %s351_s6 = inlined_call_operand.vmem [shape: bf16[4,32], index: 6, kind: input, shape index: {}]   ;;  %s352_s0 = inlined_call_operand.vmem [shape: f32[8,16], index: 0, kind: input, shape index: {}]   ;;  %s353_s1 = inlined_call_operand.vmem [shape: f32[8,4], index: 1, kind: input, shape index: {}]   ;;  %s354_s3 = inlined_call_operand.vmem [shape: f32[1,32], index: 3, kind: input, shape index: {}, may-alias: {3,5,7,9}]   ;;  %s355_s7 = inlined_call_operand.vmem [shape: f32[1,32], index: 7, kind: input, shape index: {}, may-alias: {3,5,7,9}]   ;;  %s356_s4 = inlined_call_operand.vmem [shape: f32[1,32], index: 4, kind: input, shape index: {}, may-alias: {4,8}]   ;;  %s357_s8 = inlined_call_operand.vmem [shape: f32[1,32], index: 8, kind: input, shape index: {}, may-alias: {4,8}]   ;;  %s358_s5 = inlined_call_operand.vmem [shape: f32[1,32], index: 5, kind: input, shape index: {}, may-alias: {3,5,7,9}]   ;;  %s359_s9 = inlined_call_operand.vmem [shape: f32[1,32], index: 9, kind: input, shape index: {}, may-alias: {3,5,7,9}]   ;;  %s360_s10 = inlined_call_operand.vmem [shape: bf16[8,32], index: 10, kind: output, shape index: {}]  }
   0x1   :  { %237 = vmatprep.subr.bf16.mxu0 %v256_v0  ;;  %v251_v1 = vld [vmem:[%s350_s2] sm:$0xff]   ;;  %243 = vmatprep.subr.bf16.mxu1 %v256_v0  ;;  %vm138_vm3 = vcmask 31744   ;;  %vm99_vm4 = vcmask 261120   ;;  %vm218_vm5 = vcmask 257024  }
   0x2   :  { %v129_v2 = vld [vmem:[%s351_s6] sm:$0x3]  ;;  %239 = vmatprep.mubr.msk.bf16.mxu0 %vm257_vm1, %v256_v0  ;;  %245 = vmatprep.mubr.msk.bf16.mxu1 %vm257_vm1, %v256_v0 }
   0x3   :  { %v36_v3 = vld [vmem:[%s352_s0] sm:$0xff]  ;;  %238 = vmatpush3.bf16.msra.mxu0 %v251_v1  ;;  %v144_v5 = vsel %vm142_vm0, %v129_v2, 0 }
   0x4   :  { %v128_v4 = vld [vmem:[%s353_s1] sm:$0xff]  ;;  %v39_v6 = vpack.c.bf16 %v36_v3, %v36_v3  ;;  %244 = vmatpush3.bf16.msra.mxu1 %v144_v5 }
   0x5   :  { %v130_v7 = vpack.c.bf16 %v128_v4, %v128_v4  ;;  %v224_v8 = vld [vmem:[%s354_s3] ss:$0 sm:$0xff] }
   0x6   :  { %240 = vmatmul.mubr.msk.bf16.vlgmr.msra.gmra.mrb[0].mxu0 %vm53_vm2, %v39_v6  ;;  %v229_v9 = vld [vmem:[%s355_s7] ss:$0 sm:$0xff] }
   0x7   :  { %246 = vmatmul.mubr.msk.bf16.vlgmr.msra.gmra.mrb[0].mxu1 %vm138_vm3, %v130_v7  ;;  %v227_v40 = vld [vmem:[%s356_s4] ss:$0 sm:$0xff] }
   0x8   :  { %v231_v42 = vld [vmem:[%s357_s8] ss:$0 sm:$0xff] }
   0x9   :  { %v228_v45 = vld [vmem:[%s358_s5] ss:$0 sm:$0xff] }
   0xa   :  { %v232_v46 = vld [vmem:[%s359_s9] ss:$0 sm:$0xff] }
  0xd9   :  { %v91_v10 = vpop.f32.mrb[0].mxu0 }
  0xda   :  { %v92_v11 = vadd.f32 %v224_v8, %v91_v10  ;;  %v241_v12 = vpop.f32.mrb[1].mxu0  ;;  %v180_v13 = vpop.f32.mrb[0].mxu1 }
  0xdb   :  { %v181_v14 = vadd.f32 %v229_v9, %v180_v13  ;;  %v94_v15 = vpop.f32.mrb[2].mxu0  ;;  %v247_v16 = vpop.f32.mrb[1].mxu1 }
  0xdc   :  { %v242_v17 = vpop.f32.mrb[3].mxu0  ;;  %v183_v18 = vpop.f32.mrb[2].mxu1  ;;  %v100_v19 = vsel %vm99_vm4, %v92_v11, 0.0 }
  0xdd   :  { %v248_v20 = vpop.f32.mrb[3].mxu1  ;;  %101 = vadd.xlane.f32.xlu0 %v100_v19  ;;  %v188_v21 = vsel %vm99_vm4, %v181_v14, 0.0 }
  0xe1   :  { %189 = vadd.xlane.f32.xlu0 %v188_v21 }
 0x16a   :  { %v102_v22 = vpop.xlane.xlu0 %101 }
 0x16b   :  { %v104_v23 = vmul.f32 0.03125, %v102_v22 }
 0x16d   :  { %v105_v24 = vsub.f32 %v92_v11, %v104_v23 }
 0x16e   :  { %v190_v25 = vpop.xlane.xlu0 %189 }
 0x16f   :  { %v191_v26 = vmul.f32 0.03125, %v190_v25  ;;  %v106_v27 = vmul.f32 %v105_v24, %v105_v24 }
 0x171   :  { %v192_v28 = vsub.f32 %v181_v14, %v191_v26  ;;  %v107_v29 = vsel %vm99_vm4, %v106_v27, 0.0 }
 0x172   :  { %108 = vadd.xlane.f32.xlu1 %v107_v29 }
 0x173   :  { %v193_v30 = vmul.f32 %v192_v28, %v192_v28 }
 0x175   :  { %v194_v31 = vsel %vm99_vm4, %v193_v30, 0.0 }
 0x176   :  { %195 = vadd.xlane.f32.xlu1 %v194_v31 }
 0x1ff   :  { %v109_v32 = vpop.xlane.xlu1 %108 }
 0x200   :  { %v110_v33 = vmul.f32 0.03125, %v109_v32 }
 0x202   :  { %v111_v34 = vadd.f32 1e-12, %v110_v33 }
 0x203   :  { %v196_v35 = vpop.xlane.xlu1 %195 }
 0x204   :  { %252 = vrsqrt.f32 %v111_v34  ;;  %v197_v36 = vmul.f32 0.03125, %v196_v35 }
 0x206   :  { %v198_v37 = vadd.f32 1e-12, %v197_v36 }
 0x208   :  { %254 = vrsqrt.f32 %v198_v37 }
 0x20e   :  { %v253_v38 = vpop.eup %252 }
 0x20f   :  { %v113_v39 = vmul.f32 %v253_v38, %v105_v24 }
 0x211   :  { %v120_v43 = vmul.f32 %v227_v40, %v113_v39 }
 0x212   :  { %v255_v41 = vpop.eup %254 }
 0x213   :  { %v200_v44 = vmul.f32 %v255_v41, %v192_v28  ;;  %v127_v48 = vadd.f32 %v228_v45, %v120_v43 }
 0x215   :  { %v207_v47 = vmul.f32 %v231_v42, %v200_v44 }
 0x217   :  { %v214_v49 = vadd.f32 %v232_v46, %v207_v47 }
 0x219   :  { %v215_v50 = vadd.f32 %v214_v49, %v127_v48 }
 0x21b   :  { %v216_v51 = vmul.f32 0.5, %v215_v50 }
 0x21d   :  { %v217_v52 = vpack.c.bf16 %v216_v51, %v216_v51 }
 0x21f   :  { %219 = vst.msk [vmem:[%s360_s10] sm:$0xf] %vm218_vm5, %v217_v52 }

// kernel: xtec_forward.40
= control target key start
LH: loop header
LB: loop body
LE: loop exit
PB: predicated region body
PF: predicated region fallthrough
CT: control target
= control target key end

     0   :  { %vm19_vm0 = vcmask 785408   ;;  %v124_v0 = vmov 0.0   ;;  %vm125_vm1 = vmmov 0   ;;  %vm39_vm2 = vcmask 261120   ;;  %s163_s1 = inlined_call_operand.vmem [shape: bf16[32,96], index: 1, kind: input, shape index: {}]   ;;  %s164_s0 = inlined_call_operand.vmem [shape: bf16[8,32], index: 0, kind: input, shape index: {}]   ;;  %s165_s2 = inlined_call_operand.vmem [shape: f32[1,96], index: 2, kind: input, shape index: {}]   ;;  %s166_s3 = inlined_call_operand.vmem [shape: bf16[8,96], index: 3, kind: output, shape index: {}]  }
   0x1   :  { %20 = vst.msk [vmem:[#allocation2] sm:$0xff] %vm19_vm0, %v124_v0  ;;  %112 = vmatprep.subr.bf16.mxu0 %v124_v0  ;;  %v122_v1 = vld [vmem:[%s163_s1] sm:$0xff]   ;;  %116 = vmatprep.mubr.msk.bf16.mxu0 %vm125_vm1, %v124_v0  ;;  %v123_v2 = vld [vmem:[%s163_s1 + $0x8] sm:$0xff]   ;;  %vm99_vm3 = vcmask 781312  }
   0x2   :  { %113 = vmatpush3.bf16.msra.mxu0 %v122_v1  ;;  %v22_v3 = vld [vmem:[%s164_s0] sm:$0xf] }
   0x3   :  { %114 = vmatprep.subr.bf16.mxu0 %v124_v0  ;;  %v108_v10 = vld [vmem:[%s165_s2] ss:$0 sm:$0xff] }
   0x6   :  { %115 = vmatpush3.bf16.msra.mxu0 %v123_v2 }
   0x8   :  { %v21_v4 = vld [vmem:[#allocation2] sm:$0xff] }
   0x9   :  { %117 = vmatmul.mubr.msk.bf16.vlgmr.msra.gmra.mrb[0].mxu0 %vm39_vm2, %v22_v3 }
  0xdc   :  { %v77_v5 = vpop.f32.mrb[0].mxu0 }
  0xdd   :  { %v83_v6 = vadd.f32 %v77_v5, %v21_v4  ;;  %v118_v7 = vpop.f32.mrb[1].mxu0 }
  0xde   :  { %v80_v8 = vpop.f32.mrb[2].mxu0 }
  0xdf   :  { %85 = vst.msk [vmem:[#allocation2] sm:$0xff] %vm19_vm0, %v83_v6  ;;  %v119_v9 = vpop.f32.mrb[3].mxu0 }
  0xe6   :  { %v89_v11 = vld [vmem:[#allocation2] sm:$0xff] }
  0xe7   :  { %v97_v12 = vadd.f32 %v108_v10, %v89_v11 }
  0xe9   :  { %v98_v13 = vpack.c.bf16 %v97_v12, %v97_v12 }
  0xeb   :  { %100 = vst.msk [vmem:[%s166_s3] sm:$0xf] %vm99_vm3, %v98_v13 }

// kernel: xtec_forward.41
= control target key start
LH: loop header
LB: loop body
LE: loop exit
PB: predicated region body
PF: predicated region fallthrough
CT: control target
= control target key end

     0   :  { %s794_s6 = smov 0   ;;  %s883_s0 = inlined_call_operand.vmem [shape: bf16[2,4,96], index: 0, kind: input, shape index: {}]   ;;  %s884_s1 = inlined_call_operand.vmem [shape: bf16[2,4,32], index: 1, kind: output, shape index: {}]  }
   0x1 LB: > { %s637_s7 = sadd.s32 4294967295, %s765_s6   ;;  %p641_p0 = scmp.ge.s32.totalorder %s765_s6, 1  ;;  %s765_s6 = sphi %s794_s6, %s11_s6  }
   0x2   : > { %p86_p1 = scmp.lt.s32.totalorder %s765_s6, 3 }
   0x4   : > { %p87_p2 = pnand %p641_p0, %p86_p1 }
   0x5   : > { %p104_p3 = scmp.lt.s32.totalorder (!%p87_p2), %s637_s7, 1  ;;  %v118_v0 = vlaneseq (!%p87_p2)  ;;  %v767_v1 = vmov (!%p87_p2), 1983009808   ;;  %v768_v3 = vmov (!%p87_p2), 0.0   ;;  %vm769_vm0 = vmmov (!%p87_p2), 0   ;;  %s770_s12 = smov (!%p87_p2), 96  }
   0x6   : > { %90 = sbr.rel (%p87_p2) target bundleno = 1598 (0x63e), region = 24  ;;  %v116_v2 = vunpack.c.l.s4 (!%p87_p2), %v767_v1  ;;  %670 = vmatprep.subr.bf16.mxu0 (!%p87_p2), %v768_v3  ;;  %676 = vmatprep.subr.bf16.mxu1 (!%p87_p2), %v768_v3  ;;  %vm124_vm1 = vcmask (!%p87_p2), 64512   ;;  %s771_s13 = smov (!%p87_p2), 64   ;;  %vm171_vm2 = vcmask (!%p87_p2), 27648   ;;  %vm190_vm3 = vcmask (!%p87_p2), 1041408  }
   0x7   : > { %v119_v4 = vshrl.u32 (!%p87_p2), %v118_v0, 7  ;;  %672 = vmatprep.mubr.msk.bf16.mxu0 (!%p87_p2), %vm769_vm0, %v768_v3  ;;  %678 = vmatprep.mubr.msk.bf16.mxu1 (!%p87_p2), %vm769_vm0, %v768_v3  ;;  %s772_s14 = smov (!%p87_p2), 88   ;;  %s773_s15 = smov (!%p87_p2), 72   ;;  %vm186_vm4 = vcmask (!%p87_p2), 31744   ;;  %vm577_vm5 = vcmask (!%p87_p2), 130048   ;;  %vm579_vm6 = vcmask (!%p87_p2), 195584  }
   0x8   : > { %v117_v5 = vunpack.c.0.s8 (!%p87_p2), %v116_v2  ;;  %s774_s16 = smov (!%p87_p2), 120   ;;  %s775_s17 = smov (!%p87_p2), 80   ;;  %vm582_vm7 = vcmask (!%p87_p2), 254976  }
   0x9   : > { %s776_s18 = smov (!%p87_p2), 112   ;;  %s777_s19 = smov (!%p87_p2), 104  }
   0xa   : > { %v120_v6 = vsub.s32 (!%p87_p2), %v117_v5, %v119_v4  ;;  %s778_s20 = smov (!%p87_p2), 56   ;;  %s779_s21 = smov (!%p87_p2), 48  }
   0xb   : > { %s780_s22 = smov (!%p87_p2), 40   ;;  %s781_s23 = smov (!%p87_p2), 8  }
   0xc   : > { %s782_s24 = smov (!%p87_p2), 16   ;;  %s783_s25 = smov (!%p87_p2), 24  }
   0xd   : > { %s886_s7 = smov (!%p104_p3, %s637_s7), 1 }
   0xe   : > { %s642_s8 = sshll.u32 %s886_s7, 1 }
   0xf   : > { %s107_s11 = scalar_lea.vmem %s883_s0, %s642_s8  ;;  %s111_s28 = scalar_lea.vmem %s884_s1, %s642_s8 }
  0x10   : > { %v113_v7 = vld [vmem:[%s107_s11] sm:$0x3] }
  0x11   : > { %v816_v8 = vrot.slane %v113_v7, %v120_v6 }
  0x13   : > { %122 = vrot.lane.b32.xlu0 %v816_v8, %s770_s12  ;;  %184 = vrot.lane.b32.xlu1 %v816_v8, %s771_s13 }
  0x17   : > { %236 = vrot.lane.b32.xlu1 %v816_v8, %s772_s14 }
  0x85   : > { %v123_v9 = vpop.permute.xlu0 %122  ;;  %v185_v16 = vpop.permute.xlu1 %184 }
  0x86   : > { %v129_v10 = vsel %vm124_vm1, %v123_v9, 0  ;;  %v192_v17 = vsel %vm190_vm3, %v185_v16, 0 }
  0x87   : > { %671 = vmatpush3.bf16.xpose.msra.mxu0 %v129_v10  ;;  %677 = vmatpush3.bf16.msra.mxu1 %v192_v17 }
  0x88   : > { %688 = vmatprep.subr.bf16.mxu0 %v768_v3  ;;  %682 = vmatprep.subr.bf16.mxu1 %v768_v3 }
  0x89   : > { %v237_v23 = vpop.permute.xlu1 %236 }
  0x8a   : > { %v242_v29 = vsel %vm124_vm1, %v237_v23, 0 }
  0x8e   : > { %673 = vmatmul.mubr.msk.bf16.vlgmr.msra.gmra.mrb[0].mxu0 %vm124_vm1, %v113_v7 }
  0x8f   : > { %690 = vmatprep.mubr.msk.bf16.mxu0 %vm769_vm0, %v768_v3 }
 0x161   : > { %v165_v11 = vpop.f32.mrb[0].mxu0 }
 0x162   : > { %v674_v12 = vpop.f32.mrb[1].mxu0  ;;  %v172_v13 = vsel %vm171_vm2, %v165_v11, -inf }
 0x163   : > { %173 = vmax.xlane.f32.xlu0 %v172_v13  ;;  %v168_v14 = vpop.f32.mrb[2].mxu0 }
 0x164   : > { %v675_v15 = vpop.f32.mrb[3].mxu0 }
 0x179   : > { %456 = vrot.lane.b32.xlu0 %v816_v8, %s773_s15 }
 0x1f0   : > { %v174_v18 = vpop.xlane.xlu0 %173 }
 0x1f1   : > { %v175_v19 = vsub.f32 %v165_v11, %v174_v18 }
 0x1f3   : > { %v176_v20 = vmul.f32 1.442695, %v175_v19 }
 0x1f4   : > { %v457_v32 = vpop.permute.xlu0 %456 }
 0x1f5   : > { %743 = vpow2.f32 %v176_v20  ;;  %v462_v34 = vsel %vm124_vm1, %v457_v32, 0 }
 0x1ff   : > { %v744_v21 = vpop.eup %743 }
 0x200   : > { %v178_v22 = vsel %vm171_vm2, %v744_v21, 0.0 }
 0x201   : > { %179 = vadd.xlane.f32.xlu1 %v178_v22 }
 0x212   : > { %234 = vrot.lane.b32.xlu1 %v816_v8, %s774_s16 }
 0x216   : > { %346 = vrot.lane.b32.xlu1 %v816_v8, %s775_s17 }
 0x21a   : > { %344 = vrot.lane.b32.xlu1 %v816_v8, %s776_s18 }
 0x21e   : > { %454 = vrot.lane.b32.xlu1 %v816_v8, %s777_s19 }
 0x28e   : > { %v180_v24 = vpop.xlane.xlu1 %179 }
 0x28f   : > { %745 = vrcp.f32 %v180_v24 }
 0x292   : > { %v235_v27 = vpop.permute.xlu1 %234 }
 0x296   : > { %v347_v30 = vpop.permute.xlu1 %346 }
 0x297   : > { %v352_v31 = vsel %vm124_vm1, %v347_v30, 0 }
 0x299   : > { %v746_v25 = vpop.eup %745 }
 0x29a   : > { %v182_v26 = vmul.f32 %v746_v25, %v744_v21  ;;  %v345_v33 = vpop.permute.xlu1 %344 }
 0x29c   : > { %v183_v28 = vpack.c.bf16 %v182_v26, %v182_v26 }
 0x29e   : > { %679 = vmatmul.mubr.msk.bf16.vlgmr.msra.gmra.mrb[0].mxu1 %vm186_vm4, %v183_v28  ;;  %v455_v35 = vpop.permute.xlu1 %454 }
 0x29f   : > { %683 = vmatpush3.bf16.xpose.msra.mxu1 %v242_v29  ;;  %684 = vmatprep.mubr.msk.bf16.mxu1 %vm769_vm0, %v768_v3 }
 0x2a0   : > { %694 = vmatprep.subr.bf16.mxu1 %v768_v3 }
 0x2a6   : > { %685 = vmatmul.mubr.msk.bf16.vlgmr.msra.gmra.mrb[4].mxu1 %vm124_vm1, %v235_v27 }
 0x2a7   : > { %695 = vmatpush3.bf16.xpose.msra.mxu1 %v352_v31  ;;  %696 = vmatprep.mubr.msk.bf16.mxu1 %vm769_vm0, %v768_v3 }
 0x2a8   : > { %706 = vmatprep.subr.bf16.mxu1 %v768_v3 }
 0x2ae   : > { %697 = vmatmul.mubr.msk.bf16.vlgmr.msra.gmra.mrb[8].mxu1 %vm124_vm1, %v345_v33 }
 0x2af   : > { %707 = vmatpush3.bf16.xpose.msra.mxu1 %v462_v34  ;;  %708 = vmatprep.mubr.msk.bf16.mxu1 %vm769_vm0, %v768_v3 }
 0x2b6   : > { %709 = vmatmul.mubr.msk.bf16.vlgmr.msra.gmra.mrb[12].mxu1 %vm124_vm1, %v455_v35 }
 0x371   : > { %v850_v36 = vpop.f32.mrb[0].mxu1 }
 0x372   : > { %v680_v37 = vpop.f32.mrb[1].mxu1 }
 0x373   : > { %v231_v38 = vpop.f32.mrb[2].mxu1 }
 0x374   : > { %v681_v39 = vpop.f32.mrb[3].mxu1 }
 0x379   : > { %v278_v40 = vpop.f32.mrb[4].mxu1 }
 0x37a   : > { %v686_v41 = vpop.f32.mrb[5].mxu1  ;;  %v284_v42 = vsel %vm171_vm2, %v278_v40, -inf }
 0x37b   : > { %285 = vmax.xlane.f32.xlu1 %v284_v42  ;;  %v281_v43 = vpop.f32.mrb[6].mxu1 }
 0x37c   : > { %v687_v44 = vpop.f32.mrb[7].mxu1 }
 0x381   : > { %v388_v45 = vpop.f32.mrb[8].mxu1 }
 0x382   : > { %v394_v46 = vsel %vm171_vm2, %v388_v45, -inf  ;;  %v698_v47 = vpop.f32.mrb[9].mxu1 }
 0x383   : > { %395 = vmax.xlane.f32.xlu0 %v394_v46  ;;  %v391_v48 = vpop.f32.mrb[10].mxu1 }
 0x384   : > { %v699_v49 = vpop.f32.mrb[11].mxu1 }
 0x389   : > { %v498_v50 = vpop.f32.mrb[12].mxu1 }
 0x38a   : > { %v504_v51 = vsel %vm171_vm2, %v498_v50, -inf  ;;  %v710_v52 = vpop.f32.mrb[13].mxu1 }
 0x38b   : > { %505 = vmax.xlane.f32.xlu1 %v504_v51  ;;  %v501_v53 = vpop.f32.mrb[14].mxu1 }
 0x38c   : > { %v711_v54 = vpop.f32.mrb[15].mxu1 }
 0x408   : > { %v286_v55 = vpop.xlane.xlu1 %285 }
 0x409   : > { %v287_v56 = vsub.f32 %v278_v40, %v286_v55 }
 0x40b   : > { %v288_v57 = vmul.f32 1.442695, %v287_v56 }
 0x40d   : > { %747 = vpow2.f32 %v288_v57 }
 0x410   : > { %v396_v1 = vpop.xlane.xlu0 %395 }
 0x411   : > { %v397_v2 = vsub.f32 %v388_v45, %v396_v1 }
 0x413   : > { %v398_v4 = vmul.f32 1.442695, %v397_v2 }
 0x417   : > { %v748_v58 = vpop.eup %747 }
 0x418   : > { %v506_v59 = vpop.xlane.xlu1 %505  ;;  %v290_v60 = vsel %vm171_vm2, %v748_v58, 0.0 }
 0x419   : > { %v507_v61 = vsub.f32 %v498_v50, %v506_v59  ;;  %291 = vadd.xlane.f32.xlu1 %v290_v60 }
 0x41b   : > { %v508_v62 = vmul.f32 1.442695, %v507_v61 }
 0x41d   : > { %749 = vpow2.f32 %v508_v62 }
 0x41e   : > { %751 = vpow2.f32 %v398_v4 }
 0x427   : > { %v750_v63 = vpop.eup %749 }
 0x428   : > { %v510_v0 = vsel %vm171_vm2, %v750_v63, 0.0  ;;  %v752_v5 = vpop.eup %751 }
 0x429   : > { %511 = vadd.xlane.f32.xlu0 %v510_v0  ;;  %v400_v6 = vsel %vm171_vm2, %v752_v5, 0.0 }
 0x42a   : > { %296 = vrot.lane.b32.xlu1 %v816_v8, %s778_s20 }
 0x43f   : > { %406 = vrot.lane.b32.xlu0 %v816_v8, %s779_s21 }
 0x44e   : > { %401 = vadd.xlane.f32.xlu1 %v400_v6 }
 0x45f   : > { %516 = vrot.lane.b32.xlu1 %v816_v8, %s780_s22 }
 0x4a6   : > { %v292_v7 = vpop.xlane.xlu1 %291 }
 0x4a7   : > { %753 = vrcp.f32 %v292_v7 }
 0x4aa   : > { %v297_v9 = vpop.permute.xlu1 %296 }
 0x4ab   : > { %v302_v10 = vsel %vm190_vm3, %v297_v9, 0 }
 0x4ac   : > { %689 = vmatpush3.bf16.msra.mxu0 %v302_v10 }
 0x4ad   : > { %700 = vmatprep.subr.bf16.mxu0 %v768_v3 }
 0x4b1   : > { %v754_v11 = vpop.eup %753 }
 0x4b2   : > { %v294_v12 = vmul.f32 %v754_v11, %v748_v58 }
 0x4b4   : > { %v295_v13 = vpack.c.bf16 %v294_v12, %v294_v12 }
 0x4b6   : > { %691 = vmatmul.mubr.msk.bf16.vlgmr.msra.gmra.mrb[4].mxu0 %vm186_vm4, %v295_v13  ;;  %v512_v14 = vpop.xlane.xlu0 %511 }
 0x4b7   : > { %702 = vmatprep.mubr.msk.bf16.mxu0 %vm769_vm0, %v768_v3 }
 0x4ba   : > { %v407_v15 = vpop.permute.xlu0 %406 }
 0x4bb   : > { %v412_v8 = vsel %vm190_vm3, %v407_v15, 0 }
 0x4bc   : > { %701 = vmatpush3.bf16.msra.mxu0 %v412_v8 }
 0x4bd   : > { %712 = vmatprep.subr.bf16.mxu0 %v768_v3 }
 0x4db   : > { %v402_v16 = vpop.xlane.xlu1 %401 }
 0x4dc   : > { %755 = vrcp.f32 %v402_v16 }
 0x4dd   : > { %757 = vrcp.f32 %v512_v14 }
 0x4df   : > { %v517_v18 = vpop.permute.xlu1 %516 }
 0x4e0   : > { %v522_v20 = vsel %vm190_vm3, %v517_v18, 0 }
 0x4e6   : > { %v756_v17 = vpop.eup %755 }
 0x4e7   : > { %v404_v19 = vmul.f32 %v756_v17, %v752_v5  ;;  %v758_v22 = vpop.eup %757 }
 0x4e8   : > { %v514_v23 = vmul.f32 %v758_v22, %v750_v63 }
 0x4e9   : > { %v405_v21 = vpack.c.bf16 %v404_v19, %v404_v19 }
 0x4ea   : > { %v515_v24 = vpack.c.bf16 %v514_v23, %v514_v23 }
 0x4eb   : > { %703 = vmatmul.mubr.msk.bf16.vlgmr.msra.gmra.mrb[8].mxu0 %vm186_vm4, %v405_v21 }
 0x4ec   : > { %713 = vmatpush3.bf16.msra.mxu0 %v522_v20  ;;  %714 = vmatprep.mubr.msk.bf16.mxu0 %vm769_vm0, %v768_v3 }
 0x4f3   : > { %715 = vmatmul.mubr.msk.bf16.vlgmr.msra.gmra.mrb[12].mxu0 %vm186_vm4, %v515_v24 }
 0x589   : > { %v338_v25 = vpop.f32.mrb[4].mxu0 }
 0x58a   : > { %565 = vrot.lane.b32.xlu1 %v338_v25, %s781_s23  ;;  %v692_v26 = vpop.f32.mrb[5].mxu0 }
 0x58b   : > { %v341_v27 = vpop.f32.mrb[6].mxu0 }
 0x58c   : > { %v693_v28 = vpop.f32.mrb[7].mxu0 }
 0x5be   : > { %v448_v29 = vpop.f32.mrb[8].mxu0 }
 0x5bf   : > { %569 = vrot.lane.b32.xlu0 %v448_v29, %s782_s24  ;;  %v704_v30 = vpop.f32.mrb[9].mxu0 }
 0x5c0   : > { %v451_v31 = vpop.f32.mrb[10].mxu0 }
 0x5c1   : > { %v705_v32 = vpop.f32.mrb[11].mxu0 }
 0x5c6   : > { %v558_v33 = vpop.f32.mrb[12].mxu0 }
 0x5c7   : > { %573 = vrot.lane.b32.xlu1 %v558_v33, %s783_s25  ;;  %v716_v3 = vpop.f32.mrb[13].mxu0 }
 0x5c8   : > { %v561_v34 = vpop.f32.mrb[14].mxu0 }
 0x5c9   : > { %v717_v35 = vpop.f32.mrb[15].mxu0 }
 0x5fc   : > { %v566_v37 = vpop.permute.xlu1 %565 }
 0x5fd   : > { %v576_v39 = vsel %vm124_vm1, %v850_v36, %v566_v37 }
 0x631   : > { %v570_v38 = vpop.permute.xlu0 %569 }
 0x632   : > { %v578_v40 = vsel %vm577_vm5, %v576_v39, %v570_v38 }
 0x639   : > { %v574_v41 = vpop.permute.xlu1 %573 }
 0x63a   : > { %v580_v42 = vsel %vm579_vm6, %v578_v40, %v574_v41 }
 0x63b   : > { %v581_v43 = vpack.c.bf16 %v580_v42, %v580_v42 }
 0x63d   : > { %583 = vst.msk [vmem:[%s111_s28] sm:$0x3] %vm582_vm7, %v581_v43 }
 0x63e PF: > { %s11_s6 = sadd.s32 1, %s765_s6  }
 0x63f   : > { %p8_p4 = scmp.ge.s32.totalorder %s11_s6, 4  }
 0x641   :  { %10 = sbr.rel (!%p8_p4) target bundleno = 1 (0x1), region = 54 }

// kernel: xtec_forward.43
= control target key start
LH: loop header
LB: loop body
LE: loop exit
PB: predicated region body
PF: predicated region fallthrough
CT: control target
= control target key end

     0   :  { %vm19_vm0 = vcmask 523264   ;;  %v131_v0 = vmov 0.0   ;;  %vm132_vm1 = vmmov 0   ;;  %vm39_vm2 = vcmask 261120   ;;  %s170_s1 = inlined_call_operand.vmem [shape: bf16[32,64], index: 1, kind: input, shape index: {}]   ;;  %s171_s0 = inlined_call_operand.vmem [shape: bf16[8,32], index: 0, kind: input, shape index: {}]   ;;  %s172_s2 = inlined_call_operand.vmem [shape: f32[1,64], index: 2, kind: input, shape index: {}]   ;;  %s173_s3 = inlined_call_operand.vmem [shape: bf16[8,64], index: 3, kind: output, shape index: {}]  }
   0x1   :  { %20 = vst.msk [vmem:[#allocation2] sm:$0xff] %vm19_vm0, %v131_v0  ;;  %117 = vmatprep.subr.bf16.mxu0 %v131_v0  ;;  %v127_v1 = vld [vmem:[%s170_s1] sm:$0xff]   ;;  %121 = vmatprep.mubr.msk.bf16.mxu0 %vm132_vm1, %v131_v0  ;;  %v128_v2 = vld [vmem:[%s170_s1 + $0x8] sm:$0xff]   ;;  %vm104_vm3 = vcmask 519168  }
   0x2   :  { %118 = vmatpush3.bf16.msra.mxu0 %v127_v1  ;;  %v22_v3 = vld [vmem:[%s171_s0] sm:$0xf] }
   0x3   :  { %119 = vmatprep.subr.bf16.mxu0 %v131_v0  ;;  %v113_v10 = vld [vmem:[%s172_s2] ss:$0 sm:$0xff] }
   0x6   :  { %120 = vmatpush3.bf16.msra.mxu0 %v128_v2 }
   0x8   :  { %v21_v4 = vld [vmem:[#allocation2] sm:$0xff] }
   0x9   :  { %122 = vmatmul.mubr.msk.bf16.vlgmr.msra.gmra.mrb[0].mxu0 %vm39_vm2, %v22_v3 }
  0xdc   :  { %v77_v5 = vpop.f32.mrb[0].mxu0 }
  0xdd   :  { %v83_v6 = vadd.f32 %v77_v5, %v21_v4  ;;  %v123_v7 = vpop.f32.mrb[1].mxu0 }
  0xde   :  { %v80_v8 = vpop.f32.mrb[2].mxu0 }
  0xdf   :  { %85 = vst.msk [vmem:[#allocation2] sm:$0xff] %vm19_vm0, %v83_v6  ;;  %v124_v9 = vpop.f32.mrb[3].mxu0 }
  0xe6   :  { %v89_v11 = vld [vmem:[#allocation2] sm:$0xff] }
  0xe7   :  { %v97_v12 = vadd.f32 %v113_v10, %v89_v11 }
  0xe9   :  { %v99_v13 = vmul.f32 0.70710677, %v97_v12  ;;  %v98_v15 = vmul.f32 0.5, %v97_v12 }
  0xeb   :  { %129 = verf.f32 %v99_v13 }
  0xf5   :  { %v130_v14 = vpop.eup %129 }
  0xf6   :  { %v101_v16 = vadd.f32 1.0, %v130_v14 }
  0xf8   :  { %v102_v17 = vmul.f32 %v101_v16, %v98_v15 }
  0xfa   :  { %v103_v18 = vpack.c.bf16 %v102_v17, %v102_v17 }
  0xfc   :  { %105 = vst.msk [vmem:[%s173_s3] sm:$0xf] %vm104_vm3, %v103_v18 }

// kernel: xtec_forward.42
= control target key start
LH: loop header
LB: loop body
LE: loop exit
PB: predicated region body
PF: predicated region fallthrough
CT: control target
= control target key end

     0   :  { %vm28_vm0 = vcmask 261120   ;;  %v169_v0 = vmov 0.0   ;;  %vm170_vm1 = vmmov 0   ;;  %vm140_vm2 = vcmask 257024   ;;  %s235_s1 = inlined_call_operand.vmem [shape: bf16[32,32], index: 1, kind: input, shape index: {}]   ;;  %s236_s0 = inlined_call_operand.vmem [shape: bf16[8,32], index: 0, kind: input, shape index: {}]   ;;  %s237_s3 = inlined_call_operand.vmem [shape: bf16[8,32], index: 3, kind: input, shape index: {}]   ;;  %s238_s2 = inlined_call_operand.vmem [shape: f32[1,32], index: 2, kind: input, shape index: {}, may-alias: {2,5}]   ;;  %s239_s4 = inlined_call_operand.vmem [shape: f32[1,32], index: 4, kind: input, shape index: {}]   ;;  %s240_s5 = inlined_call_operand.vmem [shape: f32[1,32], index: 5, kind: input, shape index: {}, may-alias: {2,5}]   ;;  %s241_s6 = inlined_call_operand.vmem [shape: bf16[8,32], index: 6, kind: output, shape index: {}]  }
   0x1   :  { %155 = vmatprep.subr.bf16.mxu0 %v169_v0  ;;  %v165_v1 = vld [vmem:[%s235_s1] sm:$0xff]   ;;  %159 = vmatprep.mubr.msk.bf16.mxu0 %vm170_vm1, %v169_v0  ;;  %29 = vst.msk [vmem:[#allocation2] sm:$0xff] %vm28_vm0, %v169_v0  ;;  %v166_v2 = vld [vmem:[%s235_s1 + $0x8] sm:$0xff]  }
   0x2   :  { %156 = vmatpush3.bf16.msra.mxu0 %v165_v1  ;;  %v31_v3 = vld [vmem:[%s236_s0] sm:$0xf] }
   0x3   :  { %157 = vmatprep.subr.bf16.mxu0 %v169_v0  ;;  %v99_v10 = vld [vmem:[%s237_s3] sm:$0xf] }
   0x4   :  { %v149_v11 = vld [vmem:[%s238_s2] ss:$0 sm:$0xff]  ;;  %v109_v12 = vunpack.c.l.bf16 %v99_v10 }
   0x5   :  { %v150_v26 = vld [vmem:[%s239_s4] ss:$0 sm:$0xff] }
   0x6   :  { %158 = vmatpush3.bf16.msra.mxu0 %v166_v2  ;;  %v151_v28 = vld [vmem:[%s240_s5] ss:$0 sm:$0xff] }
   0x8   :  { %v30_v4 = vld [vmem:[#allocation2] sm:$0xff] }
   0x9   :  { %160 = vmatmul.mubr.msk.bf16.vlgmr.msra.gmra.mrb[0].mxu0 %vm28_vm0, %v31_v3 }
  0xdc   :  { %v86_v5 = vpop.f32.mrb[0].mxu0 }
  0xdd   :  { %v92_v6 = vadd.f32 %v86_v5, %v30_v4  ;;  %v161_v7 = vpop.f32.mrb[1].mxu0 }
  0xde   :  { %v89_v8 = vpop.f32.mrb[2].mxu0 }
  0xdf   :  { %93 = vst.msk [vmem:[#allocation2] sm:$0xff] %vm28_vm0, %v92_v6  ;;  %v162_v9 = vpop.f32.mrb[3].mxu0 }
  0xe6   :  { %v97_v13 = vld [vmem:[#allocation2] sm:$0xff] }
  0xe7   :  { %v108_v14 = vadd.f32 %v149_v11, %v97_v13 }
  0xe9   :  { %v110_v15 = vadd.f32 %v109_v12, %v108_v14 }
  0xeb   :  { %v111_v16 = vsel %vm28_vm0, %v110_v15, 0.0 }
  0xec   :  { %112 = vadd.xlane.f32.xlu0 %v111_v16 }
 0x179   :  { %v113_v17 = vpop.xlane.xlu0 %112 }
 0x17a   :  { %v115_v18 = vmul.f32 0.03125, %v113_v17 }
 0x17c   :  { %v116_v19 = vsub.f32 %v110_v15, %v115_v18 }
 0x17e   :  { %v117_v20 = vmul.f32 %v116_v19, %v116_v19 }
 0x180   :  { %v118_v21 = vsel %vm28_vm0, %v117_v20, 0.0 }
 0x181   :  { %119 = vadd.xlane.f32.xlu0 %v118_v21 }
 0x20e   :  { %v120_v22 = vpop.xlane.xlu0 %119 }
 0x20f   :  { %v121_v23 = vmul.f32 0.03125, %v120_v22 }
 0x211   :  { %v122_v24 = vadd.f32 1e-12, %v121_v23 }
 0x213   :  { %167 = vrsqrt.f32 %v122_v24 }
 0x21d   :  { %v168_v25 = vpop.eup %167 }
 0x21e   :  { %v124_v27 = vmul.f32 %v168_v25, %v116_v19 }
 0x220   :  { %v131_v29 = vmul.f32 %v150_v26, %v124_v27 }
 0x222   :  { %v138_v30 = vadd.f32 %v151_v28, %v131_v29 }
 0x224   :  { %v139_v31 = vpack.c.bf16 %v138_v30, %v138_v30 }
 0x226   :  { %141 = vst.msk [vmem:[%s241_s6] sm:$0xf] %vm140_vm2, %v139_v31 }

// kernel: xtec_forward.47
= control target key start
LH: loop header
LB: loop body
LE: loop exit
PB: predicated region body
PF: predicated region fallthrough
CT: control target
= control target key end

     0   :  { %s860_s9 = smov 0   ;;  %s950_s0 = inlined_call_operand.vmem [shape: bf16[2,8,96], index: 0, kind: input, shape index: {}]   ;;  %s951_s1 = inlined_call_operand.vmem [shape: bf16[2,4,96], index: 1, kind: input, shape index: {}]   ;;  %s952_s2 = inlined_call_operand.vmem [shape: bf16[2,8,32], index: 2, kind: output, shape index: {}]  }
   0x1 LB: > { %s696_s10 = sadd.s32 4294967295, %s827_s9   ;;  %p700_p0 = scmp.ge.s32.totalorder %s827_s9, 1  ;;  %s827_s9 = sphi %s860_s9, %s12_s9  }
   0x2   : > { %p120_p1 = scmp.lt.s32.totalorder %s827_s9, 3 }
   0x4   : > { %p121_p2 = pnand %p700_p0, %p120_p1 }
   0x5   : > { %p144_p3 = scmp.lt.s32.totalorder (!%p121_p2), %s696_s10, 1  ;;  %v829_v0 = vmov (!%p121_p2), 0.0   ;;  %vm830_vm0 = vmmov (!%p121_p2), 0   ;;  %s831_s15 = smov (!%p121_p2), 96   ;;  %vm169_vm1 = vcmask (!%p121_p2), 64512   ;;  %vm216_vm2 = vcmask (!%p121_p2), 31744  }
   0x6   : > { %124 = sbr.rel (%p121_p2) target bundleno = 1596 (0x63c), region = 28  ;;  %732 = vmatprep.subr.bf16.mxu0 (!%p121_p2), %v829_v0  ;;  %734 = vmatprep.mubr.msk.bf16.mxu0 (!%p121_p2), %vm830_vm0, %v829_v0  ;;  %s832_s20 = smov (!%p121_p2), 64   ;;  %vm234_vm3 = vcmask (!%p121_p2), 1041408   ;;  %vm624_vm4 = vcmask (!%p121_p2), 130048   ;;  %vm626_vm5 = vcmask (!%p121_p2), 195584   ;;  %vm629_vm6 = vcmask (!%p121_p2), 257024  }
   0x7   : > { %738 = vmatprep.subr.bf16.mxu1 (!%p121_p2), %v829_v0  ;;  %740 = vmatprep.mubr.msk.bf16.mxu1 (!%p121_p2), %vm830_vm0, %v829_v0  ;;  %s833_s21 = smov (!%p121_p2), 88   ;;  %s834_s22 = smov (!%p121_p2), 72  }
   0x8   : > { %s835_s23 = smov (!%p121_p2), 120   ;;  %s836_s24 = smov (!%p121_p2), 80  }
   0x9   : > { %s837_s25 = smov (!%p121_p2), 112   ;;  %s838_s26 = smov (!%p121_p2), 104  }
   0xa   : > { %s839_s27 = smov (!%p121_p2), 56   ;;  %s840_s28 = smov (!%p121_p2), 48  }
   0xb   : > { %s841_s29 = smov (!%p121_p2), 40   ;;  %s842_s30 = smov (!%p121_p2), 8  }
   0xc   : > { %s843_s3 = smov (!%p121_p2), 16   ;;  %s844_s4 = smov (!%p121_p2), 24  }
   0xd   : > { %s954_s10 = smov (!%p144_p3, %s696_s10), 1 }
   0xe   : > { %s702_s11 = sshll.u32 %s954_s10, 1  ;;  %s701_s16 = sshll.u32 %s954_s10, 2 }
   0xf   : > { %s151_s14 = scalar_lea.vmem %s951_s1, %s702_s11  ;;  %s147_s19 = scalar_lea.vmem %s950_s0, %s701_s16 }
  0x10   : > { %v880_v1 = vld.sshfl [vmem:[%s151_s14] sm:$0x3 pattern:$0x76325410]  ;;  %s155_s7 = scalar_lea.vmem %s952_s2, %s701_s16 }
  0x11   : > { %167 = vrot.lane.b32.xlu0 %v880_v1, %s831_s15  ;;  %v157_v4 = vld [vmem:[%s147_s19] sm:$0xf]  ;;  %229 = vrot.lane.b32.xlu1 %v880_v1, %s832_s20 }
  0x12   : > { %v707_v17 = vcombine.low %v157_v4, %v157_v4 }
  0x15   : > { %283 = vrot.lane.b32.xlu1 %v880_v1, %s833_s21 }
  0x83   : > { %v168_v2 = vpop.permute.xlu0 %167  ;;  %v230_v10 = vpop.permute.xlu1 %229 }
  0x84   : > { %v174_v3 = vsel %vm169_vm1, %v168_v2, 0  ;;  %v236_v11 = vsel %vm234_vm3, %v230_v10, 0 }
  0x85   : > { %733 = vmatpush3.bf16.xpose.msra.mxu0 %v174_v3  ;;  %739 = vmatpush3.bf16.msra.mxu1 %v236_v11 }
  0x86   : > { %750 = vmatprep.subr.bf16.mxu0 %v829_v0  ;;  %744 = vmatprep.subr.bf16.mxu1 %v829_v0 }
  0x87   : > { %v284_v18 = vpop.permute.xlu1 %283 }
  0x88   : > { %v289_v24 = vsel %vm169_vm1, %v284_v18, 0 }
  0x8c   : > { %735 = vmatmul.mubr.msk.bf16.vlgmr.msra.gmra.mrb[0].mxu0 %vm169_vm1, %v157_v4 }
  0x8d   : > { %752 = vmatprep.mubr.msk.bf16.mxu0 %vm830_vm0, %v829_v0 }
 0x15f   : > { %v210_v5 = vpop.f32.mrb[0].mxu0 }
 0x160   : > { %v736_v6 = vpop.f32.mrb[1].mxu0  ;;  %v217_v7 = vsel %vm216_vm2, %v210_v5, -inf }
 0x161   : > { %218 = vmax.xlane.f32.xlu0 %v217_v7  ;;  %v213_v8 = vpop.f32.mrb[2].mxu0 }
 0x162   : > { %v737_v9 = vpop.f32.mrb[3].mxu0 }
 0x177   : > { %503 = vrot.lane.b32.xlu0 %v880_v1, %s834_s22 }
 0x1ee   : > { %v219_v12 = vpop.xlane.xlu0 %218 }
 0x1ef   : > { %v220_v13 = vsub.f32 %v210_v5, %v219_v12 }
 0x1f1   : > { %v221_v14 = vmul.f32 1.442695, %v220_v13 }
 0x1f2   : > { %v504_v27 = vpop.permute.xlu0 %503 }
 0x1f3   : > { %805 = vpow2.f32 %v221_v14  ;;  %v509_v29 = vsel %vm169_vm1, %v504_v27, 0 }
 0x1fd   : > { %v806_v15 = vpop.eup %805 }
 0x1fe   : > { %v223_v16 = vsel %vm216_vm2, %v806_v15, 0.0 }
 0x1ff   : > { %224 = vadd.xlane.f32.xlu1 %v223_v16 }
 0x210   : > { %281 = vrot.lane.b32.xlu1 %v707_v17, %s835_s23 }
 0x214   : > { %393 = vrot.lane.b32.xlu1 %v880_v1, %s836_s24 }
 0x218   : > { %391 = vrot.lane.b32.xlu1 %v707_v17, %s837_s25 }
 0x21c   : > { %501 = vrot.lane.b32.xlu1 %v707_v17, %s838_s26 }
 0x28c   : > { %v225_v19 = vpop.xlane.xlu1 %224 }
 0x28d   : > { %807 = vrcp.f32 %v225_v19 }
 0x290   : > { %v282_v22 = vpop.permute.xlu1 %281 }
 0x294   : > { %v394_v25 = vpop.permute.xlu1 %393 }
 0x295   : > { %v399_v26 = vsel %vm169_vm1, %v394_v25, 0 }
 0x297   : > { %v808_v20 = vpop.eup %807 }
 0x298   : > { %v227_v21 = vmul.f32 %v808_v20, %v806_v15  ;;  %v392_v28 = vpop.permute.xlu1 %391 }
 0x29a   : > { %v228_v23 = vpack.c.bf16 %v227_v21, %v227_v21 }
 0x29c   : > { %741 = vmatmul.mubr.msk.bf16.vlgmr.msra.gmra.mrb[0].mxu1 %vm216_vm2, %v228_v23  ;;  %v502_v30 = vpop.permute.xlu1 %501 }
 0x29d   : > { %745 = vmatpush3.bf16.xpose.msra.mxu1 %v289_v24  ;;  %746 = vmatprep.mubr.msk.bf16.mxu1 %vm830_vm0, %v829_v0 }
 0x29e   : > { %756 = vmatprep.subr.bf16.mxu1 %v829_v0 }
 0x2a4   : > { %747 = vmatmul.mubr.msk.bf16.vlgmr.msra.gmra.mrb[4].mxu1 %vm169_vm1, %v282_v22 }
 0x2a5   : > { %757 = vmatpush3.bf16.xpose.msra.mxu1 %v399_v26  ;;  %758 = vmatprep.mubr.msk.bf16.mxu1 %vm830_vm0, %v829_v0 }
 0x2a6   : > { %768 = vmatprep.subr.bf16.mxu1 %v829_v0 }
 0x2ac   : > { %759 = vmatmul.mubr.msk.bf16.vlgmr.msra.gmra.mrb[8].mxu1 %vm169_vm1, %v392_v28 }
 0x2ad   : > { %769 = vmatpush3.bf16.xpose.msra.mxu1 %v509_v29  ;;  %770 = vmatprep.mubr.msk.bf16.mxu1 %vm830_vm0, %v829_v0 }
 0x2b4   : > { %771 = vmatmul.mubr.msk.bf16.vlgmr.msra.gmra.mrb[12].mxu1 %vm169_vm1, %v502_v30 }
 0x36f   : > { %v917_v31 = vpop.f32.mrb[0].mxu1 }
 0x370   : > { %v742_v32 = vpop.f32.mrb[1].mxu1 }
 0x371   : > { %v275_v33 = vpop.f32.mrb[2].mxu1 }
 0x372   : > { %v743_v34 = vpop.f32.mrb[3].mxu1 }
 0x377   : > { %v325_v35 = vpop.f32.mrb[4].mxu1 }
 0x378   : > { %v748_v36 = vpop.f32.mrb[5].mxu1  ;;  %v331_v37 = vsel %vm216_vm2, %v325_v35, -inf }
 0x379   : > { %332 = vmax.xlane.f32.xlu1 %v331_v37  ;;  %v328_v38 = vpop.f32.mrb[6].mxu1 }
 0x37a   : > { %v749_v39 = vpop.f32.mrb[7].mxu1 }
 0x37f   : > { %v435_v40 = vpop.f32.mrb[8].mxu1 }
 0x380   : > { %v441_v41 = vsel %vm216_vm2, %v435_v40, -inf  ;;  %v760_v42 = vpop.f32.mrb[9].mxu1 }
 0x381   : > { %442 = vmax.xlane.f32.xlu0 %v441_v41  ;;  %v438_v43 = vpop.f32.mrb[10].mxu1 }
 0x382   : > { %v761_v44 = vpop.f32.mrb[11].mxu1 }
 0x387   : > { %v545_v45 = vpop.f32.mrb[12].mxu1 }
 0x388   : > { %v551_v46 = vsel %vm216_vm2, %v545_v45, -inf  ;;  %v772_v47 = vpop.f32.mrb[13].mxu1 }
 0x389   : > { %552 = vmax.xlane.f32.xlu1 %v551_v46  ;;  %v548_v48 = vpop.f32.mrb[14].mxu1 }
 0x38a   : > { %v773_v49 = vpop.f32.mrb[15].mxu1 }
 0x406   : > { %v333_v50 = vpop.xlane.xlu1 %332 }
 0x407   : > { %v334_v51 = vsub.f32 %v325_v35, %v333_v50 }
 0x409   : > { %v335_v52 = vmul.f32 1.442695, %v334_v51 }
 0x40b   : > { %809 = vpow2.f32 %v335_v52 }
 0x40e   : > { %v443_v60 = vpop.xlane.xlu0 %442 }
 0x40f   : > { %v444_v61 = vsub.f32 %v435_v40, %v443_v60 }
 0x411   : > { %v445_v62 = vmul.f32 1.442695, %v444_v61 }
 0x415   : > { %v810_v53 = vpop.eup %809 }
 0x416   : > { %v553_v54 = vpop.xlane.xlu1 %552  ;;  %v337_v55 = vsel %vm216_vm2, %v810_v53, 0.0 }
 0x417   : > { %v554_v56 = vsub.f32 %v545_v45, %v553_v54  ;;  %338 = vadd.xlane.f32.xlu1 %v337_v55 }
 0x419   : > { %v555_v57 = vmul.f32 1.442695, %v554_v56 }
 0x41b   : > { %811 = vpow2.f32 %v555_v57 }
 0x41c   : > { %813 = vpow2.f32 %v445_v62 }
 0x425   : > { %v812_v58 = vpop.eup %811 }
 0x426   : > { %v557_v59 = vsel %vm216_vm2, %v812_v58, 0.0  ;;  %v814_v63 = vpop.eup %813 }
 0x427   : > { %558 = vadd.xlane.f32.xlu0 %v557_v59  ;;  %v447_v2 = vsel %vm216_vm2, %v814_v63, 0.0 }
 0x428   : > { %343 = vrot.lane.b32.xlu1 %v880_v1, %s839_s27 }
 0x43d   : > { %453 = vrot.lane.b32.xlu0 %v880_v1, %s840_s28 }
 0x44c   : > { %448 = vadd.xlane.f32.xlu1 %v447_v2 }
 0x45d   : > { %563 = vrot.lane.b32.xlu1 %v880_v1, %s841_s29 }
 0x4a4   : > { %v339_v3 = vpop.xlane.xlu1 %338 }
 0x4a5   : > { %815 = vrcp.f32 %v339_v3 }
 0x4a8   : > { %v344_v4 = vpop.permute.xlu1 %343 }
 0x4a9   : > { %v349_v5 = vsel %vm234_vm3, %v344_v4, 0 }
 0x4aa   : > { %751 = vmatpush3.bf16.msra.mxu0 %v349_v5 }
 0x4ab   : > { %762 = vmatprep.subr.bf16.mxu0 %v829_v0 }
 0x4af   : > { %v816_v6 = vpop.eup %815 }
 0x4b0   : > { %v341_v7 = vmul.f32 %v816_v6, %v810_v53 }
 0x4b2   : > { %v342_v8 = vpack.c.bf16 %v341_v7, %v341_v7 }
 0x4b4   : > { %753 = vmatmul.mubr.msk.bf16.vlgmr.msra.gmra.mrb[4].mxu0 %vm216_vm2, %v342_v8  ;;  %v559_v9 = vpop.xlane.xlu0 %558 }
 0x4b5   : > { %764 = vmatprep.mubr.msk.bf16.mxu0 %vm830_vm0, %v829_v0 }
 0x4b8   : > { %v454_v10 = vpop.permute.xlu0 %453 }
 0x4b9   : > { %v459_v1 = vsel %vm234_vm3, %v454_v10, 0 }
 0x4ba   : > { %763 = vmatpush3.bf16.msra.mxu0 %v459_v1 }
 0x4bb   : > { %774 = vmatprep.subr.bf16.mxu0 %v829_v0 }
 0x4d9   : > { %v449_v11 = vpop.xlane.xlu1 %448 }
 0x4da   : > { %817 = vrcp.f32 %v449_v11 }
 0x4db   : > { %819 = vrcp.f32 %v559_v9 }
 0x4dd   : > { %v564_v13 = vpop.permute.xlu1 %563 }
 0x4de   : > { %v569_v15 = vsel %vm234_vm3, %v564_v13, 0 }
 0x4e4   : > { %v818_v12 = vpop.eup %817 }
 0x4e5   : > { %v451_v14 = vmul.f32 %v818_v12, %v814_v63  ;;  %v820_v17 = vpop.eup %819 }
 0x4e6   : > { %v561_v18 = vmul.f32 %v820_v17, %v812_v58 }
 0x4e7   : > { %v452_v16 = vpack.c.bf16 %v451_v14, %v451_v14 }
 0x4e8   : > { %v562_v19 = vpack.c.bf16 %v561_v18, %v561_v18 }
 0x4e9   : > { %765 = vmatmul.mubr.msk.bf16.vlgmr.msra.gmra.mrb[8].mxu0 %vm216_vm2, %v452_v16 }
 0x4ea   : > { %775 = vmatpush3.bf16.msra.mxu0 %v569_v15  ;;  %776 = vmatprep.mubr.msk.bf16.mxu0 %vm830_vm0, %v829_v0 }
 0x4f1   : > { %777 = vmatmul.mubr.msk.bf16.vlgmr.msra.gmra.mrb[12].mxu0 %vm216_vm2, %v562_v19 }
 0x587   : > { %v385_v20 = vpop.f32.mrb[4].mxu0 }
 0x588   : > { %612 = vrot.lane.b32.xlu1 %v385_v20, %s842_s30  ;;  %v754_v21 = vpop.f32.mrb[5].mxu0 }
 0x589   : > { %v388_v22 = vpop.f32.mrb[6].mxu0 }
 0x58a   : > { %v755_v23 = vpop.f32.mrb[7].mxu0 }
 0x5bc   : > { %v495_v24 = vpop.f32.mrb[8].mxu0 }
 0x5bd   : > { %616 = vrot.lane.b32.xlu0 %v495_v24, %s843_s3  ;;  %v766_v25 = vpop.f32.mrb[9].mxu0 }
 0x5be   : > { %v498_v26 = vpop.f32.mrb[10].mxu0 }
 0x5bf   : > { %v767_v27 = vpop.f32.mrb[11].mxu0 }
 0x5c4   : > { %v605_v28 = vpop.f32.mrb[12].mxu0 }
 0x5c5   : > { %620 = vrot.lane.b32.xlu1 %v605_v28, %s844_s4  ;;  %v778_v0 = vpop.f32.mrb[13].mxu0 }
 0x5c6   : > { %v608_v29 = vpop.f32.mrb[14].mxu0 }
 0x5c7   : > { %v779_v30 = vpop.f32.mrb[15].mxu0 }
 0x5fa   : > { %v613_v32 = vpop.permute.xlu1 %612 }
 0x5fb   : > { %v623_v34 = vsel %vm169_vm1, %v917_v31, %v613_v32 }
 0x62f   : > { %v617_v33 = vpop.permute.xlu0 %616 }
 0x630   : > { %v625_v35 = vsel %vm624_vm4, %v623_v34, %v617_v33 }
 0x637   : > { %v621_v36 = vpop.permute.xlu1 %620 }
 0x638   : > { %v627_v37 = vsel %vm626_vm5, %v625_v35, %v621_v36 }
 0x639   : > { %v628_v38 = vpack.c.bf16 %v627_v37, %v627_v37 }
 0x63b   : > { %630 = vst.msk [vmem:[%s155_s7] sm:$0xf] %vm629_vm6, %v628_v38 }
 0x63c PF: > { %s12_s9 = sadd.s32 1, %s827_s9  }
 0x63d   : > { %p9_p4 = scmp.ge.s32.totalorder %s12_s9, 4  }
 0x63f   :  { %11 = sbr.rel (!%p9_p4) target bundleno = 1 (0x1), region = 61 }

// kernel: xtec_forward.54
= control target key start
LH: loop header
LB: loop body
LE: loop exit
PB: predicated region body
PF: predicated region fallthrough
CT: control target
= control target key end

     0   :  { %vm25_vm0 = vcmask 261120   ;;  %v221_v0 = vmov 0.0   ;;  %vm222_vm1 = vmmov 0   ;;  %vm179_vm2 = vcmask 257024   ;;  %s286_s1 = inlined_call_operand.vmem [shape: bf16[32,32], index: 1, kind: input, shape index: {}]   ;;  %s287_s0 = inlined_call_operand.vmem [shape: bf16[16,32], index: 0, kind: input, shape index: {}]   ;;  %s288_s2 = inlined_call_operand.vmem [shape: f32[1,32], index: 2, kind: input, shape index: {}, may-alias: {2,4}]   ;;  %s289_s3 = inlined_call_operand.vmem [shape: f32[1,32], index: 3, kind: input, shape index: {}]   ;;  %s290_s4 = inlined_call_operand.vmem [shape: f32[1,32], index: 4, kind: input, shape index: {}, may-alias: {2,4}]   ;;  %s291_s5 = inlined_call_operand.vmem [shape: bf16[16,32], index: 5, kind: output, shape index: {}]  }
   0x1   :  { %200 = vmatprep.subr.bf16.mxu0 %v221_v0  ;;  %v210_v1 = vld [vmem:[%s286_s1] sm:$0xff]   ;;  %204 = vmatprep.mubr.msk.bf16.mxu0 %vm222_vm1, %v221_v0  ;;  %26 = vst.msk [vmem:[#allocation2] sm:$0xff] %vm25_vm0, %v221_v0  ;;  %27 = vst.msk [vmem:[#allocation2 + $0x8] sm:$0xff] %vm25_vm0, %v221_v0  ;;  %v211_v2 = vld [vmem:[%s286_s1 + $0x8] sm:$0xff]  }
   0x2   :  { %201 = vmatpush3.bf16.msra.mxu0 %v210_v1  ;;  %v212_v3 = vld [vmem:[%s287_s0] sm:$0xff]  }
   0x3   :  { %202 = vmatprep.subr.bf16.mxu0 %v221_v0  ;;  %v190_v12 = vld [vmem:[%s288_s2] ss:$0 sm:$0xff] }
   0x4   :  { %v191_v46 = vld [vmem:[%s289_s3] ss:$0 sm:$0xff] }
   0x5   :  { %v192_v48 = vld [vmem:[%s290_s4] ss:$0 sm:$0xff] }
   0x6   :  { %203 = vmatpush3.bf16.msra.mxu0 %v211_v2 }
   0x8   :  { %v28_v4 = vld [vmem:[#allocation2] sm:$0xff]  ;;  %v29_v6 = vld [vmem:[#allocation2 + $0x8] sm:$0xff] }
   0x9   :  { %205 = vmatmul.mubr.msk.bf16.vlgmr.msra.gmra.mrb[0].mxu0 %vm25_vm0, %v212_v3 }
  0xdc   :  { %v91_v5 = vpop.f32.mrb[0].mxu0 }
  0xdd   :  { %v98_v7 = vadd.f32 %v91_v5, %v28_v4  ;;  %v206_v8 = vpop.f32.mrb[1].mxu0 }
  0xde   :  { %v94_v9 = vpop.f32.mrb[2].mxu0 }
  0xdf   :  { %100 = vst.msk [vmem:[#allocation2] sm:$0xff] %vm25_vm0, %v98_v7  ;;  %v99_v10 = vadd.f32 %v94_v9, %v29_v6  ;;  %v207_v11 = vpop.f32.mrb[3].mxu0 }
  0xe1   :  { %101 = vst.msk [vmem:[#allocation2 + $0x8] sm:$0xff] %vm25_vm0, %v99_v10 }
  0xe6   :  { %v105_v13 = vld [vmem:[#allocation2] sm:$0xff] }
  0xe7   :  { %v116_v14 = vadd.f32 %v190_v12, %v105_v13 }
  0xe8   :  { %v106_v15 = vld [vmem:[#allocation2 + $0x8] sm:$0xff] }
  0xe9   :  { %v120_v16 = vmul.f32 0.70710677, %v116_v14  ;;  %v117_v17 = vadd.f32 %v190_v12, %v106_v15  ;;  %v118_v20 = vmul.f32 0.5, %v116_v14 }
  0xeb   :  { %213 = verf.f32 %v120_v16  ;;  %v121_v18 = vmul.f32 0.70710677, %v117_v17  ;;  %v119_v24 = vmul.f32 0.5, %v117_v17 }
  0xed   :  { %215 = verf.f32 %v121_v18 }
  0xf5   :  { %v214_v19 = vpop.eup %213 }
  0xf6   :  { %v124_v21 = vadd.f32 1.0, %v214_v19 }
  0xf7   :  { %v216_v22 = vpop.eup %215 }
  0xf8   :  { %v126_v23 = vmul.f32 %v124_v21, %v118_v20  ;;  %v125_v25 = vadd.f32 1.0, %v216_v22 }
  0xfa   :  { %v128_v26 = vsel %vm25_vm0, %v126_v23, 0.0  ;;  %v127_v27 = vmul.f32 %v125_v25, %v119_v24 }
  0xfb   :  { %129 = vadd.xlane.f32.xlu0 %v128_v26 }
  0xfc   :  { %v131_v28 = vsel %vm25_vm0, %v127_v27, 0.0 }
  0xff   :  { %132 = vadd.xlane.f32.xlu0 %v131_v28 }
 0x188   :  { %v130_v29 = vpop.xlane.xlu0 %129 }
 0x189   :  { %v135_v30 = vmul.f32 0.03125, %v130_v29 }
 0x18b   :  { %v137_v31 = vsub.f32 %v126_v23, %v135_v30 }
 0x18c   :  { %v133_v32 = vpop.xlane.xlu0 %132 }
 0x18d   :  { %v136_v33 = vmul.f32 0.03125, %v133_v32  ;;  %v139_v34 = vmul.f32 %v137_v31, %v137_v31 }
 0x18f   :  { %v138_v35 = vsub.f32 %v127_v27, %v136_v33  ;;  %v141_v36 = vsel %vm25_vm0, %v139_v34, 0.0 }
 0x190   :  { %142 = vadd.xlane.f32.xlu1 %v141_v36 }
 0x191   :  { %v140_v37 = vmul.f32 %v138_v35, %v138_v35 }
 0x193   :  { %v144_v38 = vsel %vm25_vm0, %v140_v37, 0.0 }
 0x194   :  { %145 = vadd.xlane.f32.xlu1 %v144_v38 }
 0x21d   :  { %v143_v39 = vpop.xlane.xlu1 %142 }
 0x21e   :  { %v147_v40 = vmul.f32 0.03125, %v143_v39 }
 0x220   :  { %v149_v41 = vadd.f32 1e-12, %v147_v40 }
 0x221   :  { %v146_v42 = vpop.xlane.xlu1 %145 }
 0x222   :  { %217 = vrsqrt.f32 %v149_v41  ;;  %v148_v43 = vmul.f32 0.03125, %v146_v42 }
 0x224   :  { %v150_v44 = vadd.f32 1e-12, %v148_v43 }
 0x226   :  { %219 = vrsqrt.f32 %v150_v44 }
 0x22c   :  { %v218_v45 = vpop.eup %217 }
 0x22d   :  { %v153_v47 = vmul.f32 %v218_v45, %v137_v31 }
 0x22f   :  { %v161_v49 = vmul.f32 %v191_v46, %v153_v47 }
 0x230   :  { %v220_v50 = vpop.eup %219 }
 0x231   :  { %v169_v51 = vadd.f32 %v192_v48, %v161_v49  ;;  %v154_v52 = vmul.f32 %v220_v50, %v138_v35 }
 0x233   :  { %v195_v53 = vpack.c.bf16 %v169_v51, %v169_v51  ;;  %v162_v54 = vmul.f32 %v191_v46, %v154_v52 }
 0x235   :  { %180 = vst.msk [vmem:[%s291_s5] sm:$0xf] %vm179_vm2, %v195_v53  ;;  %v170_v55 = vadd.f32 %v192_v48, %v162_v54 }
 0x237   :  { %v196_v56 = vpack.c.bf16 %v170_v55, %v170_v55 }
 0x239   :  { %181 = vst.msk [vmem:[%s291_s5 + $0x4] sm:$0xf] %vm179_vm2, %v196_v56 }

// kernel: xtec_forward.44
= control target key start
LH: loop header
LB: loop body
LE: loop exit
PB: predicated region body
PF: predicated region fallthrough
CT: control target
= control target key end

     0   :  { %vm28_vm0 = vcmask 261120   ;;  %v196_v0 = vmov 0.0   ;;  %vm197_vm1 = vmmov 0   ;;  %vm64_vm2 = vcmask 523264   ;;  %s267_s1 = inlined_call_operand.vmem [shape: bf16[64,32], index: 1, kind: input, shape index: {}]   ;;  %s268_s0 = inlined_call_operand.vmem [shape: bf16[8,64], index: 0, kind: input, shape index: {}]   ;;  %s269_s3 = inlined_call_operand.vmem [shape: bf16[8,32], index: 3, kind: input, shape index: {}]   ;;  %s270_s2 = inlined_call_operand.vmem [shape: f32[1,32], index: 2, kind: input, shape index: {}, may-alias: {2,5}]   ;;  %s271_s4 = inlined_call_operand.vmem [shape: f32[1,32], index: 4, kind: input, shape index: {}]   ;;  %s272_s5 = inlined_call_operand.vmem [shape: f32[1,32], index: 5, kind: input, shape index: {}, may-alias: {2,5}]   ;;  %s273_s6 = inlined_call_operand.vmem [shape: bf16[8,32], index: 6, kind: output, shape index: {}]  }
   0x1   :  { %176 = vmatprep.subr.bf16.mxu0 %v196_v0  ;;  %v190_v1 = vld [vmem:[%s267_s1] sm:$0xff]   ;;  %184 = vmatprep.mubr.msk.bf16.mxu0 %vm197_vm1, %v196_v0  ;;  %29 = vst.msk [vmem:[#allocation2] sm:$0xff] %vm28_vm0, %v196_v0  ;;  %v191_v2 = vld [vmem:[%s267_s1 + $0x8] sm:$0xff]   ;;  %v192_v3 = vld [vmem:[%s267_s1 + $0x10] sm:$0xff]   ;;  %vm157_vm3 = vcmask 257024  }
   0x2   :  { %177 = vmatpush3.bf16.msra.mxu0 %v190_v1  ;;  %v193_v4 = vld [vmem:[%s267_s1 + $0x18] sm:$0xff]   ;;  %v31_v5 = vld [vmem:[%s268_s0] sm:$0xf] }
   0x3   :  { %178 = vmatprep.subr.bf16.mxu0 %v196_v0  ;;  %v116_v12 = vld [vmem:[%s269_s3] sm:$0xf] }
   0x4   :  { %v168_v13 = vld [vmem:[%s270_s2] ss:$0 sm:$0xff]  ;;  %v126_v14 = vunpack.c.l.bf16 %v116_v12 }
   0x5   :  { %v169_v28 = vld [vmem:[%s271_s4] ss:$0 sm:$0xff] }
   0x6   :  { %179 = vmatpush3.bf16.msra.mxu0 %v191_v2  ;;  %v170_v30 = vld [vmem:[%s272_s5] ss:$0 sm:$0xff] }
   0x7   :  { %180 = vmatprep.subr.bf16.mxu0 %v196_v0 }
   0x8   :  { %v30_v6 = vld [vmem:[#allocation2] sm:$0xff] }
   0xa   :  { %181 = vmatpush3.bf16.msra.mxu0 %v192_v3 }
   0xb   :  { %182 = vmatprep.subr.bf16.mxu0 %v196_v0 }
   0xe   :  { %183 = vmatpush3.bf16.msra.mxu0 %v193_v4 }
  0x11   :  { %185 = vmatmul.mubr.msk.bf16.vlgmr.msra.gmra.mrb[0].mxu0 %vm64_vm2, %v31_v5 }
  0xe4   :  { %v102_v7 = vpop.f32.mrb[0].mxu0 }
  0xe5   :  { %v108_v8 = vadd.f32 %v102_v7, %v30_v6  ;;  %v186_v9 = vpop.f32.mrb[1].mxu0 }
  0xe6   :  { %v105_v10 = vpop.f32.mrb[2].mxu0 }
  0xe7   :  { %110 = vst.msk [vmem:[#allocation2] sm:$0xff] %vm28_vm0, %v108_v8  ;;  %v187_v11 = vpop.f32.mrb[3].mxu0 }
  0xee   :  { %v114_v15 = vld [vmem:[#allocation2] sm:$0xff] }
  0xef   :  { %v125_v16 = vadd.f32 %v168_v13, %v114_v15 }
  0xf1   :  { %v127_v17 = vadd.f32 %v126_v14, %v125_v16 }
  0xf3   :  { %v128_v18 = vsel %vm28_vm0, %v127_v17, 0.0 }
  0xf4   :  { %129 = vadd.xlane.f32.xlu0 %v128_v18 }
 0x181   :  { %v130_v19 = vpop.xlane.xlu0 %129 }
 0x182   :  { %v132_v20 = vmul.f32 0.03125, %v130_v19 }
 0x184   :  { %v133_v21 = vsub.f32 %v127_v17, %v132_v20 }
 0x186   :  { %v134_v22 = vmul.f32 %v133_v21, %v133_v21 }
 0x188   :  { %v135_v23 = vsel %vm28_vm0, %v134_v22, 0.0 }
 0x189   :  { %136 = vadd.xlane.f32.xlu0 %v135_v23 }
 0x216   :  { %v137_v24 = vpop.xlane.xlu0 %136 }
 0x217   :  { %v138_v25 = vmul.f32 0.03125, %v137_v24 }
 0x219   :  { %v139_v26 = vadd.f32 1e-12, %v138_v25 }
 0x21b   :  { %194 = vrsqrt.f32 %v139_v26 }
 0x225   :  { %v195_v27 = vpop.eup %194 }
 0x226   :  { %v141_v29 = vmul.f32 %v195_v27, %v133_v21 }
 0x228   :  { %v148_v31 = vmul.f32 %v169_v28, %v141_v29 }
 0x22a   :  { %v155_v32 = vadd.f32 %v170_v30, %v148_v31 }
 0x22c   :  { %v156_v33 = vpack.c.bf16 %v155_v32, %v155_v32 }
 0x22e   :  { %158 = vst.msk [vmem:[%s273_s6] sm:$0xf] %vm157_vm3, %v156_v33 }

// kernel: xtec_forward.55
= control target key start
LH: loop header
LB: loop body
LE: loop exit
PB: predicated region body
PF: predicated region fallthrough
CT: control target
= control target key end

     0   :  { %vm146_vm0 = vcmask 261120   ;;  %v258_v25 = vlaneseq  ;;  %s445_s1 = inlined_call_operand.vmem [shape: bf16[256,32], index: 1, kind: input, shape index: {}]   ;;  %s446_s0 = inlined_call_operand.vmem [shape: bf16[16,32], index: 0, kind: input, shape index: {}]   ;;  %s447_s2 = inlined_call_operand.vmem [shape: f32[1,256], index: 2, kind: input, shape index: {}]   ;;  %s448_s3 = inlined_call_operand.vmem [shape: f32[16,256], index: 3, kind: output, shape index: {}]  }
   0x1   :  { %v324_v0 = vld [vmem:[%s445_s1 + $0x40] sm:$0xff]   ;;  %v326_v2 = vld [vmem:[%s445_s1 + $0x48] sm:$0xff]   ;;  %v328_v6 = vld [vmem:[%s445_s1 + $0x50] sm:$0xff]  }
   0x2   :  { %v325_v1 = vld [vmem:[%s445_s1] sm:$0xff]   ;;  %316 = vmatprep.subr.msk.bf16.mxu0 %vm146_vm0, %v324_v0  ;;  %v327_v4 = vld [vmem:[%s445_s1 + $0x8] sm:$0xff]   ;;  %v329_v7 = vld [vmem:[%s445_s1 + $0x10] sm:$0xff]   ;;  %v259_v26 = vshrl.u32 %v258_v25, 7 }
   0x3   :  { %v151_v3 = vsel %vm146_vm0, %v325_v1, 0  ;;  %v154_v5 = vsel %vm146_vm0, %v327_v4, 0  ;;  %v340_v8 = vld [vmem:[%s446_s0] sm:$0xff]   ;;  %v157_v9 = vsel %vm146_vm0, %v329_v7, 0  ;;  %v330_v10 = vld [vmem:[%s445_s1 + $0x58] sm:$0xff]   ;;  %v334_v16 = vld [vmem:[%s445_s1 + $0x68] sm:$0xff]  }
   0x4   :  { %299 = vmatpush3.bf16.xpose.msra.mxu0 %v151_v3  ;;  %314 = vmatprep.mubr.msk.bf16.mxu0 %vm146_vm0, %v340_v8  ;;  %v331_v11 = vld [vmem:[%s445_s1 + $0x18] sm:$0xff]   ;;  %v332_v13 = vld [vmem:[%s445_s1 + $0x60] sm:$0xff]   ;;  %v335_v17 = vld [vmem:[%s445_s1 + $0x28] sm:$0xff]   ;;  %v260_v27 = vsub.s32 0, %v259_v26  ;;  %v264_v29 = vsub.s32 1, %v259_v26 }
   0x5   :  { %317 = vmatprep.subr.msk.bf16.mxu0 %vm146_vm0, %v326_v2  ;;  %v160_v12 = vsel %vm146_vm0, %v331_v11, 0  ;;  %v333_v14 = vld [vmem:[%s445_s1 + $0x20] sm:$0xff]   ;;  %v166_v18 = vsel %vm146_vm0, %v335_v17, 0  ;;  %v336_v19 = vld [vmem:[%s445_s1 + $0x70] sm:$0xff]   ;;  %v338_v22 = vld [vmem:[%s445_s1 + $0x78] sm:$0xff]  }
   0x6   :  { %v163_v15 = vsel %vm146_vm0, %v333_v14, 0  ;;  %v337_v20 = vld [vmem:[%s445_s1 + $0x30] sm:$0xff]   ;;  %v339_v23 = vld [vmem:[%s445_s1 + $0x38] sm:$0xff]   ;;  %v256_v28 = vld [vmem:[%s447_s2] sm:$0x3] }
   0x7   :  { %v169_v21 = vsel %vm146_vm0, %v337_v20, 0  ;;  %v172_v24 = vsel %vm146_vm0, %v339_v23, 0  ;;  %v261_v30 = vrot.slane %v256_v28, %v260_v27  ;;  %v265_v31 = vrot.slane %v256_v28, %v264_v29 }
   0xc   :  { %301 = vmatpush3.bf16.xpose.msra.mxu0 %v154_v5 }
   0xd   :  { %318 = vmatprep.subr.msk.bf16.mxu0 %vm146_vm0, %v328_v6 }
  0x14   :  { %303 = vmatpush3.bf16.xpose.msra.mxu0 %v157_v9 }
  0x15   :  { %319 = vmatprep.subr.msk.bf16.mxu0 %vm146_vm0, %v330_v10 }
  0x1c   :  { %305 = vmatpush3.bf16.xpose.msra.mxu0 %v160_v12 }
  0x1d   :  { %320 = vmatprep.subr.msk.bf16.mxu0 %vm146_vm0, %v332_v13 }
  0x24   :  { %307 = vmatpush3.bf16.xpose.msra.mxu0 %v163_v15 }
  0x25   :  { %321 = vmatprep.subr.msk.bf16.mxu0 %vm146_vm0, %v334_v16 }
  0x2c   :  { %309 = vmatpush3.bf16.xpose.msra.mxu0 %v166_v18 }
  0x2d   :  { %322 = vmatprep.subr.msk.bf16.mxu0 %vm146_vm0, %v336_v19 }
  0x34   :  { %311 = vmatpush3.bf16.xpose.msra.mxu0 %v169_v21 }
  0x35   :  { %323 = vmatprep.subr.msk.bf16.mxu0 %vm146_vm0, %v338_v22 }
  0x3c   :  { %313 = vmatpush3.bf16.xpose.msra.mxu0 %v172_v24 }
  0x43   :  { %315 = vmatmul.mubr.msk.bf16.vlgmr.msra.gmra.mrb[0].mxu0 %vm146_vm0, %v340_v8 }
 0x116   :  { %v232_v32 = vpop.f32.mrb[0].mxu0 }
 0x117   :  { %v268_v33 = vadd.f32 %v261_v30, %v232_v32  ;;  %v234_v34 = vpop.f32.mrb[1].mxu0 }
 0x118   :  { %v269_v35 = vadd.f32 %v265_v31, %v234_v34  ;;  %v236_v36 = vpop.f32.mrb[2].mxu0 }
 0x119   :  { %272 = vst [vmem:[%s448_s3] sm:$0xff] %v268_v33  ;;  %v270_v37 = vadd.f32 %v261_v30, %v236_v36  ;;  %v238_v38 = vpop.f32.mrb[3].mxu0 }
 0x11a   :  { %273 = vst [vmem:[%s448_s3 + $0x8] sm:$0xff] %v269_v35  ;;  %v271_v39 = vadd.f32 %v265_v31, %v238_v38 }
 0x11b   :  { %274 = vst [vmem:[%s448_s3 + $0x10] sm:$0xff] %v270_v37 }
 0x11c   :  { %275 = vst [vmem:[%s448_s3 + $0x18] sm:$0xff] %v271_v39 }

</bundles_post_ra>
